<compile_context>
chip_gen: v7x
topology: tpu7x:2x2x1
jax: 0.10.0
libtpu: 0.0.40
codegen_flags: <defaults>
</compile_context>

<pallas_src>
import functools

import jax
import jax.numpy as jnp
import numpy as np
from jax.experimental import pallas as pl
from jax.experimental.pallas import tpu as pltpu

EPS = 1e-5  # BatchNorm2d default eps


# --------------------------------------------------------------------------
# Fused kernel: 4x (3x3 conv as single K=9*Cin matmul + folded BN + ReLU)
#               + spatial mean + 1x1 conv, all VMEM resident.
# --------------------------------------------------------------------------
def _make_fused_kernel(W, n_blocks):
    taps_dydx = [(dy, dx) for dy in (-1, 0, 1) for dx in (-1, 0, 1)]

    def kernel(*refs):
        x_ref, mask_ref = refs[0], refs[1]
        blk_refs = refs[2:2 + 3 * n_blocks]
        sel_ref, w5_ref, b5_ref, o_ref = refs[2 + 3 * n_blocks:]

        M = x_ref.shape[1]
        mask = mask_ref[...]                      # (9, M) f32, 1.0 where tap is valid

        def conv_block(x, w_ref, scale_ref, shift_ref):
            # x: (Cin, M) f32.  Build 9 shifted windows in VMEM (roll along the
            # lane axis + mask), concat along channels and do ONE bf16 MXU matmul
            # with K = 9*Cin; BN+ReLU epilogue in f32.
            taps = []
            for t, (dy, dx) in enumerate(taps_dydx):
                if dy == 0 and dx == 0:
                    taps.append(x)                # center tap: mask is all ones
                else:
                    s = dy * W + dx               # flat-index offset of the tap
                    shifted = pltpu.roll(x, (-s) % M, axis=1)
                    taps.append(shifted * mask[t:t + 1, :])
            slab = jnp.concatenate(taps, axis=0).astype(jnp.bfloat16)   # (9*Cin, M)
            acc = jnp.dot(w_ref[...], slab,
                          preferred_element_type=jnp.float32)            # (Cout, M)
            return jnp.maximum(acc * scale_ref[...] + shift_ref[...], 0.0)

        y = x_ref[...]                            # (C0, M) f32
        for i in range(n_blocks):
            y = conv_block(y, blk_refs[3 * i], blk_refs[3 * i + 1], blk_refs[3 * i + 2])

        # mean over spatial positions first (exact: mean(xW+b) == mean(x)W + b),
        # via a tiny per-batch selector matmul -> (C_last, B), then the 1x1 conv.
        mean_cb = jnp.dot(y, sel_ref[...], preferred_element_type=jnp.float32)
        o_ref[...] = (jnp.dot(w5_ref[...], mean_cb,
                              preferred_element_type=jnp.float32) + b5_ref[...])

    return kernel


# --------------------------------------------------------------------------
# Wrapper: layout prep (C-major activation, folded BN, tap masks, mean selector)
# --------------------------------------------------------------------------
def rpn_head_forward(x_nchw, params):
    """Pallas implementation of RPN_head.forward.  x_nchw: (B, inplanes, H, W)."""
    B, C0, H, W = x_nchw.shape
    HW = H * W
    M = B * HW

    # Activation in channel-on-sublane / position-on-lane layout: (C, M).
    x_cm = jnp.transpose(x_nchw, (1, 0, 2, 3)).reshape(C0, M).astype(jnp.float32)

    # Per-tap validity masks (shared by all conv layers; depend only on (y, x)).
    m_idx = jnp.arange(M)
    yy = (m_idx // W) % H
    xx = m_idx % W
    mask_rows = []
    for dy in (-1, 0, 1):
        for dx in (-1, 0, 1):
            ok = (yy + dy >= 0) & (yy + dy < H) & (xx + dx >= 0) & (xx + dx < W)
            mask_rows.append(ok)
    mask = jnp.stack(mask_rows, axis=0).astype(jnp.float32)          # (9, M)

    # Per-batch spatial-mean selector: sel[m, b] = 1/HW inside image b else 0.
    sel = ((m_idx // HW)[:, None] == jnp.arange(B)[None, :]).astype(jnp.float32) / HW

    flat_inputs = [x_cm, mask]
    total_flops = 0
    for blk in params["blocks"]:
        w_hwio = blk["w_hwio"]                                       # (3, 3, Cin, Cout)
        cin, cout = int(w_hwio.shape[2]), int(w_hwio.shape[3])
        # (Cout, 9*Cin) with tap order matching the kernel's (dy, dx) loop.
        w_cat = jnp.transpose(w_hwio, (3, 0, 1, 2)).reshape(cout, 9 * cin)
        inv_std = blk["gamma"] / jnp.sqrt(blk["var"] + EPS)
        scale = inv_std.reshape(cout, 1).astype(jnp.float32)
        shift = (blk["beta"] + (blk["bias"] - blk["mean"]) * inv_std
                 ).reshape(cout, 1).astype(jnp.float32)
        flat_inputs += [w_cat.astype(jnp.bfloat16), scale, shift]
        total_flops += 2 * M * 9 * cin * cout

    c_last = int(params["w5_io"].shape[0])
    w5_t = jnp.transpose(params["w5_io"], (1, 0)).astype(jnp.float32)  # (4, C_last)
    b5 = params["b5"].reshape(4, 1).astype(jnp.float32)
    flat_inputs += [sel, w5_t, b5]
    total_flops += 2 * c_last * M * B + 2 * 4 * c_last * B

    bytes_accessed = sum(int(np.prod(a.shape)) * np.dtype(a.dtype).itemsize
                         for a in flat_inputs) + 4 * B * 4

    kernel = _make_fused_kernel(W, len(params["blocks"]))
    vmem_spec = pl.BlockSpec(memory_space=pltpu.MemorySpace.VMEM)
    out_t = pl.pallas_call(
        kernel,
        out_shape=jax.ShapeDtypeStruct((4, B), jnp.float32),
        in_specs=[vmem_spec] * len(flat_inputs),
        out_specs=vmem_spec,
        cost_estimate=pl.CostEstimate(flops=int(total_flops), transcendentals=0,
                                      bytes_accessed=int(bytes_accessed)),
    )(*flat_inputs)
    return out_t.T                                                    # (B, 4)


# --------------------------------------------------------------------------
# Deterministic synthetic parameters (PyTorch shapes -> kernel layout)
# --------------------------------------------------------------------------
def make_params(key, inplanes, channel):
    dims = [inplanes, channel, channel // 2, channel // 4, channel // 8]
    blocks = []
    for i in range(4):
        cin, cout = dims[i], dims[i + 1]
        key, kw, kb, kg, kbe, km, kv = jax.random.split(key, 7)
        w_oihw = 0.1 * jax.random.normal(kw, (cout, cin, 3, 3), jnp.float32)
        blocks.append(dict(
            w_hwio=jnp.transpose(w_oihw, (2, 3, 1, 0)),               # HWIO
            bias=0.1 * jax.random.normal(kb, (cout,), jnp.float32),
            gamma=1.0 + 0.1 * jax.random.normal(kg, (cout,), jnp.float32),
            beta=0.1 * jax.random.normal(kbe, (cout,), jnp.float32),
            mean=0.1 * jax.random.normal(km, (cout,), jnp.float32),
            var=1.0 + 0.1 * jnp.abs(jax.random.normal(kv, (cout,), jnp.float32)),
        ))
    key, kw5, kb5 = jax.random.split(key, 3)
    w5_oihw = 0.1 * jax.random.normal(kw5, (4, dims[4], 1, 1), jnp.float32)
    return dict(
        blocks=blocks,
        w5_io=jnp.transpose(w5_oihw[:, :, 0, 0], (1, 0)),             # (Cin, 4)
        b5=0.1 * jax.random.normal(kb5, (4,), jnp.float32),
    )


# --------------------------------------------------------------------------
# Pure-JAX f32 reference (correctness check)
# --------------------------------------------------------------------------
def ref_forward(x_nchw, params):
    y = jnp.transpose(x_nchw, (0, 2, 3, 1))
    for blk in params["blocks"]:
        y = jax.lax.conv_general_dilated(
            y, blk["w_hwio"], window_strides=(1, 1), padding="SAME",
            dimension_numbers=("NHWC", "HWIO", "NHWC")) + blk["bias"]
        y = (y - blk["mean"]) * (blk["gamma"] / jnp.sqrt(blk["var"] + EPS)) + blk["beta"]
        y = jnp.maximum(y, 0.0)
    smap = jnp.einsum("bhwc,co->bhwo", y, params["w5_io"]) + params["b5"]
    return smap.mean(axis=(1, 2))   # == view(b, c, -1).mean(-1)


if __name__ == "__main__":
    B, INPLANES, CHANNEL, H, W = 2, 8, 32, 16, 16   # small shapes, same structure
    key = jax.random.PRNGKey(0)
    key, kx = jax.random.split(key)
    x = jax.random.normal(kx, (B, INPLANES, H, W), jnp.float32)   # NCHW like PyTorch
    params = make_params(key, INPLANES, CHANNEL)

    out = jax.block_until_ready(rpn_head_forward(x, params))      # (B, 4)
    ref = jax.block_until_ready(ref_forward(x, params))

    assert out.shape == (B, 4), out.shape
    # bf16 MXU inputs with f32 accumulation -> slightly relaxed atol vs pure f32.
    np.testing.assert_allclose(np.asarray(out), np.asarray(ref), rtol=5e-2, atol=2e-2)
    print("KERNEL_OK")
</pallas_src>

<mosaic_0001>
module attributes {stable_mosaic.version = 11 : i64} {
  func.func @kernel(%arg0: memref<8x512xf32, #tpu.memory_space<vmem>>, %arg1: memref<9x512xf32, #tpu.memory_space<vmem>>, %arg2: memref<32x72xbf16, #tpu.memory_space<vmem>>, %arg3: memref<32x1xf32, #tpu.memory_space<vmem>>, %arg4: memref<32x1xf32, #tpu.memory_space<vmem>>, %arg5: memref<16x288xbf16, #tpu.memory_space<vmem>>, %arg6: memref<16x1xf32, #tpu.memory_space<vmem>>, %arg7: memref<16x1xf32, #tpu.memory_space<vmem>>, %arg8: memref<8x144xbf16, #tpu.memory_space<vmem>>, %arg9: memref<8x1xf32, #tpu.memory_space<vmem>>, %arg10: memref<8x1xf32, #tpu.memory_space<vmem>>, %arg11: memref<4x72xbf16, #tpu.memory_space<vmem>>, %arg12: memref<4x1xf32, #tpu.memory_space<vmem>>, %arg13: memref<4x1xf32, #tpu.memory_space<vmem>>, %arg14: memref<512x2xf32, #tpu.memory_space<vmem>>, %arg15: memref<4x4xf32, #tpu.memory_space<vmem>>, %arg16: memref<4x1xf32, #tpu.memory_space<vmem>>, %arg17: memref<4x2xf32, #tpu.memory_space<vmem>>) attributes {dimension_semantics = [], scalar_prefetch = 0 : i64, scratch_operands = 0 : i64, tpu.core_type = #tpu.core_type<tc>} {
    %c0 = arith.constant 0 : index
    %c0_0 = arith.constant 0 : index
    %0 = vector.load %arg1[%c0, %c0_0] : memref<9x512xf32, #tpu.memory_space<vmem>>, vector<9x512xf32>
    %c0_1 = arith.constant 0 : index
    %c0_2 = arith.constant 0 : index
    %1 = vector.load %arg0[%c0_1, %c0_2] : memref<8x512xf32, #tpu.memory_space<vmem>>, vector<8x512xf32>
    %c17_i32 = arith.constant 17 : i32
    %2 = tpu.dynamic_rotate %1 by %c17_i32 dim 1 : vector<8x512xf32>, i32 -> vector<8x512xf32>
    %3 = vector.extract_strided_slice %0 {offsets = [0, 0], sizes = [1, 512], strides = [1, 1]} : vector<9x512xf32> to vector<1x512xf32>
    %4 = vector.broadcast %3 : vector<1x512xf32> to vector<8x512xf32>
    %5 = arith.mulf %2, %4 : vector<8x512xf32>
    %c16_i32 = arith.constant 16 : i32
    %6 = tpu.dynamic_rotate %1 by %c16_i32 dim 1 : vector<8x512xf32>, i32 -> vector<8x512xf32>
    %7 = vector.extract_strided_slice %0 {offsets = [1, 0], sizes = [1, 512], strides = [1, 1]} : vector<9x512xf32> to vector<1x512xf32>
    %8 = vector.broadcast %7 : vector<1x512xf32> to vector<8x512xf32>
    %9 = arith.mulf %6, %8 : vector<8x512xf32>
    %c15_i32 = arith.constant 15 : i32
    %10 = tpu.dynamic_rotate %1 by %c15_i32 dim 1 : vector<8x512xf32>, i32 -> vector<8x512xf32>
    %11 = vector.extract_strided_slice %0 {offsets = [2, 0], sizes = [1, 512], strides = [1, 1]} : vector<9x512xf32> to vector<1x512xf32>
    %12 = vector.broadcast %11 : vector<1x512xf32> to vector<8x512xf32>
    %13 = arith.mulf %10, %12 : vector<8x512xf32>
    %c1_i32 = arith.constant 1 : i32
    %14 = tpu.dynamic_rotate %1 by %c1_i32 dim 1 : vector<8x512xf32>, i32 -> vector<8x512xf32>
    %15 = vector.extract_strided_slice %0 {offsets = [3, 0], sizes = [1, 512], strides = [1, 1]} : vector<9x512xf32> to vector<1x512xf32>
    %16 = vector.broadcast %15 : vector<1x512xf32> to vector<8x512xf32>
    %17 = arith.mulf %14, %16 : vector<8x512xf32>
    %c511_i32 = arith.constant 511 : i32
    %18 = tpu.dynamic_rotate %1 by %c511_i32 dim 1 : vector<8x512xf32>, i32 -> vector<8x512xf32>
    %19 = vector.extract_strided_slice %0 {offsets = [5, 0], sizes = [1, 512], strides = [1, 1]} : vector<9x512xf32> to vector<1x512xf32>
    %20 = vector.broadcast %19 : vector<1x512xf32> to vector<8x512xf32>
    %21 = arith.mulf %18, %20 : vector<8x512xf32>
    %c497_i32 = arith.constant 497 : i32
    %22 = tpu.dynamic_rotate %1 by %c497_i32 dim 1 : vector<8x512xf32>, i32 -> vector<8x512xf32>
    %23 = vector.extract_strided_slice %0 {offsets = [6, 0], sizes = [1, 512], strides = [1, 1]} : vector<9x512xf32> to vector<1x512xf32>
    %24 = vector.broadcast %23 : vector<1x512xf32> to vector<8x512xf32>
    %25 = arith.mulf %22, %24 : vector<8x512xf32>
    %c496_i32 = arith.constant 496 : i32
    %26 = tpu.dynamic_rotate %1 by %c496_i32 dim 1 : vector<8x512xf32>, i32 -> vector<8x512xf32>
    %27 = vector.extract_strided_slice %0 {offsets = [7, 0], sizes = [1, 512], strides = [1, 1]} : vector<9x512xf32> to vector<1x512xf32>
    %28 = vector.broadcast %27 : vector<1x512xf32> to vector<8x512xf32>
    %29 = arith.mulf %26, %28 : vector<8x512xf32>
    %c495_i32 = arith.constant 495 : i32
    %30 = tpu.dynamic_rotate %1 by %c495_i32 dim 1 : vector<8x512xf32>, i32 -> vector<8x512xf32>
    %31 = vector.extract_strided_slice %0 {offsets = [8, 0], sizes = [1, 512], strides = [1, 1]} : vector<9x512xf32> to vector<1x512xf32>
    %32 = vector.broadcast %31 : vector<1x512xf32> to vector<8x512xf32>
    %33 = arith.mulf %30, %32 : vector<8x512xf32>
    %34 = tpu.concatenate %5, %9, %13, %17, %1, %21, %25, %29, %33 in 0 : vector<8x512xf32>, vector<8x512xf32>, vector<8x512xf32>, vector<8x512xf32>, vector<8x512xf32>, vector<8x512xf32>, vector<8x512xf32>, vector<8x512xf32>, vector<8x512xf32> -> vector<72x512xf32>
    %35 = arith.truncf %34 : vector<72x512xf32> to vector<72x512xbf16>
    %c0_3 = arith.constant 0 : index
    %c0_4 = arith.constant 0 : index
    %36 = vector.load %arg2[%c0_3, %c0_4] : memref<32x72xbf16, #tpu.memory_space<vmem>>, vector<32x72xbf16>
    %cst = arith.constant dense<0.000000e+00> : vector<32x512xf32>
    %37 = tpu.matmul %36, %35, %cst {dimension_numbers = #tpu.dot_dimension_numbers<[1], [0], [0], [1], [0, 0, 1, 1], [], []>} : vector<32x72xbf16>, vector<72x512xbf16>, vector<32x512xf32> -> vector<32x512xf32>
    %c0_5 = arith.constant 0 : index
    %c0_6 = arith.constant 0 : index
    %38 = vector.load %arg3[%c0_5, %c0_6] : memref<32x1xf32, #tpu.memory_space<vmem>>, vector<32x1xf32>
    %39 = vector.broadcast %38 : vector<32x1xf32> to vector<32x512xf32>
    %40 = arith.mulf %37, %39 : vector<32x512xf32>
    %c0_7 = arith.constant 0 : index
    %c0_8 = arith.constant 0 : index
    %41 = vector.load %arg4[%c0_7, %c0_8] : memref<32x1xf32, #tpu.memory_space<vmem>>, vector<32x1xf32>
    %42 = vector.broadcast %41 : vector<32x1xf32> to vector<32x512xf32>
    %43 = arith.addf %40, %42 : vector<32x512xf32>
    %cst_9 = arith.constant 0.000000e+00 : f32
    %44 = vector.broadcast %cst_9 : f32 to vector<32x512xf32>
    %45 = arith.maximumf %43, %44 : vector<32x512xf32>
    %c17_i32_10 = arith.constant 17 : i32
    %46 = tpu.dynamic_rotate %45 by %c17_i32_10 dim 1 : vector<32x512xf32>, i32 -> vector<32x512xf32>
    %47 = vector.extract_strided_slice %0 {offsets = [0, 0], sizes = [1, 512], strides = [1, 1]} : vector<9x512xf32> to vector<1x512xf32>
    %48 = vector.broadcast %47 : vector<1x512xf32> to vector<32x512xf32>
    %49 = arith.mulf %46, %48 : vector<32x512xf32>
    %c16_i32_11 = arith.constant 16 : i32
    %50 = tpu.dynamic_rotate %45 by %c16_i32_11 dim 1 : vector<32x512xf32>, i32 -> vector<32x512xf32>
    %51 = vector.extract_strided_slice %0 {offsets = [1, 0], sizes = [1, 512], strides = [1, 1]} : vector<9x512xf32> to vector<1x512xf32>
    %52 = vector.broadcast %51 : vector<1x512xf32> to vector<32x512xf32>
    %53 = arith.mulf %50, %52 : vector<32x512xf32>
    %c15_i32_12 = arith.constant 15 : i32
    %54 = tpu.dynamic_rotate %45 by %c15_i32_12 dim 1 : vector<32x512xf32>, i32 -> vector<32x512xf32>
    %55 = vector.extract_strided_slice %0 {offsets = [2, 0], sizes = [1, 512], strides = [1, 1]} : vector<9x512xf32> to vector<1x512xf32>
    %56 = vector.broadcast %55 : vector<1x512xf32> to vector<32x512xf32>
    %57 = arith.mulf %54, %56 : vector<32x512xf32>
    %c1_i32_13 = arith.constant 1 : i32
    %58 = tpu.dynamic_rotate %45 by %c1_i32_13 dim 1 : vector<32x512xf32>, i32 -> vector<32x512xf32>
    %59 = vector.extract_strided_slice %0 {offsets = [3, 0], sizes = [1, 512], strides = [1, 1]} : vector<9x512xf32> to vector<1x512xf32>
    %60 = vector.broadcast %59 : vector<1x512xf32> to vector<32x512xf32>
    %61 = arith.mulf %58, %60 : vector<32x512xf32>
    %c511_i32_14 = arith.constant 511 : i32
    %62 = tpu.dynamic_rotate %45 by %c511_i32_14 dim 1 : vector<32x512xf32>, i32 -> vector<32x512xf32>
    %63 = vector.extract_strided_slice %0 {offsets = [5, 0], sizes = [1, 512], strides = [1, 1]} : vector<9x512xf32> to vector<1x512xf32>
    %64 = vector.broadcast %63 : vector<1x512xf32> to vector<32x512xf32>
    %65 = arith.mulf %62, %64 : vector<32x512xf32>
    %c497_i32_15 = arith.constant 497 : i32
    %66 = tpu.dynamic_rotate %45 by %c497_i32_15 dim 1 : vector<32x512xf32>, i32 -> vector<32x512xf32>
    %67 = vector.extract_strided_slice %0 {offsets = [6, 0], sizes = [1, 512], strides = [1, 1]} : vector<9x512xf32> to vector<1x512xf32>
    %68 = vector.broadcast %67 : vector<1x512xf32> to vector<32x512xf32>
    %69 = arith.mulf %66, %68 : vector<32x512xf32>
    %c496_i32_16 = arith.constant 496 : i32
    %70 = tpu.dynamic_rotate %45 by %c496_i32_16 dim 1 : vector<32x512xf32>, i32 -> vector<32x512xf32>
    %71 = vector.extract_strided_slice %0 {offsets = [7, 0], sizes = [1, 512], strides = [1, 1]} : vector<9x512xf32> to vector<1x512xf32>
    %72 = vector.broadcast %71 : vector<1x512xf32> to vector<32x512xf32>
    %73 = arith.mulf %70, %72 : vector<32x512xf32>
    %c495_i32_17 = arith.constant 495 : i32
    %74 = tpu.dynamic_rotate %45 by %c495_i32_17 dim 1 : vector<32x512xf32>, i32 -> vector<32x512xf32>
    %75 = vector.extract_strided_slice %0 {offsets = [8, 0], sizes = [1, 512], strides = [1, 1]} : vector<9x512xf32> to vector<1x512xf32>
    %76 = vector.broadcast %75 : vector<1x512xf32> to vector<32x512xf32>
    %77 = arith.mulf %74, %76 : vector<32x512xf32>
    %78 = tpu.concatenate %49, %53, %57, %61, %45, %65, %69, %73, %77 in 0 : vector<32x512xf32>, vector<32x512xf32>, vector<32x512xf32>, vector<32x512xf32>, vector<32x512xf32>, vector<32x512xf32>, vector<32x512xf32>, vector<32x512xf32>, vector<32x512xf32> -> vector<288x512xf32>
    %79 = arith.truncf %78 : vector<288x512xf32> to vector<288x512xbf16>
    %c0_18 = arith.constant 0 : index
    %c0_19 = arith.constant 0 : index
    %80 = vector.load %arg5[%c0_18, %c0_19] : memref<16x288xbf16, #tpu.memory_space<vmem>>, vector<16x288xbf16>
    %cst_20 = arith.constant dense<0.000000e+00> : vector<16x512xf32>
    %81 = tpu.matmul %80, %79, %cst_20 {dimension_numbers = #tpu.dot_dimension_numbers<[1], [0], [0], [1], [0, 0, 1, 1], [], []>} : vector<16x288xbf16>, vector<288x512xbf16>, vector<16x512xf32> -> vector<16x512xf32>
    %c0_21 = arith.constant 0 : index
    %c0_22 = arith.constant 0 : index
    %82 = vector.load %arg6[%c0_21, %c0_22] : memref<16x1xf32, #tpu.memory_space<vmem>>, vector<16x1xf32>
    %83 = vector.broadcast %82 : vector<16x1xf32> to vector<16x512xf32>
    %84 = arith.mulf %81, %83 : vector<16x512xf32>
    %c0_23 = arith.constant 0 : index
    %c0_24 = arith.constant 0 : index
    %85 = vector.load %arg7[%c0_23, %c0_24] : memref<16x1xf32, #tpu.memory_space<vmem>>, vector<16x1xf32>
    %86 = vector.broadcast %85 : vector<16x1xf32> to vector<16x512xf32>
    %87 = arith.addf %84, %86 : vector<16x512xf32>
    %cst_25 = arith.constant 0.000000e+00 : f32
    %88 = vector.broadcast %cst_25 : f32 to vector<16x512xf32>
    %89 = arith.maximumf %87, %88 : vector<16x512xf32>
    %c17_i32_26 = arith.constant 17 : i32
    %90 = tpu.dynamic_rotate %89 by %c17_i32_26 dim 1 : vector<16x512xf32>, i32 -> vector<16x512xf32>
    %91 = vector.extract_strided_slice %0 {offsets = [0, 0], sizes = [1, 512], strides = [1, 1]} : vector<9x512xf32> to vector<1x512xf32>
    %92 = vector.broadcast %91 : vector<1x512xf32> to vector<16x512xf32>
    %93 = arith.mulf %90, %92 : vector<16x512xf32>
    %c16_i32_27 = arith.constant 16 : i32
    %94 = tpu.dynamic_rotate %89 by %c16_i32_27 dim 1 : vector<16x512xf32>, i32 -> vector<16x512xf32>
    %95 = vector.extract_strided_slice %0 {offsets = [1, 0], sizes = [1, 512], strides = [1, 1]} : vector<9x512xf32> to vector<1x512xf32>
    %96 = vector.broadcast %95 : vector<1x512xf32> to vector<16x512xf32>
    %97 = arith.mulf %94, %96 : vector<16x512xf32>
    %c15_i32_28 = arith.constant 15 : i32
    %98 = tpu.dynamic_rotate %89 by %c15_i32_28 dim 1 : vector<16x512xf32>, i32 -> vector<16x512xf32>
    %99 = vector.extract_strided_slice %0 {offsets = [2, 0], sizes = [1, 512], strides = [1, 1]} : vector<9x512xf32> to vector<1x512xf32>
    %100 = vector.broadcast %99 : vector<1x512xf32> to vector<16x512xf32>
    %101 = arith.mulf %98, %100 : vector<16x512xf32>
    %c1_i32_29 = arith.constant 1 : i32
    %102 = tpu.dynamic_rotate %89 by %c1_i32_29 dim 1 : vector<16x512xf32>, i32 -> vector<16x512xf32>
    %103 = vector.extract_strided_slice %0 {offsets = [3, 0], sizes = [1, 512], strides = [1, 1]} : vector<9x512xf32> to vector<1x512xf32>
    %104 = vector.broadcast %103 : vector<1x512xf32> to vector<16x512xf32>
    %105 = arith.mulf %102, %104 : vector<16x512xf32>
    %c511_i32_30 = arith.constant 511 : i32
    %106 = tpu.dynamic_rotate %89 by %c511_i32_30 dim 1 : vector<16x512xf32>, i32 -> vector<16x512xf32>
    %107 = vector.extract_strided_slice %0 {offsets = [5, 0], sizes = [1, 512], strides = [1, 1]} : vector<9x512xf32> to vector<1x512xf32>
    %108 = vector.broadcast %107 : vector<1x512xf32> to vector<16x512xf32>
    %109 = arith.mulf %106, %108 : vector<16x512xf32>
    %c497_i32_31 = arith.constant 497 : i32
    %110 = tpu.dynamic_rotate %89 by %c497_i32_31 dim 1 : vector<16x512xf32>, i32 -> vector<16x512xf32>
    %111 = vector.extract_strided_slice %0 {offsets = [6, 0], sizes = [1, 512], strides = [1, 1]} : vector<9x512xf32> to vector<1x512xf32>
    %112 = vector.broadcast %111 : vector<1x512xf32> to vector<16x512xf32>
    %113 = arith.mulf %110, %112 : vector<16x512xf32>
    %c496_i32_32 = arith.constant 496 : i32
    %114 = tpu.dynamic_rotate %89 by %c496_i32_32 dim 1 : vector<16x512xf32>, i32 -> vector<16x512xf32>
    %115 = vector.extract_strided_slice %0 {offsets = [7, 0], sizes = [1, 512], strides = [1, 1]} : vector<9x512xf32> to vector<1x512xf32>
    %116 = vector.broadcast %115 : vector<1x512xf32> to vector<16x512xf32>
    %117 = arith.mulf %114, %116 : vector<16x512xf32>
    %c495_i32_33 = arith.constant 495 : i32
    %118 = tpu.dynamic_rotate %89 by %c495_i32_33 dim 1 : vector<16x512xf32>, i32 -> vector<16x512xf32>
    %119 = vector.extract_strided_slice %0 {offsets = [8, 0], sizes = [1, 512], strides = [1, 1]} : vector<9x512xf32> to vector<1x512xf32>
    %120 = vector.broadcast %119 : vector<1x512xf32> to vector<16x512xf32>
    %121 = arith.mulf %118, %120 : vector<16x512xf32>
    %122 = tpu.concatenate %93, %97, %101, %105, %89, %109, %113, %117, %121 in 0 : vector<16x512xf32>, vector<16x512xf32>, vector<16x512xf32>, vector<16x512xf32>, vector<16x512xf32>, vector<16x512xf32>, vector<16x512xf32>, vector<16x512xf32>, vector<16x512xf32> -> vector<144x512xf32>
    %123 = arith.truncf %122 : vector<144x512xf32> to vector<144x512xbf16>
    %c0_34 = arith.constant 0 : index
    %c0_35 = arith.constant 0 : index
    %124 = vector.load %arg8[%c0_34, %c0_35] : memref<8x144xbf16, #tpu.memory_space<vmem>>, vector<8x144xbf16>
    %cst_36 = arith.constant dense<0.000000e+00> : vector<8x512xf32>
    %125 = tpu.matmul %124, %123, %cst_36 {dimension_numbers = #tpu.dot_dimension_numbers<[1], [0], [0], [1], [0, 0, 1, 1], [], []>} : vector<8x144xbf16>, vector<144x512xbf16>, vector<8x512xf32> -> vector<8x512xf32>
    %c0_37 = arith.constant 0 : index
    %c0_38 = arith.constant 0 : index
    %126 = vector.load %arg9[%c0_37, %c0_38] : memref<8x1xf32, #tpu.memory_space<vmem>>, vector<8x1xf32>
    %127 = vector.broadcast %126 : vector<8x1xf32> to vector<8x512xf32>
    %128 = arith.mulf %125, %127 : vector<8x512xf32>
    %c0_39 = arith.constant 0 : index
    %c0_40 = arith.constant 0 : index
    %129 = vector.load %arg10[%c0_39, %c0_40] : memref<8x1xf32, #tpu.memory_space<vmem>>, vector<8x1xf32>
    %130 = vector.broadcast %129 : vector<8x1xf32> to vector<8x512xf32>
    %131 = arith.addf %128, %130 : vector<8x512xf32>
    %cst_41 = arith.constant 0.000000e+00 : f32
    %132 = vector.broadcast %cst_41 : f32 to vector<8x512xf32>
    %133 = arith.maximumf %131, %132 : vector<8x512xf32>
    %c17_i32_42 = arith.constant 17 : i32
    %134 = tpu.dynamic_rotate %133 by %c17_i32_42 dim 1 : vector<8x512xf32>, i32 -> vector<8x512xf32>
    %135 = vector.extract_strided_slice %0 {offsets = [0, 0], sizes = [1, 512], strides = [1, 1]} : vector<9x512xf32> to vector<1x512xf32>
    %136 = vector.broadcast %135 : vector<1x512xf32> to vector<8x512xf32>
    %137 = arith.mulf %134, %136 : vector<8x512xf32>
    %c16_i32_43 = arith.constant 16 : i32
    %138 = tpu.dynamic_rotate %133 by %c16_i32_43 dim 1 : vector<8x512xf32>, i32 -> vector<8x512xf32>
    %139 = vector.extract_strided_slice %0 {offsets = [1, 0], sizes = [1, 512], strides = [1, 1]} : vector<9x512xf32> to vector<1x512xf32>
    %140 = vector.broadcast %139 : vector<1x512xf32> to vector<8x512xf32>
    %141 = arith.mulf %138, %140 : vector<8x512xf32>
    %c15_i32_44 = arith.constant 15 : i32
    %142 = tpu.dynamic_rotate %133 by %c15_i32_44 dim 1 : vector<8x512xf32>, i32 -> vector<8x512xf32>
    %143 = vector.extract_strided_slice %0 {offsets = [2, 0], sizes = [1, 512], strides = [1, 1]} : vector<9x512xf32> to vector<1x512xf32>
    %144 = vector.broadcast %143 : vector<1x512xf32> to vector<8x512xf32>
    %145 = arith.mulf %142, %144 : vector<8x512xf32>
    %c1_i32_45 = arith.constant 1 : i32
    %146 = tpu.dynamic_rotate %133 by %c1_i32_45 dim 1 : vector<8x512xf32>, i32 -> vector<8x512xf32>
    %147 = vector.extract_strided_slice %0 {offsets = [3, 0], sizes = [1, 512], strides = [1, 1]} : vector<9x512xf32> to vector<1x512xf32>
    %148 = vector.broadcast %147 : vector<1x512xf32> to vector<8x512xf32>
    %149 = arith.mulf %146, %148 : vector<8x512xf32>
    %c511_i32_46 = arith.constant 511 : i32
    %150 = tpu.dynamic_rotate %133 by %c511_i32_46 dim 1 : vector<8x512xf32>, i32 -> vector<8x512xf32>
    %151 = vector.extract_strided_slice %0 {offsets = [5, 0], sizes = [1, 512], strides = [1, 1]} : vector<9x512xf32> to vector<1x512xf32>
    %152 = vector.broadcast %151 : vector<1x512xf32> to vector<8x512xf32>
    %153 = arith.mulf %150, %152 : vector<8x512xf32>
    %c497_i32_47 = arith.constant 497 : i32
    %154 = tpu.dynamic_rotate %133 by %c497_i32_47 dim 1 : vector<8x512xf32>, i32 -> vector<8x512xf32>
    %155 = vector.extract_strided_slice %0 {offsets = [6, 0], sizes = [1, 512], strides = [1, 1]} : vector<9x512xf32> to vector<1x512xf32>
    %156 = vector.broadcast %155 : vector<1x512xf32> to vector<8x512xf32>
    %157 = arith.mulf %154, %156 : vector<8x512xf32>
    %c496_i32_48 = arith.constant 496 : i32
    %158 = tpu.dynamic_rotate %133 by %c496_i32_48 dim 1 : vector<8x512xf32>, i32 -> vector<8x512xf32>
    %159 = vector.extract_strided_slice %0 {offsets = [7, 0], sizes = [1, 512], strides = [1, 1]} : vector<9x512xf32> to vector<1x512xf32>
    %160 = vector.broadcast %159 : vector<1x512xf32> to vector<8x512xf32>
    %161 = arith.mulf %158, %160 : vector<8x512xf32>
    %c495_i32_49 = arith.constant 495 : i32
    %162 = tpu.dynamic_rotate %133 by %c495_i32_49 dim 1 : vector<8x512xf32>, i32 -> vector<8x512xf32>
    %163 = vector.extract_strided_slice %0 {offsets = [8, 0], sizes = [1, 512], strides = [1, 1]} : vector<9x512xf32> to vector<1x512xf32>
    %164 = vector.broadcast %163 : vector<1x512xf32> to vector<8x512xf32>
    %165 = arith.mulf %162, %164 : vector<8x512xf32>
    %166 = tpu.concatenate %137, %141, %145, %149, %133, %153, %157, %161, %165 in 0 : vector<8x512xf32>, vector<8x512xf32>, vector<8x512xf32>, vector<8x512xf32>, vector<8x512xf32>, vector<8x512xf32>, vector<8x512xf32>, vector<8x512xf32>, vector<8x512xf32> -> vector<72x512xf32>
    %167 = arith.truncf %166 : vector<72x512xf32> to vector<72x512xbf16>
    %c0_50 = arith.constant 0 : index
    %c0_51 = arith.constant 0 : index
    %168 = vector.load %arg11[%c0_50, %c0_51] : memref<4x72xbf16, #tpu.memory_space<vmem>>, vector<4x72xbf16>
    %cst_52 = arith.constant dense<0.000000e+00> : vector<4x512xf32>
    %169 = tpu.matmul %168, %167, %cst_52 {dimension_numbers = #tpu.dot_dimension_numbers<[1], [0], [0], [1], [0, 0, 1, 1], [], []>} : vector<4x72xbf16>, vector<72x512xbf16>, vector<4x512xf32> -> vector<4x512xf32>
    %c0_53 = arith.constant 0 : index
    %c0_54 = arith.constant 0 : index
    %170 = vector.load %arg12[%c0_53, %c0_54] : memref<4x1xf32, #tpu.memory_space<vmem>>, vector<4x1xf32>
    %171 = vector.broadcast %170 : vector<4x1xf32> to vector<4x512xf32>
    %172 = arith.mulf %169, %171 : vector<4x512xf32>
    %c0_55 = arith.constant 0 : index
    %c0_56 = arith.constant 0 : index
    %173 = vector.load %arg13[%c0_55, %c0_56] : memref<4x1xf32, #tpu.memory_space<vmem>>, vector<4x1xf32>
    %174 = vector.broadcast %173 : vector<4x1xf32> to vector<4x512xf32>
    %175 = arith.addf %172, %174 : vector<4x512xf32>
    %cst_57 = arith.constant 0.000000e+00 : f32
    %176 = vector.broadcast %cst_57 : f32 to vector<4x512xf32>
    %177 = arith.maximumf %175, %176 : vector<4x512xf32>
    %c0_58 = arith.constant 0 : index
    %c0_59 = arith.constant 0 : index
    %178 = vector.load %arg14[%c0_58, %c0_59] : memref<512x2xf32, #tpu.memory_space<vmem>>, vector<512x2xf32>
    %cst_60 = arith.constant dense<0.000000e+00> : vector<4x2xf32>
    %179 = tpu.matmul %177, %178, %cst_60 {dimension_numbers = #tpu.dot_dimension_numbers<[1], [0], [0], [1], [0, 0, 1, 1], [], []>} : vector<4x512xf32>, vector<512x2xf32>, vector<4x2xf32> -> vector<4x2xf32>
    %c0_61 = arith.constant 0 : index
    %c0_62 = arith.constant 0 : index
    %180 = vector.load %arg15[%c0_61, %c0_62] : memref<4x4xf32, #tpu.memory_space<vmem>>, vector<4x4xf32>
    %cst_63 = arith.constant dense<0.000000e+00> : vector<4x2xf32>
    %181 = tpu.matmul %180, %179, %cst_63 {dimension_numbers = #tpu.dot_dimension_numbers<[1], [0], [0], [1], [0, 0, 1, 1], [], []>} : vector<4x4xf32>, vector<4x2xf32>, vector<4x2xf32> -> vector<4x2xf32>
    %c0_64 = arith.constant 0 : index
    %c0_65 = arith.constant 0 : index
    %182 = vector.load %arg16[%c0_64, %c0_65] : memref<4x1xf32, #tpu.memory_space<vmem>>, vector<4x1xf32>
    %183 = vector.broadcast %182 : vector<4x1xf32> to vector<4x2xf32>
    %184 = arith.addf %181, %183 : vector<4x2xf32>
    %c0_66 = arith.constant 0 : index
    %c0_67 = arith.constant 0 : index
    %185 = vector.load %arg17[%c0_66, %c0_67] : memref<4x2xf32, #tpu.memory_space<vmem>>, vector<4x2xf32>
    tpu.vector_store %arg17[%c0_66, %c0_67], %184 {strides = array<i32>} : memref<4x2xf32, #tpu.memory_space<vmem>>, vector<4x2xf32>,
    return
  }
}

</mosaic_0001>

<bundles_post_ra>
// kernel: tpu_custom_call.1
= control target key start
LH: loop header
LB: loop body
LE: loop exit
PB: predicated region body
PF: predicated region fallthrough
CT: control target
= control target key end

     0   :  { %s2596_s29 = smov 17   ;;  %s2598_s20 = smov 15   ;;  %v5310_v4 = vmov 0   ;;  %v77_v13 = vlaneseq  ;;  %vm376_vm8 = vcmask 1043456   ;;  %vm369_vm9 = vcmask 588800   ;;  %s5284_s0 = inlined_call_operand.vmem [shape: f32[8,512], index: 0, kind: input, shape index: {}]   ;;  %s5285_s2 = inlined_call_operand.vmem [shape: bf16[32,72], index: 2, kind: input, shape index: {}]   ;;  %s5286_s3 = inlined_call_operand.vmem [shape: f32[32,1], index: 3, kind: input, shape index: {}]   ;;  %s5287_s4 = inlined_call_operand.vmem [shape: f32[32,1], index: 4, kind: input, shape index: {}]   ;;  %s5288_s1 = inlined_call_operand.vmem [shape: f32[9,512], index: 1, kind: input, shape index: {}]   ;;  %s5289_s5 = inlined_call_operand.vmem [shape: bf16[16,288], index: 5, kind: input, shape index: {}]   ;;  %s5290_s6 = inlined_call_operand.vmem [shape: f32[16,1], index: 6, kind: input, shape index: {}]   ;;  %s5291_s7 = inlined_call_operand.vmem [shape: f32[16,1], index: 7, kind: input, shape index: {}]   ;;  %s5292_s8 = inlined_call_operand.vmem [shape: bf16[8,144], index: 8, kind: input, shape index: {}]   ;;  %s5293_s9 = inlined_call_operand.vmem [shape: f32[8,1], index: 9, kind: input, shape index: {}]   ;;  %s5294_s10 = inlined_call_operand.vmem [shape: f32[8,1], index: 10, kind: input, shape index: {}]   ;;  %s5295_s12 = inlined_call_operand.vmem [shape: f32[4,1], index: 12, kind: input, shape index: {}]   ;;  %s5296_s13 = inlined_call_operand.vmem [shape: f32[4,1], index: 13, kind: input, shape index: {}]   ;;  %s5297_s16 = inlined_call_operand.vmem [shape: f32[4,1], index: 16, kind: input, shape index: {}]   ;;  %s5298_s14 = inlined_call_operand.vmem [shape: f32[512,2], index: 14, kind: input, shape index: {}]   ;;  %s5299_s11 = inlined_call_operand.vmem [shape: bf16[4,72], index: 11, kind: input, shape index: {}]   ;;  %s5300_s15 = inlined_call_operand.vmem [shape: f32[4,4], index: 15, kind: input, shape index: {}]   ;;  %s5301_s17 = inlined_call_operand.vmem [shape: f32[4,2], index: 17, kind: output, shape index: {}]  }
   0x1   :  { %5441 = sst [smem:[#allocation82_spill]] %s5284_s0  ;;  %s2599_s21 = smov 1   ;;  %421 = vmatprep.mubr.bf16.mxu0 %v5310_v4  ;;  %474 = vmatprep.mubr.bf16.mxu1 %v5310_v4  ;;  %v496_v5 = vld [vmem:[%s5286_s3 + $0x8] sm:$0xff]  ;;  %v495_v6 = vld [vmem:[%s5286_s3] sm:$0xff]  ;;  %v497_v9 = vld [vmem:[%s5286_s3 + $0x10] sm:$0xff]  ;;  %vm1194_vm10 = vcmask 261120  }
   0x2   :  { %5442 = sst [smem:[#allocation83_spill]] %s5285_s2  ;;  %s5443_s26 = sld [smem:[#allocation82_spill]]  ;;  %2579 = vset.pattern.permute.xlu1 %v5310_v4  ;;  %2578 = vset.pattern.permute.xlu0 %v5310_v4  ;;  %v535_v7 = vld [vmem:[%s5287_s4] sm:$0xff]  ;;  %v536_v8 = vld [vmem:[%s5287_s4 + $0x8] sm:$0xff]  ;;  %v498_v10 = vld [vmem:[%s5286_s3 + $0x18] sm:$0xff]  ;;  %v2809_v14 = vshrl.u32 %v77_v13, 7 }
   0x3   :  { %s2597_s2 = smov 16   ;;  %s2600_s22 = smov 127   ;;  %v537_v11 = vld [vmem:[%s5287_s4 + $0x10] sm:$0xff]  ;;  %v538_v12 = vld [vmem:[%s5287_s4 + $0x18] sm:$0xff]  ;;  %v2811_v17 = vand.u32 127, %v77_v13  ;;  %v2818_v20 = vld [vmem:[%s5288_s1 + $0x8] sm:$0xff] }
   0x4   :  { %s5308_s23 = smov 113   ;;  %s5304_s24 = smov 112   ;;  %v86_v18 = vsub.s32 0, %v2809_v14  ;;  %v119_v19 = vsub.s32 1, %v2809_v14  ;;  %v2824_v23 = vld [vmem:[%s5288_s1] sm:$0xff]  ;;  %v2829_v24 = vld [vmem:[%s5288_s1 + $0x18] sm:$0xff] }
   0x5   :  { %s5306_s25 = smov 111   ;;  %vm79_vm0 = vcmp.lt.s32.totalorder %v2811_v17, 17  ;;  %vm112_vm1 = vcmp.lt.s32.totalorder %v2811_v17, 16  ;;  %v2841_v27 = vld [vmem:[%s5288_s1 + $0x10] sm:$0xff]  ;;  %v152_v60 = vsub.s32 2, %v2809_v14  ;;  %v185_v61 = vsub.s32 3, %v2809_v14 }
   0x6   :  { %v2833_v25 = vrot.slane %v2818_v20, %v86_v18  ;;  %v2836_v26 = vrot.slane %v2818_v20, %v119_v19  ;;  %v2846_v31 = vrot.slane %v2824_v23, %v86_v18  ;;  %v2849_v32 = vrot.slane %v2824_v23, %v119_v19  ;;  %s5467_s0 = smov 113   ;;  %s5468_s30 = smov 112  }
   0x7   :  { %v2852_v33 = vrot.slane %v2829_v24, %v86_v18  ;;  %v2859_v36 = vrot.slane %v2829_v24, %v119_v19  ;;  %v2862_v37 = vrot.slane %v2841_v27, %v86_v18  ;;  %v2869_v41 = vrot.slane %v2841_v27, %v119_v19  ;;  %s5469_s18 = smov 111  }
   0x8   :  { %v2700_v0 = vld [vmem:[%s5443_s26 + $0x10] sm:$0xff]  ;;  %v2705_v1 = vld [vmem:[%s5443_s26] sm:$0xff]  ;;  %v2714_v2 = vld [vmem:[%s5443_s26 + $0x18] sm:$0xff]  ;;  %5444 = vst [vmem:[#allocation2_spill] sm:$0xff] %v2833_v25  ;;  %vm145_vm2 = vcmp.lt.s32.totalorder %v2811_v17, 15  ;;  %vm178_vm3 = vcmp.lt.s32.totalorder %v2811_v17, 1  ;;  %v2914_v18 = vrot.slane %v2841_v27, %v185_v61 }
   0x9   :  { %73 = vrot.lane.b32.xlu1 %v2700_v0, %s2596_s29  ;;  %69 = vrot.lane.b32.xlu0 %v2705_v1, %s2596_s29  ;;  %v2719_v3 = vld [vmem:[%s5443_s26 + $0x8] sm:$0xff]  ;;  %5445 = vst [vmem:[#allocation3_spill] sm:$0xff] %v2846_v31  ;;  %5446 = vst [vmem:[#allocation4_spill] sm:$0xff] %v2852_v33  ;;  %vm211_vm4 = vcmp.lt.s32.totalorder %v2811_v17, 127  ;;  %vm277_vm5 = vcmp.lt.s32.totalorder %v2811_v17, 112  ;;  %vm244_vm6 = vcmp.lt.s32.totalorder %v2811_v17, 113 }
   0xa   :  { %5447 = vst [vmem:[#allocation5_spill] sm:$0xff] %v2862_v37  ;;  %vm310_vm7 = vcmp.lt.s32.totalorder %v2811_v17, 111  ;;  %s5462_s26 = sld [smem:[#allocation83_spill]]  ;;  %vm1717_vm11 = vcmask 130048   ;;  %vm2606_vm12 = vmmov 0   ;;  %vm2308_vm13 = vcmask 31744  }
   0xb   :  { %vm2385_vm14 = vcmask 11264  }
   0xd   :  { %75 = vrot.lane.b32.xlu1 %v2714_v2, %s2596_s29  ;;  %71 = vrot.lane.b32.xlu0 %v2719_v3, %s2596_s29 }
  0x11   :  { %106 = vrot.lane.b32.xlu1 %v2719_v3, %s2597_s2  ;;  %104 = vrot.lane.b32.xlu0 %v2705_v1, %s2597_s2 }
  0x15   :  { %110 = vrot.lane.b32.xlu1 %v2714_v2, %s2597_s2  ;;  %108 = vrot.lane.b32.xlu0 %v2700_v0, %s2597_s2 }
  0x19   :  { %139 = vrot.lane.b32.xlu1 %v2719_v3, %s2598_s20  ;;  %137 = vrot.lane.b32.xlu0 %v2705_v1, %s2598_s20 }
  0x1d   :  { %143 = vrot.lane.b32.xlu1 %v2714_v2, %s2598_s20  ;;  %141 = vrot.lane.b32.xlu0 %v2700_v0, %s2598_s20 }
  0x21   :  { %172 = vrot.lane.b32.xlu1 %v2719_v3, %s2599_s21  ;;  %170 = vrot.lane.b32.xlu0 %v2705_v1, %s2599_s21 }
  0x25   :  { %176 = vrot.lane.b32.xlu1 %v2714_v2, %s2599_s21  ;;  %174 = vrot.lane.b32.xlu0 %v2700_v0, %s2599_s21 }
  0x29   :  { %205 = vrot.lane.b32.xlu1 %v2719_v3, %s2600_s22  ;;  %203 = vrot.lane.b32.xlu0 %v2705_v1, %s2600_s22 }
  0x2d   :  { %209 = vrot.lane.b32.xlu1 %v2714_v2, %s2600_s22  ;;  %207 = vrot.lane.b32.xlu0 %v2700_v0, %s2600_s22 }
  0x31   :  { %238 = vrot.lane.b32.xlu1 %v2719_v3, %s5308_s23  ;;  %236 = vrot.lane.b32.xlu0 %v2705_v1, %s5308_s23 }
  0x35   :  { %242 = vrot.lane.b32.xlu1 %v2714_v2, %s5308_s23  ;;  %240 = vrot.lane.b32.xlu0 %v2700_v0, %s5308_s23 }
  0x39   :  { %271 = vrot.lane.b32.xlu1 %v2719_v3, %s5304_s24  ;;  %269 = vrot.lane.b32.xlu0 %v2705_v1, %s5304_s24 }
  0x3d   :  { %275 = vrot.lane.b32.xlu1 %v2714_v2, %s5304_s24  ;;  %273 = vrot.lane.b32.xlu0 %v2700_v0, %s5304_s24 }
  0x41   :  { %304 = vrot.lane.b32.xlu1 %v2719_v3, %s5306_s25  ;;  %302 = vrot.lane.b32.xlu0 %v2705_v1, %s5306_s25 }
  0x45   :  { %308 = vrot.lane.b32.xlu1 %v2714_v2, %s5306_s25  ;;  %306 = vrot.lane.b32.xlu0 %v2700_v0, %s5306_s25 }
  0x49   :  { %506 = vperm.xlu1 %2579, %v496_v5   ;;  %501 = vperm.xlu0 %2578, %v495_v6   ;;  %v2890_v5 = vrot.slane %v2818_v20, %v152_v60  ;;  %v2893_v6 = vrot.slane %v2818_v20, %v185_v61 }
  0x4d   :  { %541 = vperm.xlu1 %2579, %v535_v7   ;;  %546 = vperm.xlu0 %2578, %v536_v8   ;;  %v2898_v8 = vrot.slane %v2824_v23, %v152_v60 }
  0x51   :  { %511 = vperm.xlu1 %2579, %v497_v9   ;;  %516 = vperm.xlu0 %2578, %v498_v10   ;;  %v2901_v9 = vrot.slane %v2841_v27, %v152_v60  ;;  %v2904_v10 = vrot.slane %v2829_v24, %v152_v60 }
  0x55   :  { %551 = vperm.xlu1 %2579, %v537_v11   ;;  %556 = vperm.xlu0 %2578, %v538_v12  }
  0x7b   :  { %v74_v15 = vpop.permute.xlu1 %73  ;;  %v70_v16 = vpop.permute.xlu0 %69 }
  0x7f   :  { %v76_v21 = vpop.permute.xlu1 %75  ;;  %v72_v22 = vpop.permute.xlu0 %71 }
  0x80   :  { %v82_v28 = vsel %vm79_vm0, %v70_v16, %v72_v22  ;;  %v83_v34 = vsel %vm79_vm0, %v76_v21, %v70_v16  ;;  %v80_v40 = vsel %vm79_vm0, %v74_v15, %v76_v21  ;;  %v81_v42 = vsel %vm79_vm0, %v72_v22, %v74_v15 }
  0x81   :  { %v101_v38 = vmul.f32 %v2833_v25, %v82_v28  ;;  %v100_v46 = vmul.f32 %v2846_v31, %v83_v34  ;;  %v103_v49 = vmul.f32 %v2852_v33, %v80_v40  ;;  %v102_v53 = vmul.f32 %v2862_v37, %v81_v42 }
  0x82   :  { %v2911_v16 = vrot.slane %v2824_v23, %v185_v61  ;;  %v2921_v28 = vrot.slane %v2829_v24, %v185_v61 }
  0x83   :  { %v107_v29 = vpop.permute.xlu1 %106  ;;  %v105_v30 = vpop.permute.xlu0 %104 }
  0x84   :  { %v115_v35 = vsel %vm112_vm1, %v105_v30, %v107_v29  ;;  %5448 = vst [vmem:[#allocation6_spill] sm:$0xff] %v2911_v16  ;;  %5449 = vst [vmem:[#allocation7_spill] sm:$0xff] %v2921_v28 }
  0x85   :  { %v134_v39 = vmul.f32 %v2836_v26, %v115_v35 }
  0x87   :  { %v111_v43 = vpop.permute.xlu1 %110  ;;  %v109_v44 = vpop.permute.xlu0 %108  ;;  %v336_v45 = vpack.c.bf16 %v134_v39, %v101_v38  ;;  %v218_v39 = vsub.s32 5, %v2809_v14 }
  0x88   :  { %v116_v47 = vsel %vm112_vm1, %v111_v43, %v105_v30  ;;  %v114_v48 = vsel %vm112_vm1, %v107_v29, %v109_v44  ;;  %v113_v50 = vsel %vm112_vm1, %v109_v44, %v111_v43 }
  0x89   :  { %389 = vmatprep.subr.bf16.mxu0 %v336_v45  ;;  %v133_v51 = vmul.f32 %v2849_v32, %v116_v47  ;;  %v136_v52 = vmul.f32 %v2859_v36, %v113_v50  ;;  %v135_v54 = vmul.f32 %v2869_v41, %v114_v48 }
  0x8b   :  { %v140_v55 = vpop.permute.xlu1 %139  ;;  %v138_v56 = vpop.permute.xlu0 %137  ;;  %v335_v57 = vpack.c.bf16 %v133_v51, %v100_v46  ;;  %v338_v58 = vpack.c.bf16 %v136_v52, %v103_v49  ;;  %v337_v59 = vpack.c.bf16 %v135_v54, %v102_v53  ;;  %v2940_v54 = vrot.slane %v2824_v23, %v218_v39 }
  0x8c   :  { %v148_v7 = vsel %vm145_vm2, %v138_v56, %v140_v55 }
  0x8d   :  { %390 = vmatpush1.bf16.msra.mxu0 %v335_v57  ;;  %442 = vmatprep.subr.bf16.mxu1 %v338_v58  ;;  %v167_v19 = vmul.f32 %v2890_v5, %v148_v7  ;;  %5450 = vst [vmem:[#allocation8_spill] sm:$0xff] %v2940_v54  ;;  %v2948_v57 = vrot.slane %v2818_v20, %v218_v39 }
  0x8e   :  { %443 = vmatpush1.bf16.msra.mxu1 %v337_v59  ;;  %v2951_v58 = vrot.slane %v2841_v27, %v218_v39 }
  0x8f   :  { %v144_v62 = vpop.permute.xlu1 %143  ;;  %v142_v63 = vpop.permute.xlu0 %141  ;;  %5452 = vst [vmem:[#allocation10_spill] sm:$0xff] %v2948_v57 }
  0x90   :  { %v149_v13 = vsel %vm145_vm2, %v144_v62, %v138_v56  ;;  %v147_v21 = vsel %vm145_vm2, %v140_v55, %v142_v63  ;;  %v146_v29 = vsel %vm145_vm2, %v142_v63, %v144_v62  ;;  %v2943_v55 = vrot.slane %v2829_v24, %v218_v39  ;;  %5453 = vst [vmem:[#allocation11_spill] sm:$0xff] %v2951_v58 }
  0x91   :  { %v166_v30 = vmul.f32 %v2898_v8, %v149_v13  ;;  %v168_v40 = vmul.f32 %v2901_v9, %v147_v21  ;;  %v169_v45 = vmul.f32 %v2904_v10, %v146_v29  ;;  %v251_v39 = vsub.s32 6, %v2809_v14 }
  0x92   :  { %5451 = vst [vmem:[#allocation9_spill] sm:$0xff] %v2943_v55 }
  0x93   :  { %v173_v11 = vpop.permute.xlu1 %172  ;;  %v171_v12 = vpop.permute.xlu0 %170 }
  0x94   :  { %v181_v15 = vsel %vm178_vm3, %v171_v12, %v173_v11 }
  0x95   :  { %v200_v22 = vmul.f32 %v2893_v6, %v181_v15 }
  0x97   :  { %v177_v34 = vpop.permute.xlu1 %176  ;;  %v175_v35 = vpop.permute.xlu0 %174  ;;  %v340_v38 = vpack.c.bf16 %v200_v22, %v167_v19 }
  0x98   :  { %v182_v42 = vsel %vm178_vm3, %v177_v34, %v171_v12  ;;  %v179_v43 = vsel %vm178_vm3, %v175_v35, %v177_v34  ;;  %v180_v44 = vsel %vm178_vm3, %v173_v11, %v175_v35 }
  0x99   :  { %v199_v46 = vmul.f32 %v2911_v16, %v182_v42  ;;  %v201_v47 = vmul.f32 %v2914_v18, %v180_v44  ;;  %v202_v48 = vmul.f32 %v2921_v28, %v179_v43  ;;  %391 = vmatprep.subr.bf16.mxu0 %v340_v38  ;;  %v284_v38 = vsub.s32 7, %v2809_v14  ;;  %v1390_v28 = vld [vmem:[%s5291_s7] sm:$0xff] }
  0x9a   :  { %v2980_v42 = vrot.slane %v2841_v27, %v251_v39 }
  0x9b   :  { %v206_v49 = vpop.permute.xlu1 %205  ;;  %v204_v50 = vpop.permute.xlu0 %203  ;;  %v339_v51 = vpack.c.bf16 %v199_v46, %v166_v30  ;;  %v342_v52 = vpack.c.bf16 %v202_v48, %v169_v45  ;;  %v341_v53 = vpack.c.bf16 %v201_v47, %v168_v40  ;;  %v2985_v43 = vrot.slane %v2824_v23, %v284_v38 }
  0x9c   :  { %v214_v56 = vsel %vm211_vm4, %v204_v50, %v206_v49  ;;  %5456 = vst [vmem:[#allocation14_spill] sm:$0xff] %v2980_v42  ;;  %v2990_v45 = vrot.slane %v2829_v24, %v284_v38  ;;  %v2993_v46 = vrot.slane %v2818_v20, %v284_v38  ;;  %v2996_v47 = vrot.slane %v2841_v27, %v284_v38 }
  0x9d   :  { %392 = vmatpush1.bf16.msra.mxu0 %v339_v51  ;;  %444 = vmatprep.subr.bf16.mxu1 %v342_v52  ;;  %v232_v61 = vmul.f32 %v2940_v54, %v214_v56  ;;  %5457 = vst [vmem:[#allocation15_spill] sm:$0xff] %v2985_v43  ;;  %v2999_v48 = vrot.slane %v2824_v23, %v251_v39 }
  0x9e   :  { %445 = vmatpush1.bf16.msra.mxu1 %v341_v53  ;;  %5458 = vst [vmem:[#allocation16_spill] sm:$0xff] %v2990_v45  ;;  %5459 = vst [vmem:[#allocation17_spill] sm:$0xff] %v2993_v46 }
  0x9f   :  { %v210_v59 = vpop.permute.xlu1 %209  ;;  %v208_v60 = vpop.permute.xlu0 %207  ;;  %v343_v30 = vpack.c.bf16 %v232_v61, %v2705_v1  ;;  %5460 = vst [vmem:[#allocation18_spill] sm:$0xff] %v2996_v47  ;;  %5461 = vst [vmem:[#allocation19_spill] sm:$0xff] %v2999_v48 }
  0xa0   :  { %v215_v62 = vsel %vm211_vm4, %v210_v59, %v204_v50  ;;  %v212_v63 = vsel %vm211_vm4, %v208_v60, %v210_v59  ;;  %v213_v7 = vsel %vm211_vm4, %v206_v49, %v208_v60 }
  0xa1   :  { %v235_v11 = vmul.f32 %v2943_v55, %v215_v62  ;;  %v233_v12 = vmul.f32 %v2948_v57, %v213_v7  ;;  %v234_v13 = vmul.f32 %v2951_v58, %v212_v63  ;;  %v2391_v7 = vld [vmem:[%s5288_s1 + $0x20] ss:$0 sm:$0xff] }
  0xa3   :  { %v239_v15 = vpop.permute.xlu1 %238  ;;  %v237_v19 = vpop.permute.xlu0 %236  ;;  %v344_v21 = vpack.c.bf16 %v233_v12, %v2719_v3  ;;  %v346_v22 = vpack.c.bf16 %v235_v11, %v2714_v2  ;;  %v345_v29 = vpack.c.bf16 %v234_v13, %v2700_v0  ;;  %v2972_v2 = vrot.slane %v2829_v24, %v251_v39 }
  0xa4   :  { %v2975_v0 = vrot.slane %v2818_v20, %v251_v39  ;;  %v247_v50 = vsel %vm244_vm6, %v237_v19, %v239_v15 }
  0xa5   :  { %393 = vmatprep.subr.bf16.mxu0 %v344_v21  ;;  %446 = vmatprep.subr.bf16.mxu1 %v346_v22  ;;  %5454 = vst [vmem:[#allocation12_spill] sm:$0xff] %v2972_v2  ;;  %v265_v63 = vmul.f32 %v2999_v48, %v247_v50 }
  0xa6   :  { %394 = vmatpush1.bf16.msra.mxu0 %v343_v30  ;;  %447 = vmatpush1.bf16.msra.mxu1 %v345_v29  ;;  %5455 = vst [vmem:[#allocation13_spill] sm:$0xff] %v2975_v0  ;;  %v2394_v30 = vld [vmem:[%s5288_s1 + $0x38] ss:$0 sm:$0xff] }
  0xa7   :  { %v243_v34 = vpop.permute.xlu1 %242  ;;  %v241_v35 = vpop.permute.xlu0 %240 }
  0xa8   :  { %v248_v40 = vsel %vm244_vm6, %v243_v34, %v237_v19  ;;  %v246_v14 = vsel %vm244_vm6, %v239_v15, %v241_v35  ;;  %v245_v49 = vsel %vm244_vm6, %v241_v35, %v243_v34  ;;  %v2392_v34 = vld [vmem:[%s5288_s1 + $0x28] ss:$0 sm:$0xff]  ;;  %v2393_v35 = vld [vmem:[%s5288_s1 + $0x30] ss:$0 sm:$0xff] }
  0xa9   :  { %v268_v24 = vmul.f32 %v2972_v2, %v248_v40  ;;  %v266_v51 = vmul.f32 %v2975_v0, %v246_v14  ;;  %v267_v59 = vmul.f32 %v2980_v42, %v245_v49 }
  0xab   :  { %v272_v1 = vpop.permute.xlu1 %271  ;;  %v270_v3 = vpop.permute.xlu0 %269 }
  0xac   :  { %v280_v44 = vsel %vm277_vm5, %v270_v3, %v272_v1 }
  0xad   :  { %v298_v27 = vmul.f32 %v2985_v43, %v280_v44 }
  0xaf   :  { %v276_v20 = vpop.permute.xlu1 %275  ;;  %v274_v52 = vpop.permute.xlu0 %273  ;;  %v347_v22 = vpack.c.bf16 %v298_v27, %v265_v63 }
  0xb0   :  { %v281_v23 = vsel %vm277_vm5, %v276_v20, %v270_v3  ;;  %v278_v53 = vsel %vm277_vm5, %v274_v52, %v276_v20  ;;  %v279_v56 = vsel %vm277_vm5, %v272_v1, %v274_v52 }
  0xb1   :  { %v301_v60 = vmul.f32 %v2990_v45, %v281_v23  ;;  %v299_v61 = vmul.f32 %v2993_v46, %v279_v56  ;;  %v300_v62 = vmul.f32 %v2996_v47, %v278_v53  ;;  %v2580_v23 = vld [vmem:[%s5462_s26] sm:$0xff]   ;;  %v2581_v53 = vld [vmem:[%s5462_s26 + $0x8] sm:$0xff]  }
  0xb3   :  { %v305_v11 = vpop.permute.xlu1 %304  ;;  %v303_v12 = vpop.permute.xlu0 %302  ;;  %v348_v13 = vpack.c.bf16 %v299_v61, %v266_v51  ;;  %v350_v15 = vpack.c.bf16 %v301_v60, %v268_v24  ;;  %v349_v19 = vpack.c.bf16 %v300_v62, %v267_v59 }
  0xb4   :  { %v313_v21 = vsel %vm310_vm7, %v303_v12, %v305_v11 }
  0xb5   :  { %395 = vmatprep.subr.bf16.mxu0 %v348_v13  ;;  %448 = vmatprep.subr.bf16.mxu1 %v350_v15  ;;  %v331_v29 = vmul.f32 %v2391_v7, %v313_v21 }
  0xb6   :  { %396 = vmatpush1.bf16.msra.mxu0 %v347_v22  ;;  %449 = vmatpush1.bf16.msra.mxu1 %v349_v19 }
  0xb7   :  { %v309_v38 = vpop.permute.xlu1 %308  ;;  %v307_v39 = vpop.permute.xlu0 %306  ;;  %v351_v49 = vpack.c.bf16 %v331_v29, %v331_v29 }
  0xb8   :  { %v314_v1 = vsel %vm310_vm7, %v309_v38, %v303_v12  ;;  %v311_v3 = vsel %vm310_vm7, %v307_v39, %v309_v38  ;;  %v312_v40 = vsel %vm310_vm7, %v305_v11, %v307_v39 }
  0xb9   :  { %v334_v14 = vmul.f32 %v2394_v30, %v314_v1  ;;  %v332_v44 = vmul.f32 %v2392_v34, %v312_v40  ;;  %v333_v50 = vmul.f32 %v2393_v35, %v311_v3  ;;  %v378_v52 = vsel %vm376_vm8, %v351_v49, 0 }
  0xbb   :  { %v354_v24 = vpack.c.bf16 %v334_v14, %v334_v14  ;;  %v352_v51 = vpack.c.bf16 %v332_v44, %v332_v44  ;;  %v353_v20 = vpack.c.bf16 %v333_v50, %v333_v50 }
  0xbd   :  { %2397 = vmatprep.subr.msk.bf16.mxu0 %vm376_vm8, %v352_v51  ;;  %2400 = vmatprep.subr.msk.bf16.mxu1 %vm376_vm8, %v354_v24  ;;  %v384_v27 = vsel %vm376_vm8, %v353_v20, 0 }
  0xbe   :  { %398 = vmatpush1.bf16.msra.mxu0 %v378_v52  ;;  %451 = vmatpush1.bf16.msra.mxu1 %v384_v27 }
  0xc1   :  { %2398 = vmatmul.mubr.msk.bf16.vlgmr.msra.gmra.mrb[0].mxu0 %vm369_vm9, %v2580_v23  ;;  %2401 = vmatmul.mubr.msk.bf16.vlgmr.msra.gmra.mrb[0].mxu1 %vm369_vm9, %v2580_v23 }
  0xc2   :  { %431 = vmatprep.mubr.bf16.mxu0 %v5310_v4  ;;  %484 = vmatprep.mubr.bf16.mxu1 %v5310_v4 }
  0xc8   :  { %v3056_v56 = vpop.permute.xlu1 %506  ;;  %v3058_v59 = vpop.permute.xlu0 %501 }
  0xc9   :  { %2399 = vmatmul.mubr.msk.bf16.gmra.mrb[4].mxu0 %vm369_vm9, %v2581_v53  ;;  %2402 = vmatmul.mubr.msk.bf16.gmra.mrb[4].mxu1 %vm369_vm9, %v2581_v53 }
  0xcc   :  { %v3060_v60 = vpop.permute.xlu1 %541  ;;  %v547_v35 = vpop.permute.xlu0 %546 }
 0x194   :  { %v423_v61 = vpop.f32.mrb[0].mxu0  ;;  %v476_v62 = vpop.f32.mrb[0].mxu1 }
 0x195   :  { %v519_v63 = vmul.f32 %v3058_v59, %v423_v61  ;;  %v521_v7 = vmul.f32 %v3058_v59, %v476_v62  ;;  %v425_v11 = vpop.f32.mrb[1].mxu0  ;;  %v478_v12 = vpop.f32.mrb[1].mxu1 }
 0x196   :  { %v427_v13 = vpop.f32.mrb[2].mxu0  ;;  %v480_v15 = vpop.f32.mrb[2].mxu1  ;;  %v520_v61 = vmul.f32 %v3058_v59, %v425_v11 }
 0x197   :  { %v559_v19 = vadd.f32 %v3060_v60, %v519_v63  ;;  %v561_v21 = vadd.f32 %v3060_v60, %v521_v7  ;;  %v523_v22 = vmul.f32 %v3056_v56, %v427_v13  ;;  %v525_v29 = vmul.f32 %v3056_v56, %v480_v15  ;;  %v429_v30 = vpop.f32.mrb[3].mxu0  ;;  %v482_v34 = vpop.f32.mrb[3].mxu1 }
 0x198   :  { %v524_v62 = vmul.f32 %v3056_v56, %v429_v30  ;;  %v560_v63 = vadd.f32 %v3060_v60, %v520_v61  ;;  %v522_v7 = vmul.f32 %v3058_v59, %v478_v12  ;;  %v526_v15 = vmul.f32 %v3056_v56, %v482_v34  ;;  %v3218_v12 = vpop.permute.xlu0 %516 }
 0x199   :  { %v3068_v38 = vmax.f32 %v559_v19, 0.0  ;;  %v563_v39 = vadd.f32 %v547_v35, %v523_v22  ;;  %v565_v1 = vadd.f32 %v547_v35, %v525_v29  ;;  %v3070_v3 = vmax.f32 %v561_v21, 0.0 }
 0x19a   :  { %v564_v13 = vadd.f32 %v547_v35, %v524_v62  ;;  %v3163_v11 = vmax.f32 %v560_v63, 0.0  ;;  %v562_v19 = vadd.f32 %v3060_v60, %v522_v7  ;;  %v566_v22 = vadd.f32 %v547_v35, %v526_v15  ;;  %v3214_v60 = vpop.permute.xlu1 %511 }
 0x19b   :  { %5463 = vst [vmem:[#allocation20_spill] sm:$0xff] %v3068_v38  ;;  %5464 = vst [vmem:[#allocation21_spill] sm:$0xff] %v3070_v3  ;;  %v3072_v40 = vmax.f32 %v563_v39, 0.0  ;;  %v3074_v14 = vmax.f32 %v565_v1, 0.0  ;;  %591 = vrot.lane.b32.xlu1 %v3068_v38, %s2596_s29 }
 0x19c   :  { %v3078_v44 = vpop.f32.mrb[4].mxu0  ;;  %v3080_v49 = vpop.f32.mrb[4].mxu1  ;;  %v3168_v21 = vmax.f32 %v564_v13, 0.0  ;;  %v3172_v59 = vmax.f32 %v562_v19, 0.0  ;;  %v3176_v56 = vmax.f32 %v566_v22, 0.0 }
 0x19d   :  { %5465 = vst [vmem:[#allocation22_spill] sm:$0xff] %v3072_v40  ;;  %5466 = vst [vmem:[#allocation23_spill] sm:$0xff] %v3074_v14  ;;  %v3082_v50 = vpop.f32.mrb[5].mxu0  ;;  %v3084_v24 = vpop.f32.mrb[5].mxu1  ;;  %593 = vrot.lane.b32.xlu0 %v3072_v40, %s2596_s29  ;;  %v527_v34 = vmul.f32 %v3214_v60, %v3078_v44  ;;  %v529_v62 = vmul.f32 %v3214_v60, %v3080_v49 }
 0x19e   :  { %v3092_v52 = vpop.f32.mrb[6].mxu0  ;;  %v3094_v27 = vpop.f32.mrb[6].mxu1 }
 0x19f   :  { %v3096_v23 = vpop.f32.mrb[7].mxu0  ;;  %v3098_v53 = vpop.f32.mrb[7].mxu1  ;;  %607 = vrot.lane.b32.xlu1 %v3070_v3, %s2596_s29  ;;  %v531_v39 = vmul.f32 %v3218_v12, %v3092_v52  ;;  %v533_v52 = vmul.f32 %v3218_v12, %v3094_v27 }
 0x1a0   :  { %v3224_v29 = vpop.permute.xlu1 %551  ;;  %v3228_v30 = vpop.permute.xlu0 %556 }
 0x1a1   :  { %609 = vrot.lane.b32.xlu0 %v3074_v14, %s2596_s29  ;;  %v567_v61 = vadd.f32 %v3224_v29, %v527_v34  ;;  %v571_v44 = vadd.f32 %v3228_v30, %v531_v39  ;;  %v569_v15 = vadd.f32 %v3224_v29, %v529_v62  ;;  %v573_v22 = vadd.f32 %v3228_v30, %v533_v52 }
 0x1a3   :  { %655 = vrot.lane.b32.xlu1 %v3068_v38, %s2597_s2  ;;  %v3258_v13 = vmax.f32 %v567_v61, 0.0  ;;  %v3265_v19 = vmax.f32 %v571_v44, 0.0  ;;  %v3272_v34 = vmax.f32 %v569_v15, 0.0  ;;  %v3278_v61 = vmax.f32 %v573_v22, 0.0 }
 0x1a5   :  { %657 = vrot.lane.b32.xlu0 %v3072_v40, %s2597_s2  ;;  %5470 = vst [vmem:[#allocation24_spill] sm:$0xff] %v3258_v13  ;;  %5471 = vst [vmem:[#allocation25_spill] sm:$0xff] %v3265_v19 }
 0x1a6   :  { %5472 = vst [vmem:[#allocation26_spill] sm:$0xff] %v3272_v34  ;;  %5473 = vst [vmem:[#allocation27_spill] sm:$0xff] %v3278_v61 }
 0x1a7   :  { %671 = vrot.lane.b32.xlu1 %v3070_v3, %s2597_s2 }
 0x1a9   :  { %673 = vrot.lane.b32.xlu0 %v3074_v14, %s2597_s2 }
 0x1ab   :  { %719 = vrot.lane.b32.xlu1 %v3068_v38, %s2598_s20 }
 0x1ad   :  { %721 = vrot.lane.b32.xlu0 %v3072_v40, %s2598_s20 }
 0x1af   :  { %735 = vrot.lane.b32.xlu1 %v3070_v3, %s2598_s20 }
 0x1b1   :  { %737 = vrot.lane.b32.xlu0 %v3074_v14, %s2598_s20 }
 0x1b3   :  { %783 = vrot.lane.b32.xlu1 %v3068_v38, %s2599_s21 }
 0x1b5   :  { %785 = vrot.lane.b32.xlu0 %v3072_v40, %s2599_s21 }
 0x1b7   :  { %799 = vrot.lane.b32.xlu1 %v3070_v3, %s2599_s21 }
 0x1b9   :  { %801 = vrot.lane.b32.xlu0 %v3074_v14, %s2599_s21 }
 0x1bb   :  { %847 = vrot.lane.b32.xlu1 %v3068_v38, %s2600_s22 }
 0x1bd   :  { %849 = vrot.lane.b32.xlu0 %v3072_v40, %s2600_s22 }
 0x1bf   :  { %863 = vrot.lane.b32.xlu1 %v3070_v3, %s2600_s22 }
 0x1c1   :  { %865 = vrot.lane.b32.xlu0 %v3074_v14, %s2600_s22 }
 0x1c3   :  { %911 = vrot.lane.b32.xlu1 %v3068_v38, %s5467_s0 }
 0x1c5   :  { %913 = vrot.lane.b32.xlu0 %v3072_v40, %s5467_s0 }
 0x1c7   :  { %927 = vrot.lane.b32.xlu1 %v3070_v3, %s5467_s0 }
 0x1c9   :  { %929 = vrot.lane.b32.xlu0 %v3074_v14, %s5467_s0 }
 0x1cb   :  { %975 = vrot.lane.b32.xlu1 %v3068_v38, %s5468_s30 }
 0x1cd   :  { %977 = vrot.lane.b32.xlu0 %v3072_v40, %s5468_s30 }
 0x1cf   :  { %991 = vrot.lane.b32.xlu1 %v3070_v3, %s5468_s30 }
 0x1d1   :  { %993 = vrot.lane.b32.xlu0 %v3074_v14, %s5468_s30 }
 0x1d3   :  { %1039 = vrot.lane.b32.xlu1 %v3068_v38, %s5469_s18 }
 0x1d5   :  { %1041 = vrot.lane.b32.xlu0 %v3072_v40, %s5469_s18 }
 0x1d7   :  { %1055 = vrot.lane.b32.xlu1 %v3070_v3, %s5469_s18 }
 0x1d9   :  { %1057 = vrot.lane.b32.xlu0 %v3074_v14, %s5469_s18 }
 0x1db   :  { %599 = vrot.lane.b32.xlu1 %v3163_v11, %s2596_s29 }
 0x1dd   :  { %601 = vrot.lane.b32.xlu0 %v3168_v21, %s2596_s29 }
 0x1df   :  { %615 = vrot.lane.b32.xlu1 %v3172_v59, %s2596_s29 }
 0x1e1   :  { %617 = vrot.lane.b32.xlu0 %v3176_v56, %s2596_s29 }
 0x1e3   :  { %663 = vrot.lane.b32.xlu1 %v3163_v11, %s2597_s2 }
 0x1e5   :  { %665 = vrot.lane.b32.xlu0 %v3168_v21, %s2597_s2 }
 0x1e7   :  { %679 = vrot.lane.b32.xlu1 %v3172_v59, %s2597_s2 }
 0x1e9   :  { %681 = vrot.lane.b32.xlu0 %v3176_v56, %s2597_s2 }
 0x1eb   :  { %727 = vrot.lane.b32.xlu1 %v3163_v11, %s2598_s20 }
 0x1ed   :  { %729 = vrot.lane.b32.xlu0 %v3168_v21, %s2598_s20 }
 0x1ef   :  { %743 = vrot.lane.b32.xlu1 %v3172_v59, %s2598_s20 }
 0x1f1   :  { %745 = vrot.lane.b32.xlu0 %v3176_v56, %s2598_s20 }
 0x1f3   :  { %791 = vrot.lane.b32.xlu1 %v3163_v11, %s2599_s21 }
 0x1f5   :  { %793 = vrot.lane.b32.xlu0 %v3168_v21, %s2599_s21 }
 0x1f7   :  { %807 = vrot.lane.b32.xlu1 %v3172_v59, %s2599_s21 }
 0x1f9   :  { %809 = vrot.lane.b32.xlu0 %v3176_v56, %s2599_s21 }
 0x1fb   :  { %855 = vrot.lane.b32.xlu1 %v3163_v11, %s2600_s22 }
 0x1fd   :  { %857 = vrot.lane.b32.xlu0 %v3168_v21, %s2600_s22 }
 0x1ff   :  { %871 = vrot.lane.b32.xlu1 %v3172_v59, %s2600_s22 }
 0x201   :  { %873 = vrot.lane.b32.xlu0 %v3176_v56, %s2600_s22 }
 0x203   :  { %919 = vrot.lane.b32.xlu1 %v3163_v11, %s5467_s0 }
 0x205   :  { %921 = vrot.lane.b32.xlu0 %v3168_v21, %s5467_s0 }
 0x207   :  { %935 = vrot.lane.b32.xlu1 %v3172_v59, %s5467_s0 }
 0x209   :  { %937 = vrot.lane.b32.xlu0 %v3176_v56, %s5467_s0 }
 0x20b   :  { %983 = vrot.lane.b32.xlu1 %v3163_v11, %s5468_s30 }
 0x20d   :  { %v3234_v35 = vpop.permute.xlu1 %591  ;;  %985 = vrot.lane.b32.xlu0 %v3168_v21, %s5468_s30 }
 0x20f   :  { %999 = vrot.lane.b32.xlu1 %v3172_v59, %s5468_s30  ;;  %v3242_v1 = vpop.permute.xlu0 %593 }
 0x211   :  { %v3247_v63 = vpop.permute.xlu1 %607  ;;  %1001 = vrot.lane.b32.xlu0 %v3176_v56, %s5468_s30 }
 0x213   :  { %1047 = vrot.lane.b32.xlu1 %v3163_v11, %s5469_s18  ;;  %v3256_v7 = vpop.permute.xlu0 %609 }
 0x215   :  { %v3261_v49 = vpop.permute.xlu1 %655  ;;  %1049 = vrot.lane.b32.xlu0 %v3168_v21, %s5469_s18 }
 0x217   :  { %595 = vrot.lane.b32.xlu1 %v3258_v13, %s2596_s29  ;;  %v3270_v27 = vpop.permute.xlu0 %657 }
 0x219   :  { %v3274_v39 = vpop.permute.xlu1 %671  ;;  %597 = vrot.lane.b32.xlu0 %v3265_v19, %s2596_s29 }
 0x21b   :  { %611 = vrot.lane.b32.xlu1 %v3272_v34, %s2596_s29  ;;  %v3282_v62 = vpop.permute.xlu0 %673 }
 0x21d   :  { %v3284_v44 = vpop.permute.xlu1 %719  ;;  %613 = vrot.lane.b32.xlu0 %v3278_v61, %s2596_s29 }
 0x21f   :  { %659 = vrot.lane.b32.xlu1 %v3258_v13, %s2597_s2  ;;  %v3290_v52 = vpop.permute.xlu0 %721 }
 0x221   :  { %v3292_v15 = vpop.permute.xlu1 %735  ;;  %661 = vrot.lane.b32.xlu0 %v3265_v19, %s2597_s2 }
 0x223   :  { %675 = vrot.lane.b32.xlu1 %v3272_v34, %s2597_s2  ;;  %v3298_v22 = vpop.permute.xlu0 %737 }
 0x225   :  { %v3300_v4 = vpop.permute.xlu1 %783  ;;  %677 = vrot.lane.b32.xlu0 %v3278_v61, %s2597_s2 }
 0x227   :  { %723 = vrot.lane.b32.xlu1 %v3258_v13, %s2598_s20  ;;  %v3306_v20 = vpop.permute.xlu0 %785 }
 0x229   :  { %v3308_v51 = vpop.permute.xlu1 %799  ;;  %725 = vrot.lane.b32.xlu0 %v3265_v19, %s2598_s20 }
 0x22b   :  { %739 = vrot.lane.b32.xlu1 %v3272_v34, %s2598_s20  ;;  %v3314_v45 = vpop.permute.xlu0 %801 }
 0x22d   :  { %v3316_v47 = vpop.permute.xlu1 %847  ;;  %741 = vrot.lane.b32.xlu0 %v3278_v61, %s2598_s20 }
 0x22e   :  { %5474 = vst [vmem:[#allocation28_spill] sm:$0xff] %v3316_v47  ;;  %v1370_v47 = vld [vmem:[%s5290_s6] sm:$0xff] }
 0x22f   :  { %787 = vrot.lane.b32.xlu1 %v3258_v13, %s2599_s21  ;;  %v3322_v46 = vpop.permute.xlu0 %849 }
 0x230   :  { %5475 = vst [vmem:[#allocation29_spill] sm:$0xff] %v3322_v46 }
 0x231   :  { %v3324_v43 = vpop.permute.xlu1 %863  ;;  %789 = vrot.lane.b32.xlu0 %v3265_v19, %s2599_s21 }
 0x232   :  { %5476 = vst [vmem:[#allocation30_spill] sm:$0xff] %v3324_v43  ;;  %v1371_v43 = vld [vmem:[%s5290_s6 + $0x8] sm:$0xff] }
 0x233   :  { %803 = vrot.lane.b32.xlu1 %v3272_v34, %s2599_s21  ;;  %v3330_v3 = vpop.permute.xlu0 %865 }
 0x234   :  { %5477 = vst [vmem:[#allocation31_spill] sm:$0xff] %v3330_v3 }
 0x235   :  { %v3332_v14 = vpop.permute.xlu1 %911  ;;  %805 = vrot.lane.b32.xlu0 %v3278_v61, %s2599_s21 }
 0x236   :  { %5478 = vst [vmem:[#allocation32_spill] sm:$0xff] %v3332_v14 }
 0x237   :  { %851 = vrot.lane.b32.xlu1 %v3258_v13, %s2600_s22  ;;  %v3338_v38 = vpop.permute.xlu0 %913 }
 0x238   :  { %5479 = vst [vmem:[#allocation33_spill] sm:$0xff] %v3338_v38 }
 0x239   :  { %v3340_v40 = vpop.permute.xlu1 %927  ;;  %853 = vrot.lane.b32.xlu0 %v3265_v19, %s2600_s22 }
 0x23a   :  { %5480 = vst [vmem:[#allocation34_spill] sm:$0xff] %v3340_v40 }
 0x23b   :  { %867 = vrot.lane.b32.xlu1 %v3272_v34, %s2600_s22  ;;  %v3346_v2 = vpop.permute.xlu0 %929 }
 0x23c   :  { %5481 = vst [vmem:[#allocation35_spill] sm:$0xff] %v3346_v2 }
 0x23d   :  { %v3348_v42 = vpop.permute.xlu1 %975  ;;  %869 = vrot.lane.b32.xlu0 %v3278_v61, %s2600_s22 }
 0x23e   :  { %5482 = vst [vmem:[#allocation36_spill] sm:$0xff] %v3348_v42  ;;  %v528_v42 = vmul.f32 %v3214_v60, %v3082_v50 }
 0x23f   :  { %915 = vrot.lane.b32.xlu1 %v3258_v13, %s5467_s0  ;;  %v3354_v0 = vpop.permute.xlu0 %977 }
 0x240   :  { %5483 = vst [vmem:[#allocation37_spill] sm:$0xff] %v3354_v0  ;;  %v532_v0 = vmul.f32 %v3218_v12, %v3096_v23  ;;  %v568_v14 = vadd.f32 %v3224_v29, %v528_v42  ;;  %v534_v23 = vmul.f32 %v3218_v12, %v3098_v53 }
 0x241   :  { %v3356_v48 = vpop.permute.xlu1 %991  ;;  %917 = vrot.lane.b32.xlu0 %v3265_v19, %s5467_s0 }
 0x242   :  { %5484 = vst [vmem:[#allocation38_spill] sm:$0xff] %v3356_v48  ;;  %v572_v50 = vadd.f32 %v3228_v30, %v532_v0  ;;  %v574_v53 = vadd.f32 %v3228_v30, %v534_v23 }
 0x243   :  { %931 = vrot.lane.b32.xlu1 %v3272_v34, %s5467_s0  ;;  %v3362_v40 = vpop.permute.xlu0 %993 }
 0x244   :  { %5485 = vst [vmem:[#allocation39_spill] sm:$0xff] %v3362_v40  ;;  %v530_v40 = vmul.f32 %v3214_v60, %v3084_v24  ;;  %v3398_v60 = vmax.f32 %v572_v50, 0.0 }
 0x245   :  { %v3366_v2 = vpop.permute.xlu1 %1039  ;;  %933 = vrot.lane.b32.xlu0 %v3278_v61, %s5467_s0 }
 0x246   :  { %5486 = vst [vmem:[#allocation40_spill] sm:$0xff] %v3366_v2  ;;  %v570_v42 = vadd.f32 %v3224_v29, %v530_v40 }
 0x247   :  { %979 = vrot.lane.b32.xlu1 %v3258_v13, %s5468_s30  ;;  %v3374_v48 = vpop.permute.xlu0 %1041 }
 0x248   :  { %5487 = vst [vmem:[#allocation41_spill] sm:$0xff] %v3374_v48  ;;  %v3390_v48 = vmax.f32 %v568_v14, 0.0  ;;  %v3406_v14 = vmax.f32 %v570_v42, 0.0  ;;  %v3421_v42 = vmax.f32 %v574_v53, 0.0 }
 0x249   :  { %v3379_v55 = vpop.permute.xlu1 %1055  ;;  %981 = vrot.lane.b32.xlu0 %v3265_v19, %s5468_s30 }
 0x24a   :  { %5488 = vst [vmem:[#allocation42_spill] sm:$0xff] %v3379_v55 }
 0x24b   :  { %995 = vrot.lane.b32.xlu1 %v3272_v34, %s5468_s30  ;;  %v3388_v2 = vpop.permute.xlu0 %1057 }
 0x24c   :  { %5489 = vst [vmem:[#allocation43_spill] sm:$0xff] %v3388_v2 }
 0x24d   :  { %v600_v24 = vpop.permute.xlu1 %599  ;;  %997 = vrot.lane.b32.xlu0 %v3278_v61, %s5468_s30 }
 0x24e   :  { %v631_v0 = vsel %vm79_vm0, %v3234_v35, %v600_v24 }
 0x24f   :  { %603 = vrot.lane.b32.xlu1 %v3390_v48, %s2596_s29  ;;  %v602_v12 = vpop.permute.xlu0 %601  ;;  %v640_v29 = vmul.f32 %v631_v0, %v2833_v25  ;;  %v627_v0 = vsel %vm79_vm0, %v600_v24, %v3247_v63 }
 0x250   :  { %v632_v40 = vsel %vm79_vm0, %v3242_v1, %v602_v12  ;;  %v628_v2 = vsel %vm79_vm0, %v602_v12, %v3256_v7 }
 0x251   :  { %v644_v50 = vmul.f32 %v632_v40, %v2833_v25  ;;  %v616_v55 = vpop.permute.xlu1 %615  ;;  %605 = vrot.lane.b32.xlu0 %v3398_v60, %s2596_s29  ;;  %v645_v38 = vmul.f32 %v628_v2, %v2862_v37  ;;  %v641_v2 = vmul.f32 %v627_v0, %v2862_v37 }
 0x252   :  { %v623_v30 = vsel %vm79_vm0, %v3247_v63, %v616_v55  ;;  %v635_v23 = vsel %vm79_vm0, %v616_v55, %v3234_v35 }
 0x253   :  { %619 = vrot.lane.b32.xlu1 %v3406_v14, %s2596_s29  ;;  %v618_v12 = vpop.permute.xlu0 %617  ;;  %v1104_v40 = vpack.c.bf16 %v644_v50, %v640_v29  ;;  %v639_v58 = vmul.f32 %v635_v23, %v2846_v31  ;;  %v642_v35 = vmul.f32 %v623_v30, %v2852_v33  ;;  %v1105_v50 = vpack.c.bf16 %v645_v38, %v641_v2 }
 0x254   :  { %v624_v57 = vsel %vm79_vm0, %v3256_v7, %v618_v12  ;;  %v636_v55 = vsel %vm79_vm0, %v618_v12, %v3242_v1 }
 0x255   :  { %v643_v63 = vmul.f32 %v636_v55, %v2846_v31  ;;  %v646_v24 = vmul.f32 %v624_v57, %v2852_v33  ;;  %v3439_v53 = vpop.permute.xlu1 %663  ;;  %621 = vrot.lane.b32.xlu0 %v3421_v42, %s2596_s29  ;;  %1198 = vmatprep.subr.bf16.mxu0 %v1104_v40 }
 0x257   :  { %v1103_v29 = vpack.c.bf16 %v643_v63, %v639_v58  ;;  %667 = vrot.lane.b32.xlu1 %v3390_v48, %s2597_s2  ;;  %v3446_v7 = vpop.permute.xlu0 %665  ;;  %v1106_v1 = vpack.c.bf16 %v646_v24, %v642_v35 }
 0x259   :  { %v3448_v30 = vpop.permute.xlu1 %679  ;;  %669 = vrot.lane.b32.xlu0 %v3398_v60, %s2597_s2  ;;  %1199 = vmatpush1.bf16.msra.mxu0 %v1103_v29 }
 0x25a   :  { %1284 = vmatprep.subr.bf16.mxu1 %v1106_v1 }
 0x25b   :  { %1285 = vmatpush1.bf16.msra.mxu1 %v1105_v50  ;;  %683 = vrot.lane.b32.xlu1 %v3406_v14, %s2597_s2  ;;  %v3454_v57 = vpop.permute.xlu0 %681 }
 0x25d   :  { %v3456_v58 = vpop.permute.xlu1 %727  ;;  %685 = vrot.lane.b32.xlu0 %v3421_v42, %s2597_s2 }
 0x25f   :  { %731 = vrot.lane.b32.xlu1 %v3390_v48, %s2598_s20  ;;  %v3462_v38 = vpop.permute.xlu0 %729 }
 0x261   :  { %v3464_v23 = vpop.permute.xlu1 %743  ;;  %733 = vrot.lane.b32.xlu0 %v3398_v60, %s2598_s20 }
 0x263   :  { %747 = vrot.lane.b32.xlu1 %v3406_v14, %s2598_s20  ;;  %v3470_v0 = vpop.permute.xlu0 %745 }
 0x265   :  { %v3472_v12 = vpop.permute.xlu1 %791  ;;  %749 = vrot.lane.b32.xlu0 %v3421_v42, %s2598_s20 }
 0x267   :  { %795 = vrot.lane.b32.xlu1 %v3390_v48, %s2599_s21  ;;  %v3478_v40 = vpop.permute.xlu0 %793 }
 0x269   :  { %v3480_v55 = vpop.permute.xlu1 %807  ;;  %797 = vrot.lane.b32.xlu0 %v3398_v60, %s2599_s21 }
 0x26a   :  { %5490 = vst [vmem:[#allocation44_spill] sm:$0xff] %v3480_v55 }
 0x26b   :  { %811 = vrot.lane.b32.xlu1 %v3406_v14, %s2599_s21  ;;  %v3486_v35 = vpop.permute.xlu0 %809 }
 0x26c   :  { %5491 = vst [vmem:[#allocation45_spill] sm:$0xff] %v3486_v35 }
 0x26d   :  { %v3488_v63 = vpop.permute.xlu1 %855  ;;  %813 = vrot.lane.b32.xlu0 %v3421_v42, %s2599_s21 }
 0x26e   :  { %5492 = vst [vmem:[#allocation46_spill] sm:$0xff] %v3488_v63 }
 0x26f   :  { %1063 = vrot.lane.b32.xlu1 %v3172_v59, %s5469_s18  ;;  %v3494_v24 = vpop.permute.xlu0 %857 }
 0x270   :  { %5493 = vst [vmem:[#allocation47_spill] sm:$0xff] %v3494_v24 }
 0x271   :  { %v3496_v2 = vpop.permute.xlu1 %871  ;;  %1065 = vrot.lane.b32.xlu0 %v3176_v56, %s5469_s18 }
 0x272   :  { %5494 = vst [vmem:[#allocation48_spill] sm:$0xff] %v3496_v2 }
 0x273   :  { %859 = vrot.lane.b32.xlu1 %v3390_v48, %s2600_s22  ;;  %v3502_v29 = vpop.permute.xlu0 %873 }
 0x274   :  { %5495 = vst [vmem:[#allocation49_spill] sm:$0xff] %v3502_v29 }
 0x275   :  { %v3504_v1 = vpop.permute.xlu1 %919  ;;  %1045 = vrot.lane.b32.xlu0 %v3265_v19, %s5469_s18 }
 0x276   :  { %5496 = vst [vmem:[#allocation50_spill] sm:$0xff] %v3504_v1 }
 0x277   :  { %875 = vrot.lane.b32.xlu1 %v3406_v14, %s2600_s22  ;;  %v3510_v50 = vpop.permute.xlu0 %921 }
 0x278   :  { %5497 = vst [vmem:[#allocation51_spill] sm:$0xff] %v3510_v50 }
 0x279   :  { %v3512_v46 = vpop.permute.xlu1 %935  ;;  %861 = vrot.lane.b32.xlu0 %v3398_v60, %s2600_s22 }
 0x27a   :  { %5498 = vst [vmem:[#allocation52_spill] sm:$0xff] %v3512_v46 }
 0x27b   :  { %923 = vrot.lane.b32.xlu1 %v3390_v48, %s5467_s0  ;;  %v3518_v2 = vpop.permute.xlu0 %937 }
 0x27c   :  { %5499 = vst [vmem:[#allocation53_spill] sm:$0xff] %v3518_v2 }
 0x27d   :  { %v3520_v29 = vpop.permute.xlu1 %983  ;;  %877 = vrot.lane.b32.xlu0 %v3421_v42, %s2600_s22 }
 0x27e   :  { %5500 = vst [vmem:[#allocation54_spill] sm:$0xff] %v3520_v29  ;;  %v2584_v29 = vld [vmem:[%s5289_s5 + $0x4] ss:$12 sps:$4 sm:$0xff]  }
 0x27f   :  { %939 = vrot.lane.b32.xlu1 %v3406_v14, %s5467_s0  ;;  %v3526_v1 = vpop.permute.xlu0 %985  ;;  %1230 = vmatprep.mubr.bf16.mxu0 %v2584_v29 }
 0x280   :  { %5501 = vst [vmem:[#allocation55_spill] sm:$0xff] %v3526_v1  ;;  %1316 = vmatprep.mubr.bf16.mxu1 %v2584_v29 }
 0x281   :  { %v3528_v50 = vpop.permute.xlu1 %999  ;;  %925 = vrot.lane.b32.xlu0 %v3398_v60, %s5467_s0 }
 0x282   :  { %5502 = vst [vmem:[#allocation56_spill] sm:$0xff] %v3528_v50 }
 0x283   :  { %987 = vrot.lane.b32.xlu1 %v3390_v48, %s5468_s30  ;;  %v3534_v46 = vpop.permute.xlu0 %1001 }
 0x284   :  { %5503 = vst [vmem:[#allocation57_spill] sm:$0xff] %v3534_v46 }
 0x285   :  { %v3536_v2 = vpop.permute.xlu1 %1047  ;;  %941 = vrot.lane.b32.xlu0 %v3421_v42, %s5467_s0 }
 0x286   :  { %5504 = vst [vmem:[#allocation58_spill] sm:$0xff] %v3536_v2 }
 0x287   :  { %1003 = vrot.lane.b32.xlu1 %v3406_v14, %s5468_s30  ;;  %v3545_v50 = vpop.permute.xlu0 %1049 }
 0x288   :  { %5505 = vst [vmem:[#allocation59_spill] sm:$0xff] %v3545_v50 }
 0x289   :  { %v3547_v1 = vpop.permute.xlu1 %595  ;;  %989 = vrot.lane.b32.xlu0 %v3398_v60, %s5468_s30 }
 0x28b   :  { %1043 = vrot.lane.b32.xlu1 %v3258_v13, %s5469_s18  ;;  %v3553_v2 = vpop.permute.xlu0 %597 }
 0x28d   :  { %v3555_v46 = vpop.permute.xlu1 %611  ;;  %1005 = vrot.lane.b32.xlu0 %v3421_v42, %s5468_s30 }
 0x28f   :  { %1051 = vrot.lane.b32.xlu1 %v3390_v48, %s5469_s18  ;;  %v3561_v50 = vpop.permute.xlu0 %613 }
 0x291   :  { %v3563_v29 = vpop.permute.xlu1 %659  ;;  %1061 = vrot.lane.b32.xlu0 %v3278_v61, %s5469_s18 }
 0x292   :  { %5506 = vst [vmem:[#allocation60_spill] sm:$0xff] %v3563_v29 }
 0x293   :  { %1059 = vrot.lane.b32.xlu1 %v3272_v34, %s5469_s18  ;;  %v3569_v24 = vpop.permute.xlu0 %661 }
 0x294   :  { %5507 = vst [vmem:[#allocation61_spill] sm:$0xff] %v3569_v24 }
 0x295   :  { %v3571_v3 = vpop.permute.xlu1 %675  ;;  %1053 = vrot.lane.b32.xlu0 %v3398_v60, %s5469_s18 }
 0x296   :  { %5508 = vst [vmem:[#allocation62_spill] sm:$0xff] %v3571_v3 }
 0x297   :  { %1067 = vrot.lane.b32.xlu1 %v3406_v14, %s5469_s18  ;;  %v3577_v54 = vpop.permute.xlu0 %677 }
 0x298   :  { %5509 = vst [vmem:[#allocation63_spill] sm:$0xff] %v3577_v54 }
 0x299   :  { %v3582_v63 = vpop.permute.xlu1 %723  ;;  %1069 = vrot.lane.b32.xlu0 %v3421_v42, %s5469_s18 }
 0x29a   :  { %5510 = vst [vmem:[#allocation64_spill] sm:$0xff] %v3582_v63  ;;  %v1391_v63 = vld [vmem:[%s5291_s7 + $0x8] sm:$0xff] }
 0x29b   :  { %1374 = vperm.xlu1 %2579, %v1370_v47   ;;  %v3589_v35 = vpop.permute.xlu0 %725 }
 0x29c   :  { %5511 = vst [vmem:[#allocation65_spill] sm:$0xff] %v3589_v35 }
 0x29d   :  { %v3594_v3 = vpop.permute.xlu1 %739  ;;  %1379 = vperm.xlu0 %2578, %v1371_v43  }
 0x29e   :  { %5512 = vst [vmem:[#allocation66_spill] sm:$0xff] %v3594_v3 }
 0x29f   :  { %1394 = vperm.xlu1 %2579, %v1390_v28   ;;  %v3599_v16 = vpop.permute.xlu0 %741 }
 0x2a0   :  { %5513 = vst [vmem:[#allocation67_spill] sm:$0xff] %v3599_v16 }
 0x2a1   :  { %v3601_v54 = vpop.permute.xlu1 %787  ;;  %1399 = vperm.xlu0 %2578, %v1391_v63   ;;  %v692_v63 = vsel %vm112_vm1, %v3446_v7, %v3282_v62 }
 0x2a2   :  { %5514 = vst [vmem:[#allocation68_spill] sm:$0xff] %v3601_v54 }
 0x2a3   :  { %v3603_v47 = vpop.permute.xlu0 %789 }
 0x2a5   :  { %v3605_v35 = vpop.permute.xlu1 %803 }
 0x2a6   :  { %5515 = vst [vmem:[#allocation69_spill] sm:$0xff] %v3605_v35 }
 0x2a7   :  { %v3607_v24 = vpop.permute.xlu0 %805 }
 0x2a9   :  { %v3609_v55 = vpop.permute.xlu1 %851 }
 0x2aa   :  { %5516 = vst [vmem:[#allocation70_spill] sm:$0xff] %v3609_v55  ;;  %v691_v55 = vsel %vm112_vm1, %v3439_v53, %v3274_v39 }
 0x2ab   :  { %v3611_v3 = vpop.permute.xlu0 %853 }
 0x2ac   :  { %5517 = vst [vmem:[#allocation71_spill] sm:$0xff] %v3611_v3 }
 0x2ad   :  { %v3613_v43 = vpop.permute.xlu1 %867 }
 0x2ae   :  { %5518 = vst [vmem:[#allocation72_spill] sm:$0xff] %v3613_v43 }
 0x2af   :  { %v3615_v29 = vpop.permute.xlu0 %869 }
 0x2b0   :  { %5519 = vst [vmem:[#allocation73_spill] sm:$0xff] %v3615_v29  ;;  %v688_v29 = vsel %vm112_vm1, %v3282_v62, %v3454_v57  ;;  %v760_v62 = vsel %vm145_vm2, %v3290_v52, %v3462_v38 }
 0x2b1   :  { %v3617_v28 = vpop.permute.xlu1 %915 }
 0x2b2   :  { %5520 = vst [vmem:[#allocation74_spill] sm:$0xff] %v3617_v28  ;;  %v700_v28 = vsel %vm112_vm1, %v3454_v57, %v3270_v27 }
 0x2b3   :  { %v3619_v16 = vpop.permute.xlu0 %917 }
 0x2b4   :  { %5521 = vst [vmem:[#allocation75_spill] sm:$0xff] %v3619_v16  ;;  %v695_v16 = vsel %vm112_vm1, %v3261_v49, %v3439_v53  ;;  %v759_v53 = vsel %vm145_vm2, %v3284_v44, %v3456_v58 }
 0x2b5   :  { %v3621_v54 = vpop.permute.xlu1 %931  ;;  %v3676_v43 = vmul.f32 %v695_v16, %v2836_v26  ;;  %v687_v16 = vsel %vm112_vm1, %v3274_v39, %v3448_v30  ;;  %v764_v39 = vsel %vm145_vm2, %v3470_v0, %v3290_v52 }
 0x2b6   :  { %5522 = vst [vmem:[#allocation76_spill] sm:$0xff] %v3621_v54  ;;  %v3646_v54 = vmul.f32 %v692_v63, %v2869_v41  ;;  %v3663_v63 = vmul.f32 %v691_v55, %v2869_v41  ;;  %v699_v55 = vsel %vm112_vm1, %v3448_v30, %v3261_v49  ;;  %v755_v49 = vsel %vm145_vm2, %v3456_v58, %v3292_v15 }
 0x2b7   :  { %v3627_v35 = vpop.permute.xlu0 %933  ;;  %v751_v58 = vsel %vm145_vm2, %v3292_v15, %v3464_v23  ;;  %v3735_v52 = vmul.f32 %v687_v16, %v2859_v36 }
 0x2b8   :  { %5523 = vst [vmem:[#allocation77_spill] sm:$0xff] %v3627_v35  ;;  %v696_v35 = vsel %vm112_vm1, %v3270_v27, %v3446_v7  ;;  %v756_v27 = vsel %vm145_vm2, %v3462_v38, %v3298_v22  ;;  %v3705_v38 = vmul.f32 %v688_v29, %v2859_v36  ;;  %v3724_v29 = vmul.f32 %v760_v62, %v2890_v5 }
 0x2b9   :  { %v3633_v3 = vpop.permute.xlu1 %979  ;;  %v3679_v7 = vmul.f32 %v696_v35, %v2836_v26  ;;  %v3698_v35 = vmul.f32 %v700_v28, %v2849_v32  ;;  %v3721_v28 = vmul.f32 %v699_v55, %v2849_v32  ;;  %v752_v55 = vsel %vm145_vm2, %v3298_v22, %v3470_v0 }
 0x2ba   :  { %5524 = vst [vmem:[#allocation78_spill] sm:$0xff] %v3633_v3 }
 0x2bb   :  { %v3654_v3 = vpop.permute.xlu0 %981  ;;  %v1112_v15 = vpack.c.bf16 %v3679_v7, %v3676_v43  ;;  %v3763_v43 = vmul.f32 %v751_v58, %v2904_v10  ;;  %v819_v58 = vsel %vm178_vm3, %v3472_v12, %v3308_v51 }
 0x2bc   :  { %5525 = vst [vmem:[#allocation79_spill] sm:$0xff] %v3654_v3  ;;  %v3712_v3 = vmul.f32 %v756_v27, %v2901_v9  ;;  %v763_v27 = vsel %vm145_vm2, %v3464_v23, %v3284_v44  ;;  %v3749_v44 = vmul.f32 %v759_v53, %v2890_v5  ;;  %v3752_v23 = vmul.f32 %v764_v39, %v2898_v8 }
 0x2bd   :  { %v3689_v57 = vpop.permute.xlu1 %995  ;;  %v3760_v0 = vmul.f32 %v763_v27, %v2898_v8  ;;  %v1114_v53 = vpack.c.bf16 %v3705_v38, %v3735_v52  ;;  %v823_v39 = vsel %vm178_vm3, %v3300_v4, %v3472_v12  ;;  %v820_v38 = vsel %vm178_vm3, %v3478_v40, %v3314_v45 }
 0x2be   :  { %5526 = vst [vmem:[#allocation80_spill] sm:$0xff] %v3689_v57  ;;  %v3811_v13 = vmul.f32 %v820_v38, %v2914_v18  ;;  %v3825_v38 = vmul.f32 %v819_v58, %v2914_v18 }
 0x2bf   :  { %v3718_v30 = vpop.permute.xlu0 %997 }
 0x2c0   :  { %5527 = vst [vmem:[#allocation81_spill] sm:$0xff] %v3718_v30  ;;  %v3738_v30 = vmul.f32 %v755_v49, %v2901_v9  ;;  %v3768_v49 = vmul.f32 %v752_v55, %v2904_v10 }
 0x2c1   :  { %v604_v62 = vpop.permute.xlu1 %603 }
 0x2c2   :  { %v633_v16 = vsel %vm79_vm0, %v3547_v1, %v604_v62  ;;  %v629_v12 = vsel %vm79_vm0, %v604_v62, %v3555_v46 }
 0x2c3   :  { %v606_v7 = vpop.permute.xlu0 %605  ;;  %v648_v52 = vmul.f32 %v633_v16, %v2833_v25 }
 0x2c4   :  { %v634_v27 = vsel %vm79_vm0, %v3553_v2, %v606_v7  ;;  %v630_v55 = vsel %vm79_vm0, %v606_v7, %v3561_v50  ;;  %v3801_v7 = vmul.f32 %v823_v39, %v2893_v6 }
 0x2c5   :  { %v652_v22 = vmul.f32 %v634_v27, %v2833_v25  ;;  %v620_v57 = vpop.permute.xlu1 %619  ;;  %v824_v27 = vsel %vm178_vm3, %v3306_v20, %v3478_v40  ;;  %v653_v19 = vmul.f32 %v630_v55, %v2862_v37 }
 0x2c6   :  { %v625_v61 = vsel %vm79_vm0, %v3555_v46, %v620_v57  ;;  %v637_v16 = vsel %vm79_vm0, %v620_v57, %v3547_v1 }
 0x2c7   :  { %v622_v34 = vpop.permute.xlu0 %621  ;;  %v1108_v25 = vpack.c.bf16 %v652_v22, %v648_v52  ;;  %v647_v40 = vmul.f32 %v637_v16, %v2846_v31  ;;  %v650_v39 = vmul.f32 %v625_v61, %v2852_v33  ;;  %v649_v52 = vmul.f32 %v629_v12, %v2862_v37  ;;  %v5531_v37 = vld [vmem:[#allocation63_spill] sm:$0xff] }
 0x2c8   :  { %v626_v1 = vsel %vm79_vm0, %v3561_v50, %v622_v34  ;;  %v638_v57 = vsel %vm79_vm0, %v622_v34, %v3553_v2  ;;  %v5528_v50 = vld [vmem:[#allocation60_spill] sm:$0xff]  ;;  %v3834_v61 = vmul.f32 %v824_v27, %v2893_v6  ;;  %v1129_v12 = vpack.c.bf16 %v3811_v13, %v3825_v38  ;;  %v5565_v38 = vld [vmem:[#allocation53_spill] sm:$0xff] }
 0x2c9   :  { %v651_v46 = vmul.f32 %v638_v57, %v2846_v31  ;;  %v654_v62 = vmul.f32 %v626_v1, %v2852_v33  ;;  %v668_v22 = vpop.permute.xlu1 %667  ;;  %1200 = vmatprep.subr.bf16.mxu0 %v1108_v25  ;;  %v5529_v2 = vld [vmem:[#allocation44_spill] sm:$0xff]  ;;  %v1109_v34 = vpack.c.bf16 %v653_v19, %v649_v52  ;;  %v5530_v33 = vld [vmem:[#allocation61_spill] sm:$0xff] }
 0x2ca   :  { %v697_v55 = vsel %vm112_vm1, %v5528_v50, %v668_v22  ;;  %v827_v25 = vsel %vm178_vm3, %v5529_v2, %v3300_v4  ;;  %v815_v57 = vsel %vm178_vm3, %v3308_v51, %v5529_v2  ;;  %v5533_v51 = vld [vmem:[#allocation62_spill] sm:$0xff] }
 0x2cb   :  { %v1107_v16 = vpack.c.bf16 %v651_v46, %v647_v40  ;;  %v670_v58 = vpop.permute.xlu0 %669  ;;  %v1110_v1 = vpack.c.bf16 %v654_v62, %v650_v39  ;;  %v712_v31 = vmul.f32 %v697_v55, %v2836_v26  ;;  %v5532_v46 = vld [vmem:[#allocation6_spill] sm:$0xff]  ;;  %v5534_v55 = vld [vmem:[#allocation7_spill] sm:$0xff] }
 0x2cc   :  { %v698_v27 = vsel %vm112_vm1, %v5530_v33, %v670_v58  ;;  %v694_v4 = vsel %vm112_vm1, %v670_v58, %v5531_v37  ;;  %v3855_v62 = vmul.f32 %v827_v25, %v5532_v46  ;;  %v3864_v2 = vmul.f32 %v815_v57, %v5534_v55  ;;  %v5535_v58 = vld [vmem:[#allocation45_spill] sm:$0xff] }
 0x2cd   :  { %v716_v40 = vmul.f32 %v698_v27, %v2836_v26  ;;  %v684_v39 = vpop.permute.xlu1 %683  ;;  %1201 = vmatpush1.bf16.msra.mxu0 %v1107_v16  ;;  %1286 = vmatprep.subr.bf16.mxu1 %v1110_v1  ;;  %v828_v16 = vsel %vm178_vm3, %v5535_v58, %v3306_v20  ;;  %v693_v25 = vsel %vm112_vm1, %v668_v22, %v5533_v51 }
 0x2ce   :  { %v689_v19 = vsel %vm112_vm1, %v5533_v51, %v684_v39  ;;  %v701_v52 = vsel %vm112_vm1, %v684_v39, %v5528_v50  ;;  %1202 = vmatprep.subr.bf16.mxu0 %v1112_v15  ;;  %1287 = vmatpush1.bf16.msra.mxu1 %v1109_v34  ;;  %v816_v15 = vsel %vm178_vm3, %v3314_v45, %v5535_v58  ;;  %v5537_v39 = vld [vmem:[#allocation64_spill] sm:$0xff] }
 0x2cf   :  { %1288 = vmatprep.subr.bf16.mxu1 %v1114_v53  ;;  %v686_v1 = vpop.permute.xlu0 %685  ;;  %v1116_v27 = vpack.c.bf16 %v716_v40, %v712_v31  ;;  %v717_v50 = vmul.f32 %v694_v4, %v2869_v41  ;;  %v711_v22 = vmul.f32 %v701_v52, %v2849_v32  ;;  %v714_v53 = vmul.f32 %v689_v19, %v2859_v36 }
 0x2d0   :  { %v690_v34 = vsel %vm112_vm1, %v5531_v37, %v686_v1  ;;  %v702_v20 = vsel %vm112_vm1, %v686_v1, %v5530_v33  ;;  %v5536_v45 = vpack.c.bf16 %v3698_v35, %v3721_v28  ;;  %v3892_v4 = vmul.f32 %v828_v16, %v5532_v46  ;;  %v5539_v16 = vld [vmem:[#allocation30_spill] sm:$0xff] }
 0x2d1   :  { %v715_v31 = vmul.f32 %v702_v20, %v2849_v32  ;;  %v718_v57 = vmul.f32 %v690_v34, %v2859_v36  ;;  %v732_v40 = vpop.permute.xlu1 %731  ;;  %v713_v37 = vmul.f32 %v693_v25, %v2869_v41  ;;  %v5538_v51 = vpack.c.bf16 %v3646_v54, %v3663_v63  ;;  %v5540_v25 = vld [vmem:[#allocation46_spill] sm:$0xff]  ;;  %v5542_v34 = vld [vmem:[#allocation65_spill] sm:$0xff] }
 0x2d2   :  { %1203 = vmatpush1.bf16.msra.mxu0 %v5536_v45  ;;  %v761_v33 = vsel %vm145_vm2, %v5537_v39, %v732_v40  ;;  %v3902_v19 = vmul.f32 %v816_v15, %v5534_v55  ;;  %v1128_v58 = vpack.c.bf16 %v3834_v61, %v3801_v7  ;;  %v883_v1 = vsel %vm211_vm4, %v5540_v25, %v5539_v16 }
 0x2d3   :  { %1204 = vmatprep.subr.bf16.mxu0 %v1116_v27  ;;  %1289 = vmatpush1.bf16.msra.mxu1 %v5538_v51  ;;  %v1115_v52 = vpack.c.bf16 %v715_v31, %v711_v22  ;;  %v734_v35 = vpop.permute.xlu0 %733  ;;  %v1118_v28 = vpack.c.bf16 %v718_v57, %v714_v53  ;;  %v5541_v27 = vld [vmem:[#allocation28_spill] sm:$0xff]  ;;  %v1117_v63 = vpack.c.bf16 %v717_v50, %v713_v37  ;;  %v5543_v22 = vld [vmem:[#allocation67_spill] sm:$0xff]  ;;  %v5544_v57 = vld [vmem:[#allocation66_spill] sm:$0xff] }
 0x2d4   :  { %v887_v54 = vsel %vm211_vm4, %v5541_v27, %v5540_v25  ;;  %v762_v15 = vsel %vm145_vm2, %v5542_v34, %v734_v35  ;;  %v776_v20 = vmul.f32 %v761_v33, %v2890_v5  ;;  %v758_v7 = vsel %vm145_vm2, %v734_v35, %v5543_v22  ;;  %v5546_v33 = vld [vmem:[#allocation8_spill] sm:$0xff]  ;;  %v5548_v35 = vld [vmem:[#allocation47_spill] sm:$0xff] }
 0x2d5   :  { %v780_v61 = vmul.f32 %v762_v15, %v2890_v5  ;;  %v748_v53 = vpop.permute.xlu1 %747  ;;  %1290 = vmatprep.subr.bf16.mxu1 %v1118_v28  ;;  %v1127_v31 = vpack.c.bf16 %v3892_v4, %v3855_v62  ;;  %v5545_v37 = vpack.c.bf16 %v3724_v29, %v3749_v44  ;;  %v3934_v51 = vmul.f32 %v887_v54, %v5546_v33  ;;  %v5550_v44 = vld [vmem:[#allocation29_spill] sm:$0xff] }
 0x2d6   :  { %1205 = vmatpush1.bf16.msra.mxu0 %v1115_v52  ;;  %v753_v50 = vsel %vm145_vm2, %v5544_v57, %v748_v53  ;;  %v765_v45 = vsel %vm145_vm2, %v748_v53, %v5537_v39  ;;  %v5547_v52 = vld [vmem:[#allocation31_spill] sm:$0xff]  ;;  %v757_v4 = vsel %vm145_vm2, %v732_v40, %v5544_v57  ;;  %v5549_v39 = vpack.c.bf16 %v3768_v49, %v3763_v43  ;;  %v5552_v53 = vld [vmem:[#allocation10_spill] sm:$0xff] }
 0x2d7   :  { %1206 = vmatprep.subr.bf16.mxu0 %v5545_v37  ;;  %1291 = vmatpush1.bf16.msra.mxu1 %v1117_v63  ;;  %v884_v62 = vsel %vm211_vm4, %v5548_v35, %v5547_v52  ;;  %v750_v28 = vpop.permute.xlu0 %749  ;;  %v1124_v29 = vpack.c.bf16 %v780_v61, %v776_v20  ;;  %v888_v25 = vsel %vm211_vm4, %v5550_v44, %v5548_v35  ;;  %v5553_v37 = vld [vmem:[#allocation68_spill] sm:$0xff] }
 0x2d8   :  { %1292 = vmatprep.subr.bf16.mxu1 %v5549_v39  ;;  %v781_v54 = vmul.f32 %v758_v7, %v2901_v9  ;;  %v754_v63 = vsel %vm145_vm2, %v5543_v22, %v750_v28  ;;  %v766_v40 = vsel %vm145_vm2, %v750_v28, %v5542_v34  ;;  %v775_v43 = vmul.f32 %v765_v45, %v2898_v8  ;;  %v5555_v39 = vld [vmem:[#allocation48_spill] sm:$0xff] }
 0x2d9   :  { %v778_v49 = vmul.f32 %v753_v50, %v2904_v10  ;;  %v779_v15 = vmul.f32 %v766_v40, %v2898_v8  ;;  %v782_v20 = vmul.f32 %v754_v63, %v2904_v10  ;;  %v796_v61 = vpop.permute.xlu1 %795  ;;  %v5551_v7 = vpack.c.bf16 %v3752_v23, %v3760_v0  ;;  %v5595_v40 = vld [vmem:[#allocation24_spill] sm:$0xff] }
 0x2da   :  { %v3965_v57 = vmul.f32 %v883_v1, %v5552_v53  ;;  %v777_v22 = vmul.f32 %v757_v4, %v2901_v9  ;;  %v825_v34 = vsel %vm178_vm3, %v5553_v37, %v796_v61  ;;  %v5554_v50 = vpack.c.bf16 %v3712_v3, %v3738_v30 }
 0x2db   :  { %1207 = vmatpush1.bf16.msra.mxu0 %v5551_v7  ;;  %v3975_v45 = vmul.f32 %v888_v25, %v5546_v33  ;;  %v1123_v35 = vpack.c.bf16 %v779_v15, %v775_v43  ;;  %v798_v23 = vpop.permute.xlu0 %797  ;;  %v1126_v0 = vpack.c.bf16 %v782_v20, %v778_v49  ;;  %v1130_v1 = vpack.c.bf16 %v3902_v19, %v3864_v2  ;;  %v5557_v43 = vld [vmem:[#allocation49_spill] sm:$0xff] }
 0x2dc   :  { %1208 = vmatprep.subr.bf16.mxu0 %v1124_v29  ;;  %1293 = vmatpush1.bf16.msra.mxu1 %v5554_v50  ;;  %v3980_v4 = vmul.f32 %v884_v62, %v5552_v53  ;;  %v879_v28 = vsel %vm211_vm4, %v5539_v16, %v5555_v39  ;;  %v1125_v29 = vpack.c.bf16 %v781_v54, %v777_v22  ;;  %v5556_v62 = vld [vmem:[#allocation69_spill] sm:$0xff] }
 0x2dd   :  { %v826_v3 = vsel %vm178_vm3, %v3603_v47, %v798_v23  ;;  %v840_v30 = vmul.f32 %v825_v34, %v2893_v6  ;;  %v822_v25 = vsel %vm178_vm3, %v798_v23, %v3607_v24  ;;  %v812_v19 = vpop.permute.xlu1 %811  ;;  %1294 = vmatprep.subr.bf16.mxu1 %v1126_v0  ;;  %v891_v16 = vsel %vm211_vm4, %v5555_v39, %v5541_v27  ;;  %v5559_v0 = vld [vmem:[#allocation51_spill] sm:$0xff] }
 0x2de   :  { %v844_v2 = vmul.f32 %v826_v3, %v2893_v6  ;;  %v817_v54 = vsel %vm178_vm3, %v5556_v62, %v812_v19  ;;  %v829_v63 = vsel %vm178_vm3, %v812_v19, %v5553_v37  ;;  %v880_v49 = vsel %vm211_vm4, %v5547_v52, %v5557_v43 }
 0x2df   :  { %1209 = vmatpush1.bf16.msra.mxu0 %v1123_v35  ;;  %v821_v27 = vsel %vm178_vm3, %v796_v61, %v5556_v62  ;;  %v814_v15 = vpop.permute.xlu0 %813  ;;  %v845_v7 = vmul.f32 %v822_v25, %v2914_v18  ;;  %v839_v61 = vmul.f32 %v829_v63, %v5532_v46  ;;  %v842_v37 = vmul.f32 %v817_v54, %v5534_v55  ;;  %v5562_v25 = vld [vmem:[#allocation50_spill] sm:$0xff]  ;;  %v5564_v62 = vld [vmem:[#allocation35_spill] sm:$0xff] }
 0x2e0   :  { %1210 = vmatprep.subr.bf16.mxu0 %v1128_v58  ;;  %1295 = vmatpush1.bf16.msra.mxu1 %v1125_v29  ;;  %v1132_v20 = vpack.c.bf16 %v844_v2, %v840_v30  ;;  %v892_v58 = vsel %vm211_vm4, %v5557_v43, %v5550_v44  ;;  %v818_v22 = vsel %vm178_vm3, %v3607_v24, %v814_v15  ;;  %v5558_v44 = vld [vmem:[#allocation11_spill] sm:$0xff]  ;;  %v5560_v24 = vld [vmem:[#allocation33_spill] sm:$0xff]  ;;  %v5563_v2 = vld [vmem:[#allocation32_spill] sm:$0xff] }
 0x2e1   :  { %1296 = vmatprep.subr.bf16.mxu1 %v1130_v1  ;;  %v830_v52 = vsel %vm178_vm3, %v814_v15, %v3603_v47  ;;  %v846_v50 = vmul.f32 %v818_v22, %v5534_v55  ;;  %v4028_v35 = vpop.permute.xlu1 %1063  ;;  %v4031_v23 = vmul.f32 %v879_v28, %v5558_v44  ;;  %v952_v1 = vsel %vm244_vm6, %v5560_v24, %v5559_v0  ;;  %v5561_v29 = vld [vmem:[#allocation9_spill] sm:$0xff]  ;;  %v5566_v63 = vld [vmem:[#allocation34_spill] sm:$0xff]  ;;  %v5568_v22 = vld [vmem:[#allocation52_spill] sm:$0xff] }
 0x2e2   :  { %v843_v34 = vmul.f32 %v830_v52, %v5532_v46  ;;  %v841_v47 = vmul.f32 %v821_v27, %v2914_v18  ;;  %v4042_v39 = vmul.f32 %v880_v49, %v5558_v44  ;;  %v951_v19 = vsel %vm244_vm6, %v5563_v2, %v5562_v25  ;;  %v5567_v49 = vld [vmem:[#allocation19_spill] sm:$0xff] }
 0x2e3   :  { %1211 = vmatpush1.bf16.msra.mxu0 %v1127_v31  ;;  %v4045_v31 = vmul.f32 %v892_v58, %v5561_v29  ;;  %v4047_v3 = vpop.permute.xlu0 %1065  ;;  %v1134_v30 = vpack.c.bf16 %v846_v50, %v842_v37  ;;  %v948_v13 = vsel %vm244_vm6, %v5559_v0, %v5564_v62  ;;  %v947_v43 = vsel %vm244_vm6, %v5562_v25, %v5566_v63  ;;  %v5571_v0 = vld [vmem:[#allocation14_spill] sm:$0xff] }
 0x2e4   :  { %1212 = vmatprep.subr.bf16.mxu0 %v1132_v20  ;;  %1297 = vmatpush1.bf16.msra.mxu1 %v1129_v12  ;;  %v1131_v28 = vpack.c.bf16 %v843_v34, %v839_v61  ;;  %v944_v12 = vsel %vm244_vm6, %v5564_v62, %v5565_v38  ;;  %v1133_v54 = vpack.c.bf16 %v845_v7, %v841_v47  ;;  %v5570_v34 = vld [vmem:[#allocation13_spill] sm:$0xff]  ;;  %v5578_v62 = vld [vmem:[#allocation20_spill] sm:$0xff] }
 0x2e5   :  { %v4066_v27 = vmul.f32 %v952_v1, %v5567_v49  ;;  %v956_v15 = vsel %vm244_vm6, %v5565_v38, %v5560_v24  ;;  %v860_v20 = vpop.permute.xlu1 %859  ;;  %1298 = vmatprep.subr.bf16.mxu1 %v1134_v30  ;;  %v898_v58 = vmul.f32 %v891_v16, %v5561_v29  ;;  %v943_v7 = vsel %vm244_vm6, %v5566_v63, %v5568_v22  ;;  %v5573_v1 = vld [vmem:[#allocation12_spill] sm:$0xff]  ;;  %v5581_v63 = vld [vmem:[#allocation37_spill] sm:$0xff] }
 0x2e6   :  { %v5569_v52 = vpack.c.bf16 %v3168_v21, %v3163_v11  ;;  %v1144_v61 = vpack.c.bf16 %v3980_v4, %v3965_v57  ;;  %v4083_v37 = vmul.f32 %v951_v19, %v5567_v49  ;;  %v4086_v50 = vmul.f32 %v948_v13, %v5570_v34  ;;  %v5575_v30 = vld [vmem:[#allocation36_spill] sm:$0xff]  ;;  %v5577_v19 = vld [vmem:[#allocation22_spill] sm:$0xff] }
 0x2e7   :  { %1213 = vmatpush1.bf16.msra.mxu0 %v1131_v28  ;;  %v955_v16 = vsel %vm244_vm6, %v5568_v22, %v5563_v2  ;;  %v4093_v24 = vmul.f32 %v944_v12, %v5571_v0  ;;  %v5572_v11 = vpack.c.bf16 %v3176_v56, %v3172_v59  ;;  %v4098_v21 = vpop.permute.xlu0 %1045  ;;  %v1145_v57 = vpack.c.bf16 %v4042_v39, %v4031_v23  ;;  %v5574_v28 = vld [vmem:[#allocation54_spill] sm:$0xff]  ;;  %v5594_v59 = vld [vmem:[#allocation25_spill] sm:$0xff] }
 0x2e8   :  { %1214 = vmatprep.subr.bf16.mxu0 %v5569_v52  ;;  %1299 = vmatpush1.bf16.msra.mxu1 %v1133_v54  ;;  %v4103_v4 = vmul.f32 %v947_v43, %v5570_v34  ;;  %v4106_v47 = vmul.f32 %v956_v15, %v5573_v1  ;;  %v1015_v25 = vsel %vm277_vm5, %v5575_v30, %v5574_v28  ;;  %v5576_v2 = vld [vmem:[#allocation38_spill] sm:$0xff]  ;;  %v5580_v54 = vld [vmem:[#allocation55_spill] sm:$0xff]  ;;  %v5582_v15 = vld [vmem:[#allocation72_spill] sm:$0xff] }
 0x2e9   :  { %1300 = vmatprep.subr.bf16.mxu1 %v5572_v11  ;;  %v4115_v56 = vmul.f32 %v943_v7, %v5571_v0  ;;  %v1011_v23 = vsel %vm277_vm5, %v5574_v28, %v5576_v2  ;;  %v876_v39 = vpop.permute.xlu1 %875  ;;  %v5579_v13 = vpack.c.bf16 %v5577_v19, %v5578_v62  ;;  %v1146_v38 = vpack.c.bf16 %v4045_v31, %v898_v58  ;;  %v5584_v52 = vld [vmem:[#allocation23_spill] sm:$0xff]  ;;  %v5585_v11 = vld [vmem:[#allocation21_spill] sm:$0xff] }
 0x2ea   :  { %v4126_v12 = vmul.f32 %v955_v16, %v5573_v1  ;;  %v1016_v43 = vsel %vm277_vm5, %v5581_v63, %v5580_v54  ;;  %v885_v22 = vsel %vm211_vm4, %v860_v20, %v5582_v15  ;;  %v5583_v7 = vpack.c.bf16 %v3398_v60, %v3390_v48  ;;  %v5587_v58 = vld [vmem:[#allocation15_spill] sm:$0xff] }
 0x2eb   :  { %1215 = vmatpush1.bf16.msra.mxu0 %v5579_v13  ;;  %v5586_v28 = vpack.c.bf16 %v5584_v52, %v5585_v11  ;;  %v4144_v16 = vmul.f32 %v1015_v25, %v5587_v58  ;;  %v5588_v19 = vld [vmem:[#allocation39_spill] sm:$0xff]  ;;  %v5589_v13 = vpack.c.bf16 %v3421_v42, %v3406_v14  ;;  %v862_v48 = vpop.permute.xlu0 %861  ;;  %v1152_v60 = vpack.c.bf16 %v4086_v50, %v4103_v4  ;;  %v5591_v11 = vld [vmem:[#allocation73_spill] sm:$0xff]  ;;  %v5593_v42 = vld [vmem:[#allocation70_spill] sm:$0xff] }
 0x2ec   :  { %1216 = vmatprep.subr.bf16.mxu0 %v5583_v7  ;;  %v1012_v62 = vsel %vm277_vm5, %v5580_v54, %v5588_v19  ;;  %v5590_v7 = vld [vmem:[#allocation17_spill] sm:$0xff]  ;;  %v886_v25 = vsel %vm211_vm4, %v862_v48, %v5591_v11  ;;  %v1154_v54 = vpack.c.bf16 %v4106_v47, %v4126_v12  ;;  %v4167_v14 = vmul.f32 %v1016_v43, %v5587_v58  ;;  %v5597_v12 = vld [vmem:[#allocation27_spill] sm:$0xff]  ;;  %v5598_v43 = vld [vmem:[#allocation26_spill] sm:$0xff] }
 0x2ed   :  { %1301 = vmatpush1.bf16.msra.mxu1 %v5586_v28  ;;  %v4156_v52 = vmul.f32 %v1011_v23, %v5590_v7  ;;  %v5592_v28 = vld [vmem:[#allocation71_spill] sm:$0xff]  ;;  %v889_v50 = vsel %vm211_vm4, %v5593_v42, %v860_v20  ;;  %v904_v4 = vmul.f32 %v885_v22, %v5552_v53  ;;  %v908_v23 = vmul.f32 %v886_v25, %v5552_v53  ;;  %v5600_v25 = vld [vmem:[#allocation56_spill] sm:$0xff] }
 0x2ee   :  { %1302 = vmatprep.subr.bf16.mxu1 %v5589_v13  ;;  %v890_v31 = vsel %vm211_vm4, %v5592_v28, %v862_v48  ;;  %v924_v13 = vpop.permute.xlu1 %923  ;;  %v5596_v55 = vpack.c.bf16 %v5594_v59, %v5595_v40  ;;  %v4178_v48 = vmul.f32 %v1012_v62, %v5590_v7  ;;  %v881_v47 = vsel %vm211_vm4, %v5582_v15, %v876_v39 }
 0x2ef   :  { %v893_v20 = vsel %vm211_vm4, %v876_v39, %v5593_v42  ;;  %v5599_v22 = vpack.c.bf16 %v5597_v12, %v5598_v43  ;;  %v1019_v40 = vsel %vm277_vm5, %v5600_v25, %v5575_v30  ;;  %v907_v59 = vmul.f32 %v890_v31, %v5546_v33  ;;  %v878_v15 = vpop.permute.xlu0 %877 }
 0x2f0   :  { %1217 = vmatpush1.bf16.msra.mxu0 %v5596_v55  ;;  %v1007_v55 = vsel %vm277_vm5, %v5576_v2, %v5600_v25  ;;  %v1148_v39 = vpack.c.bf16 %v908_v23, %v904_v4  ;;  %v903_v42 = vmul.f32 %v889_v50, %v5546_v33  ;;  %v882_v2 = vsel %vm211_vm4, %v5591_v11, %v878_v15  ;;  %v5603_v50 = vld [vmem:[#allocation18_spill] sm:$0xff] }
 0x2f1   :  { %1218 = vmatprep.subr.bf16.mxu0 %v1144_v61  ;;  %1303 = vmatpush1.bf16.msra.mxu1 %v5599_v22  ;;  %v5601_v61 = vld [vmem:[#allocation57_spill] sm:$0xff]  ;;  %v894_v30 = vsel %vm211_vm4, %v878_v15, %v5592_v28  ;;  %v905_v31 = vmul.f32 %v881_v47, %v5558_v44  ;;  %v909_v4 = vmul.f32 %v882_v2, %v5558_v44  ;;  %v5604_v28 = vld [vmem:[#allocation76_spill] sm:$0xff]  ;;  %v5608_v11 = vld [vmem:[#allocation74_spill] sm:$0xff] }
 0x2f2   :  { %1304 = vmatprep.subr.bf16.mxu1 %v1146_v38  ;;  %v1008_v62 = vsel %vm277_vm5, %v5588_v19, %v5601_v61  ;;  %v906_v38 = vmul.f32 %v893_v20, %v5561_v29  ;;  %v910_v23 = vmul.f32 %v894_v30, %v5561_v29  ;;  %v940_v12 = vpop.permute.xlu1 %939  ;;  %v5602_v19 = vpack.c.bf16 %v3975_v45, %v3934_v51  ;;  %v5605_v15 = vld [vmem:[#allocation16_spill] sm:$0xff]  ;;  %v5606_v30 = vld [vmem:[#allocation77_spill] sm:$0xff] }
 0x2f3   :  { %v4219_v43 = vmul.f32 %v1007_v55, %v5603_v50  ;;  %v949_v47 = vsel %vm244_vm6, %v924_v13, %v5604_v28  ;;  %v1020_v20 = vsel %vm277_vm5, %v5601_v61, %v5581_v63  ;;  %v1147_v22 = vpack.c.bf16 %v907_v59, %v903_v42  ;;  %v926_v45 = vpop.permute.xlu0 %925 }
 0x2f4   :  { %1219 = vmatpush1.bf16.msra.mxu0 %v5602_v19  ;;  %v1149_v51 = vpack.c.bf16 %v909_v4, %v905_v31  ;;  %v1150_v25 = vpack.c.bf16 %v910_v23, %v906_v38  ;;  %v1026_v2 = vmul.f32 %v1019_v40, %v5605_v15  ;;  %v4230_v55 = vmul.f32 %v1008_v62, %v5603_v50  ;;  %v5610_v38 = vld [vmem:[#allocation58_spill] sm:$0xff] }
 0x2f5   :  { %1220 = vmatprep.subr.bf16.mxu0 %v1148_v39  ;;  %1305 = vmatpush1.bf16.msra.mxu1 %v1145_v57  ;;  %v950_v19 = vsel %vm244_vm6, %v926_v45, %v5606_v30  ;;  %v5607_v39 = vld [vmem:[#allocation75_spill] sm:$0xff]  ;;  %v953_v63 = vsel %vm244_vm6, %v5608_v11, %v924_v13  ;;  %v968_v59 = vmul.f32 %v949_v47, %v5570_v34  ;;  %v5609_v13 = vld [vmem:[#allocation42_spill] sm:$0xff] }
 0x2f6   :  { %v954_v57 = vsel %vm244_vm6, %v5607_v39, %v926_v45  ;;  %v972_v61 = vmul.f32 %v950_v19, %v5570_v34  ;;  %v988_v40 = vpop.permute.xlu1 %987  ;;  %1306 = vmatprep.subr.bf16.mxu1 %v1150_v25  ;;  %v1030_v62 = vmul.f32 %v1020_v20, %v5605_v15  ;;  %v945_v42 = vsel %vm244_vm6, %v5604_v28, %v940_v12  ;;  %v5611_v28 = vld [vmem:[#allocation40_spill] sm:$0xff]  ;;  %v5640_v34 = vld [vmem:[#allocation5_spill] sm:$0xff] }
 0x2f7   :  { %v957_v31 = vsel %vm244_vm6, %v940_v12, %v5608_v11  ;;  %v1075_v4 = vsel %vm310_vm7, %v5610_v38, %v5609_v13  ;;  %v971_v23 = vmul.f32 %v954_v57, %v5567_v49  ;;  %v942_v47 = vpop.permute.xlu0 %941  ;;  %v4261_v12 = vsel %vm310_vm7, %v5611_v28, %v5610_v38  ;;  %v5613_v57 = vld [vmem:[#allocation80_spill] sm:$0xff] }
 0x2f8   :  { %1221 = vmatpush1.bf16.msra.mxu0 %v1147_v22  ;;  %v1156_v20 = vpack.c.bf16 %v972_v61, %v968_v59  ;;  %v1160_v22 = vpack.c.bf16 %v4178_v48, %v4156_v52  ;;  %v946_v11 = vsel %vm244_vm6, %v5606_v30, %v942_v47  ;;  %v970_v52 = vmul.f32 %v957_v31, %v5573_v1  ;;  %v5615_v61 = vld [vmem:[#allocation43_spill] sm:$0xff] }
 0x2f9   :  { %1222 = vmatprep.subr.bf16.mxu0 %v1152_v60  ;;  %1307 = vmatpush1.bf16.msra.mxu1 %v1149_v51  ;;  %v967_v60 = vmul.f32 %v953_v63, %v5567_v49  ;;  %v969_v51 = vmul.f32 %v945_v42, %v5571_v0  ;;  %v973_v48 = vmul.f32 %v946_v11, %v5571_v0  ;;  %v5616_v42 = vld [vmem:[#allocation59_spill] sm:$0xff] }
 0x2fa   :  { %1308 = vmatprep.subr.bf16.mxu1 %v1154_v54  ;;  %v958_v54 = vsel %vm244_vm6, %v942_v47, %v5607_v39  ;;  %v1004_v25 = vpop.permute.xlu1 %1003  ;;  %v5612_v19 = vpack.c.bf16 %v4066_v27, %v4083_v37  ;;  %v1161_v30 = vpack.c.bf16 %v4230_v55, %v4219_v43  ;;  %v1013_v39 = vsel %vm277_vm5, %v988_v40, %v5613_v57  ;;  %v5617_v43 = vld [vmem:[#allocation41_spill] sm:$0xff] }
 0x2fb   :  { %v974_v45 = vmul.f32 %v958_v54, %v5573_v1  ;;  %v5614_v63 = vpack.c.bf16 %v4093_v24, %v4115_v56  ;;  %v1162_v59 = vpack.c.bf16 %v1030_v62, %v1026_v2  ;;  %v1076_v31 = vsel %vm310_vm7, %v5616_v42, %v5615_v61  ;;  %v990_v38 = vpop.permute.xlu0 %989  ;;  %v5618_v56 = vld [vmem:[#allocation81_spill] sm:$0xff]  ;;  %v5619_v62 = vld [vmem:[#allocation79_spill] sm:$0xff] }
 0x2fc   :  { %1223 = vmatpush1.bf16.msra.mxu0 %v5612_v19  ;;  %v1155_v27 = vpack.c.bf16 %v971_v23, %v967_v60  ;;  %v1157_v37 = vpack.c.bf16 %v973_v48, %v969_v51  ;;  %v1080_v55 = vsel %vm310_vm7, %v5617_v43, %v5616_v42  ;;  %v1084_v24 = vsel %vm310_vm7, %v4047_v3, %v5617_v43 }
 0x2fd   :  { %1224 = vmatprep.subr.bf16.mxu0 %v1156_v20  ;;  %1309 = vmatpush1.bf16.msra.mxu1 %v5614_v63  ;;  %v1158_v47 = vpack.c.bf16 %v974_v45, %v970_v52  ;;  %v1014_v2 = vsel %vm277_vm5, %v990_v38, %v5618_v56  ;;  %v1018_v23 = vsel %vm277_vm5, %v5619_v62, %v990_v38  ;;  %v5620_v20 = vld [vmem:[#allocation78_spill] sm:$0xff]  ;;  %v4313_v52 = vld [vmem:[%s5288_s1 + $0x28] ss:$0 sm:$0xff] }
 0x2fe   :  { %v1017_v60 = vsel %vm277_vm5, %v5620_v20, %v988_v40  ;;  %v1032_v11 = vmul.f32 %v1013_v39, %v5590_v7  ;;  %v1036_v54 = vmul.f32 %v1014_v2, %v5590_v7  ;;  %v4308_v51 = vpop.permute.xlu1 %1043  ;;  %5621 = vst [vmem:[#allocation60_spill] sm:$0xff] %v4313_v52  ;;  %v1092_v48 = vmul.f32 %v4313_v52, %v1076_v31 }
 0x2ff   :  { %1310 = vmatprep.subr.bf16.mxu1 %v1158_v47  ;;  %v1009_v45 = vsel %vm277_vm5, %v5613_v57, %v1004_v25  ;;  %v1021_v40 = vsel %vm277_vm5, %v1004_v25, %v5620_v20  ;;  %v1083_v19 = vsel %vm310_vm7, %v4028_v35, %v5611_v28  ;;  %v1072_v39 = vsel %vm310_vm7, %v5615_v61, %v4047_v3  ;;  %v1006_v57 = vpop.permute.xlu0 %1005  ;;  %v4366_v20 = vld [vmem:[%s5288_s1 + $0x30] ss:$0 sm:$0xff] }
 0x300   :  { %1225 = vmatpush1.bf16.msra.mxu0 %v1155_v27  ;;  %v1035_v63 = vmul.f32 %v1018_v23, %v5587_v58  ;;  %v1164_v42 = vpack.c.bf16 %v1036_v54, %v1032_v11  ;;  %v1031_v31 = vmul.f32 %v1017_v60, %v5587_v58  ;;  %v1010_v28 = vsel %vm277_vm5, %v5618_v56, %v1006_v57 }
 0x301   :  { %1226 = vmatprep.subr.bf16.mxu0 %v1160_v22  ;;  %1311 = vmatpush1.bf16.msra.mxu1 %v1157_v37  ;;  %v4334_v22 = vld [vmem:[%s5288_s1 + $0x38] ss:$0 sm:$0xff]  ;;  %v1022_v3 = vsel %vm277_vm5, %v1006_v57, %v5619_v62  ;;  %v1034_v61 = vmul.f32 %v1021_v40, %v5605_v15  ;;  %v1037_v27 = vmul.f32 %v1010_v28, %v5603_v50 }
 0x302   :  { %1312 = vmatprep.subr.bf16.mxu1 %v1162_v59  ;;  %5622 = vst [vmem:[#allocation44_spill] sm:$0xff] %v4334_v22  ;;  %v1094_v25 = vmul.f32 %v4334_v22, %v1084_v24  ;;  %v1033_v59 = vmul.f32 %v1009_v45, %v5603_v50  ;;  %v1038_v37 = vmul.f32 %v1022_v3, %v5605_v15  ;;  %v1052_v38 = vpop.permute.xlu1 %1051  ;;  %v4355_v24 = vld [vmem:[%s5288_s1 + $0x20] ss:$0 sm:$0xff]  ;;  %5625 = vst [vmem:[#allocation63_spill] sm:$0xff] %v4366_v20 }
 0x303   :  { %v5623_v47 = vpack.c.bf16 %v4167_v14, %v4144_v16  ;;  %v1088_v43 = vmul.f32 %v4313_v52, %v1075_v4  ;;  %5624 = vst [vmem:[#allocation61_spill] sm:$0xff] %v4355_v24  ;;  %v1091_v56 = vmul.f32 %v4355_v24, %v1080_v55  ;;  %v1071_v2 = vsel %vm310_vm7, %v5609_v13, %v4028_v35  ;;  %v1062_v23 = vpop.permute.xlu0 %1061  ;;  %v2582_v35 = vld [vmem:[%s5289_s5] ss:$12 sps:$4 sm:$0xff]  }
 0x304   :  { %v1090_v62 = vmul.f32 %v4334_v22, %v1083_v19  ;;  %v1163_v16 = vpack.c.bf16 %v1035_v63, %v1031_v31  ;;  %v1165_v14 = vpack.c.bf16 %v1037_v27, %v1033_v59  ;;  %v1166_v4 = vpack.c.bf16 %v1038_v37, %v1034_v61 }
 0x305   :  { %1227 = vmatpush1.bf16.msra.mxu0 %v5623_v47  ;;  %1313 = vmatpush1.bf16.msra.mxu1 %v1161_v30  ;;  %v1093_v55 = vmul.f32 %v4366_v20, %v1072_v39  ;;  %v1168_v60 = vpack.c.bf16 %v1092_v48, %v1088_v43  ;;  %v1087_v13 = vmul.f32 %v4355_v24, %v4261_v12  ;;  %v5626_v61 = vmov 0  }
 0x306   :  { %1228 = vmatprep.subr.bf16.mxu0 %v1164_v42  ;;  %v1081_v30 = vsel %vm310_vm7, %v4308_v51, %v1052_v38  ;;  %v1060_v11 = vpop.permute.xlu1 %1059  ;;  %1314 = vmatprep.subr.bf16.mxu1 %v1166_v4  ;;  %v1170_v54 = vpack.c.bf16 %v1094_v25, %v1090_v62  ;;  %v1089_v45 = vmul.f32 %v4366_v20, %v1071_v2 }
 0x307   :  { %v1077_v48 = vsel %vm310_vm7, %v1052_v38, %v1060_v11  ;;  %v1167_v40 = vpack.c.bf16 %v1091_v56, %v1087_v13  ;;  %v1054_v19 = vpop.permute.xlu0 %1053  ;;  %v1095_v12 = vmul.f32 %v4355_v24, %v1081_v30 }
 0x308   :  { %v1169_v39 = vpack.c.bf16 %v1093_v55, %v1089_v45  ;;  %v1078_v63 = vsel %vm310_vm7, %v1054_v19, %v1062_v23  ;;  %v1082_v57 = vsel %vm310_vm7, %v4098_v21, %v1054_v19  ;;  %v1096_v42 = vmul.f32 %v4313_v52, %v1077_v48 }
 0x309   :  { %1229 = vmatpush1.bf16.msra.mxu0 %v1163_v16  ;;  %1315 = vmatpush1.bf16.msra.mxu1 %v1165_v14  ;;  %v1099_v25 = vmul.f32 %v4355_v24, %v1082_v57  ;;  %v1100_v31 = vmul.f32 %v4313_v52, %v1078_v63 }
 0x30a   :  { %1241 = vmatprep.subr.bf16.mxu0 %v1168_v60  ;;  %1327 = vmatprep.subr.bf16.mxu1 %v1170_v54  ;;  %v1068_v28 = vpop.permute.xlu1 %1067 }
 0x30b   :  { %v1073_v3 = vsel %vm310_vm7, %v1060_v11, %v1068_v28  ;;  %v1085_v59 = vsel %vm310_vm7, %v1068_v28, %v4308_v51  ;;  %v1171_v27 = vpack.c.bf16 %v1099_v25, %v1095_v12  ;;  %v1070_v37 = vpop.permute.xlu0 %1069  ;;  %v1172_v38 = vpack.c.bf16 %v1100_v31, %v1096_v42 }
 0x30c   :  { %1231 = vmatmul.mubr.bf16.vlgmr.msra.gmra.mrb[8].mxu0 %v2582_v35  ;;  %1317 = vmatmul.mubr.bf16.vlgmr.msra.gmra.mrb[8].mxu1 %v2582_v35  ;;  %v1074_v47 = vsel %vm310_vm7, %v1062_v23, %v1070_v37  ;;  %v1086_v43 = vsel %vm310_vm7, %v1070_v37, %v4098_v21  ;;  %v1097_v56 = vmul.f32 %v4366_v20, %v1073_v3  ;;  %v2585_v23 = vld [vmem:[%s5289_s5 + $0x8] ss:$12 sps:$4 sm:$0xff]  }
 0x30d   :  { %1242 = vmatpush1.bf16.msra.mxu0 %v1167_v40  ;;  %1328 = vmatpush1.bf16.msra.mxu1 %v1169_v39  ;;  %v1098_v2 = vmul.f32 %v4334_v22, %v1085_v59  ;;  %v1101_v51 = vmul.f32 %v4366_v20, %v1074_v47  ;;  %v1102_v62 = vmul.f32 %v4334_v22, %v1086_v43 }
 0x30e   :  { %1273 = vmatprep.mubr.bf16.mxu0 %v5626_v61  ;;  %1359 = vmatprep.mubr.bf16.mxu1 %v5626_v61 }
 0x30f   :  { %1243 = vmatprep.subr.bf16.mxu0 %v1172_v38  ;;  %v1173_v16 = vpack.c.bf16 %v1101_v51, %v1097_v56  ;;  %v1174_v14 = vpack.c.bf16 %v1102_v62, %v1098_v2 }
 0x311   :  { %1244 = vmatpush1.bf16.msra.mxu0 %v1171_v27  ;;  %1329 = vmatprep.subr.bf16.mxu1 %v1174_v14 }
 0x312   :  { %1330 = vmatpush1.bf16.msra.mxu1 %v1173_v16 }
 0x318   :  { %2406 = vmatmul.mubr.msk.bf16.vlgmr.msra.gmra.mrb[8].mxu0 %vm1194_vm10, %v2585_v23  ;;  %2407 = vmatmul.mubr.msk.bf16.vlgmr.msra.gmra.mrb[8].mxu1 %vm1194_vm10, %v2585_v23 }
 0x31a   :  { %v1375_v21 = vpop.permute.xlu1 %1374 }
 0x31c   :  { %v1380_v4 = vpop.permute.xlu0 %1379 }
 0x31e   :  { %v1395_v55 = vpop.permute.xlu1 %1394 }
 0x320   :  { %v1400_v12 = vpop.permute.xlu0 %1399 }
 0x3eb   :  { %v1275_v60 = vpop.f32.mrb[8].mxu0  ;;  %v1361_v30 = vpop.f32.mrb[8].mxu1 }
 0x3ec   :  { %v1382_v35 = vmul.f32 %v1375_v21, %v1275_v60  ;;  %v1277_v13 = vpop.f32.mrb[9].mxu0  ;;  %v1384_v11 = vmul.f32 %v1375_v21, %v1361_v30  ;;  %v1363_v45 = vpop.f32.mrb[9].mxu1 }
 0x3ed   :  { %v1279_v54 = vpop.f32.mrb[10].mxu0  ;;  %v1365_v39 = vpop.f32.mrb[10].mxu1  ;;  %v1383_v47 = vmul.f32 %v1375_v21, %v1277_v13  ;;  %v1385_v2 = vmul.f32 %v1375_v21, %v1363_v45 }
 0x3ee   :  { %v1402_v48 = vadd.f32 %v1395_v55, %v1382_v35  ;;  %v1386_v40 = vmul.f32 %v1380_v4, %v1279_v54  ;;  %v1281_v19 = vpop.f32.mrb[11].mxu0  ;;  %v1404_v63 = vadd.f32 %v1395_v55, %v1384_v11  ;;  %v1388_v57 = vmul.f32 %v1380_v4, %v1365_v39  ;;  %v1367_v42 = vpop.f32.mrb[11].mxu1  ;;  %v4547_v35 = vld [vmem:[%s5292_s8] sm:$0xff] }
 0x3ef   :  { %v1387_v43 = vmul.f32 %v1380_v4, %v1281_v19  ;;  %v1403_v56 = vadd.f32 %v1395_v55, %v1383_v47  ;;  %v1389_v62 = vmul.f32 %v1380_v4, %v1367_v42  ;;  %v1405_v14 = vadd.f32 %v1395_v55, %v1385_v2  ;;  %5628 = vst [vmem:[#allocation62_spill] sm:$0xff] %v4547_v35  ;;  %v1813_v39 = vld [vmem:[%s5294_s10] sm:$0xff] }
 0x3f0   :  { %v4408_v25 = vmax.f32 %v1402_v48, 0.0  ;;  %v1406_v31 = vadd.f32 %v1400_v12, %v1386_v40  ;;  %v1408_v28 = vadd.f32 %v1400_v12, %v1388_v57  ;;  %v4414_v59 = vmax.f32 %v1404_v63, 0.0  ;;  %v1803_v40 = vld [vmem:[%s5293_s9] sm:$0xff] }
 0x3f1   :  { %v1407_v51 = vadd.f32 %v1400_v12, %v1387_v43  ;;  %v4482_v16 = vmax.f32 %v1403_v56, 0.0  ;;  %v1409_v60 = vadd.f32 %v1400_v12, %v1389_v62  ;;  %v4490_v21 = vmax.f32 %v1405_v14, 0.0 }
 0x3f2   :  { %v4410_v3 = vmax.f32 %v1406_v31, 0.0  ;;  %1418 = vrot.lane.b32.xlu1 %v4408_v25, %s2596_s29  ;;  %5627 = vst [vmem:[#allocation6_spill] sm:$0xff] %v4414_v59  ;;  %v4416_v27 = vmax.f32 %v1408_v28, 0.0  ;;  %v2409_v30 = vcombine.high %v4547_v35, %v4547_v35 }
 0x3f3   :  { %v4486_v23 = vmax.f32 %v1407_v51, 0.0  ;;  %v4494_v4 = vmax.f32 %v1409_v60, 0.0 }
 0x3f4   :  { %1420 = vrot.lane.b32.xlu0 %v4410_v3, %s2596_s29  ;;  %2410 = vmatprep.mubr.msk.bf16.mxu0 %vm1717_vm11, %v2409_v30 }
 0x3f5   :  { %2411 = vmatprep.mubr.msk.bf16.mxu1 %vm1717_vm11, %v2409_v30 }
 0x3f6   :  { %1426 = vrot.lane.b32.xlu1 %v4414_v59, %s2596_s29 }
 0x3f8   :  { %1428 = vrot.lane.b32.xlu0 %v4416_v27, %s2596_s29 }
 0x3fa   :  { %1450 = vrot.lane.b32.xlu1 %v4408_v25, %s2597_s2 }
 0x3fc   :  { %1452 = vrot.lane.b32.xlu0 %v4410_v3, %s2597_s2 }
 0x3fe   :  { %1458 = vrot.lane.b32.xlu1 %v4414_v59, %s2597_s2 }
 0x400   :  { %1460 = vrot.lane.b32.xlu0 %v4416_v27, %s2597_s2 }
 0x402   :  { %1482 = vrot.lane.b32.xlu1 %v4408_v25, %s2598_s20 }
 0x404   :  { %1484 = vrot.lane.b32.xlu0 %v4410_v3, %s2598_s20 }
 0x406   :  { %1490 = vrot.lane.b32.xlu1 %v4414_v59, %s2598_s20 }
 0x408   :  { %1492 = vrot.lane.b32.xlu0 %v4416_v27, %s2598_s20 }
 0x40a   :  { %1514 = vrot.lane.b32.xlu1 %v4408_v25, %s2599_s21 }
 0x40c   :  { %1516 = vrot.lane.b32.xlu0 %v4410_v3, %s2599_s21 }
 0x40e   :  { %1522 = vrot.lane.b32.xlu1 %v4414_v59, %s2599_s21 }
 0x410   :  { %1524 = vrot.lane.b32.xlu0 %v4416_v27, %s2599_s21 }
 0x412   :  { %1546 = vrot.lane.b32.xlu1 %v4408_v25, %s2600_s22 }
 0x414   :  { %1548 = vrot.lane.b32.xlu0 %v4410_v3, %s2600_s22 }
 0x416   :  { %1554 = vrot.lane.b32.xlu1 %v4414_v59, %s2600_s22 }
 0x418   :  { %1556 = vrot.lane.b32.xlu0 %v4416_v27, %s2600_s22 }
 0x41a   :  { %1578 = vrot.lane.b32.xlu1 %v4408_v25, %s5467_s0 }
 0x41c   :  { %1580 = vrot.lane.b32.xlu0 %v4410_v3, %s5467_s0 }
 0x41e   :  { %1586 = vrot.lane.b32.xlu1 %v4414_v59, %s5467_s0 }
 0x420   :  { %1588 = vrot.lane.b32.xlu0 %v4416_v27, %s5467_s0 }
 0x422   :  { %1610 = vrot.lane.b32.xlu1 %v4408_v25, %s5468_s30 }
 0x424   :  { %1612 = vrot.lane.b32.xlu0 %v4410_v3, %s5468_s30 }
 0x426   :  { %1618 = vrot.lane.b32.xlu1 %v4414_v59, %s5468_s30 }
 0x428   :  { %1620 = vrot.lane.b32.xlu0 %v4416_v27, %s5468_s30 }
 0x42a   :  { %1642 = vrot.lane.b32.xlu1 %v4408_v25, %s5469_s18 }
 0x42c   :  { %1644 = vrot.lane.b32.xlu0 %v4410_v3, %s5469_s18 }
 0x42e   :  { %1650 = vrot.lane.b32.xlu1 %v4414_v59, %s5469_s18 }
 0x430   :  { %1652 = vrot.lane.b32.xlu0 %v4416_v27, %s5469_s18 }
 0x432   :  { %1422 = vrot.lane.b32.xlu1 %v4482_v16, %s2596_s29 }
 0x434   :  { %1424 = vrot.lane.b32.xlu0 %v4486_v23, %s2596_s29 }
 0x436   :  { %1430 = vrot.lane.b32.xlu1 %v4490_v21, %s2596_s29 }
 0x438   :  { %1432 = vrot.lane.b32.xlu0 %v4494_v4, %s2596_s29 }
 0x43a   :  { %1454 = vrot.lane.b32.xlu1 %v4482_v16, %s2597_s2 }
 0x43c   :  { %1456 = vrot.lane.b32.xlu0 %v4486_v23, %s2597_s2 }
 0x43e   :  { %1462 = vrot.lane.b32.xlu1 %v4490_v21, %s2597_s2 }
 0x440   :  { %1464 = vrot.lane.b32.xlu0 %v4494_v4, %s2597_s2 }
 0x442   :  { %1486 = vrot.lane.b32.xlu1 %v4482_v16, %s2598_s20 }
 0x444   :  { %1488 = vrot.lane.b32.xlu0 %v4486_v23, %s2598_s20 }
 0x446   :  { %1494 = vrot.lane.b32.xlu1 %v4490_v21, %s2598_s20 }
 0x448   :  { %1496 = vrot.lane.b32.xlu0 %v4494_v4, %s2598_s20 }
 0x44a   :  { %1518 = vrot.lane.b32.xlu1 %v4482_v16, %s2599_s21 }
 0x44c   :  { %1520 = vrot.lane.b32.xlu0 %v4486_v23, %s2599_s21 }
 0x44e   :  { %1526 = vrot.lane.b32.xlu1 %v4490_v21, %s2599_s21 }
 0x450   :  { %1528 = vrot.lane.b32.xlu0 %v4494_v4, %s2599_s21 }
 0x452   :  { %1550 = vrot.lane.b32.xlu1 %v4482_v16, %s2600_s22 }
 0x454   :  { %1552 = vrot.lane.b32.xlu0 %v4486_v23, %s2600_s22 }
 0x456   :  { %1558 = vrot.lane.b32.xlu1 %v4490_v21, %s2600_s22 }
 0x458   :  { %1560 = vrot.lane.b32.xlu0 %v4494_v4, %s2600_s22 }
 0x45a   :  { %1582 = vrot.lane.b32.xlu1 %v4482_v16, %s5467_s0 }
 0x45c   :  { %1584 = vrot.lane.b32.xlu0 %v4486_v23, %s5467_s0 }
 0x45e   :  { %1590 = vrot.lane.b32.xlu1 %v4490_v21, %s5467_s0 }
 0x460   :  { %1592 = vrot.lane.b32.xlu0 %v4494_v4, %s5467_s0 }
 0x462   :  { %1614 = vrot.lane.b32.xlu1 %v4482_v16, %s5468_s30 }
 0x464   :  { %v1419_v55 = vpop.permute.xlu1 %1418  ;;  %1616 = vrot.lane.b32.xlu0 %v4486_v23, %s5468_s30 }
 0x466   :  { %1622 = vrot.lane.b32.xlu1 %v4490_v21, %s5468_s30  ;;  %v1421_v13 = vpop.permute.xlu0 %1420 }
 0x468   :  { %v1427_v11 = vpop.permute.xlu1 %1426  ;;  %1624 = vrot.lane.b32.xlu0 %v4494_v4, %s5468_s30 }
 0x46a   :  { %1646 = vrot.lane.b32.xlu1 %v4482_v16, %s5469_s18  ;;  %v1429_v54 = vpop.permute.xlu0 %1428 }
 0x46c   :  { %v4557_v45 = vpop.permute.xlu1 %1450  ;;  %1648 = vrot.lane.b32.xlu0 %v4486_v23, %s5469_s18 }
 0x46e   :  { %1654 = vrot.lane.b32.xlu1 %v4490_v21, %s5469_s18  ;;  %v4563_v48 = vpop.permute.xlu0 %1452 }
 0x470   :  { %v4568_v19 = vpop.permute.xlu1 %1458  ;;  %1656 = vrot.lane.b32.xlu0 %v4494_v4, %s5469_s18 }
 0x472   :  { %1806 = vperm.xlu1 %2579, %v1803_v40   ;;  %v4575_v12 = vpop.permute.xlu0 %1460 }
 0x474   :  { %v4577_v63 = vpop.permute.xlu1 %1482  ;;  %1816 = vperm.xlu0 %2578, %v1813_v39  }
 0x476   :  { %v4579_v57 = vpop.permute.xlu0 %1484 }
 0x478   :  { %v4581_v42 = vpop.permute.xlu1 %1490 }
 0x47a   :  { %v4583_v31 = vpop.permute.xlu0 %1492 }
 0x47c   :  { %v4585_v28 = vpop.permute.xlu1 %1514 }
 0x47e   :  { %v4587_v47 = vpop.permute.xlu0 %1516 }
 0x480   :  { %v4589_v43 = vpop.permute.xlu1 %1522 }
 0x482   :  { %v4591_v56 = vpop.permute.xlu0 %1524 }
 0x484   :  { %v4593_v2 = vpop.permute.xlu1 %1546 }
 0x486   :  { %v4595_v51 = vpop.permute.xlu0 %1548 }
 0x488   :  { %v4597_v62 = vpop.permute.xlu1 %1554 }
 0x48a   :  { %v4599_v14 = vpop.permute.xlu0 %1556 }
 0x48c   :  { %v4601_v60 = vpop.permute.xlu1 %1578 }
 0x48e   :  { %v4603_v30 = vpop.permute.xlu0 %1580 }
 0x48f   :  { %5629 = vst [vmem:[#allocation45_spill] sm:$0xff] %v4603_v30 }
 0x490   :  { %v4605_v40 = vpop.permute.xlu1 %1586 }
 0x492   :  { %v4607_v39 = vpop.permute.xlu0 %1588 }
 0x493   :  { %5630 = vst [vmem:[#allocation64_spill] sm:$0xff] %v4607_v39  ;;  %v5642_v39 = vld [vmem:[#allocation4_spill] sm:$0xff] }
 0x494   :  { %v4609_v38 = vpop.permute.xlu1 %1610 }
 0x495   :  { %5631 = vst [vmem:[#allocation30_spill] sm:$0xff] %v4609_v38 }
 0x496   :  { %v4611_v37 = vpop.permute.xlu0 %1612 }
 0x497   :  { %5632 = vst [vmem:[#allocation46_spill] sm:$0xff] %v4611_v37  ;;  %v5639_v37 = vld [vmem:[#allocation2_spill] sm:$0xff] }
 0x498   :  { %v4613_v61 = vpop.permute.xlu1 %1618 }
 0x499   :  { %5633 = vst [vmem:[#allocation28_spill] sm:$0xff] %v4613_v61 }
 0x49a   :  { %v4615_v22 = vpop.permute.xlu0 %1620 }
 0x49b   :  { %5634 = vst [vmem:[#allocation65_spill] sm:$0xff] %v4615_v22 }
 0x49c   :  { %v4617_v20 = vpop.permute.xlu1 %1642 }
 0x49d   :  { %5635 = vst [vmem:[#allocation67_spill] sm:$0xff] %v4617_v20 }
 0x49e   :  { %v4619_v35 = vpop.permute.xlu0 %1644 }
 0x49f   :  { %5636 = vst [vmem:[#allocation66_spill] sm:$0xff] %v4619_v35 }
 0x4a0   :  { %v4621_v52 = vpop.permute.xlu1 %1650 }
 0x4a1   :  { %5637 = vst [vmem:[#allocation8_spill] sm:$0xff] %v4621_v52 }
 0x4a2   :  { %v4623_v24 = vpop.permute.xlu0 %1652 }
 0x4a3   :  { %5638 = vst [vmem:[#allocation31_spill] sm:$0xff] %v4623_v24 }
 0x4a4   :  { %v1423_v15 = vpop.permute.xlu1 %1422 }
 0x4a5   :  { %v1438_v50 = vsel %vm79_vm0, %v1419_v55, %v1423_v15  ;;  %v1436_v61 = vsel %vm79_vm0, %v1423_v15, %v1427_v11 }
 0x4a6   :  { %v1425_v7 = vpop.permute.xlu0 %1424  ;;  %v1443_v38 = vmul.f32 %v1438_v50, %v5639_v37  ;;  %v1444_v15 = vmul.f32 %v1436_v61, %v5640_v34 }
 0x4a7   :  { %v1439_v58 = vsel %vm79_vm0, %v1421_v13, %v1425_v7  ;;  %v1437_v22 = vsel %vm79_vm0, %v1425_v7, %v1429_v54  ;;  %v5641_v7 = vld [vmem:[#allocation3_spill] sm:$0xff] }
 0x4a8   :  { %v1447_v20 = vmul.f32 %v1439_v58, %v5639_v37  ;;  %v1431_v35 = vpop.permute.xlu1 %1430  ;;  %v1448_v30 = vmul.f32 %v1437_v22, %v5640_v34 }
 0x4a9   :  { %v1434_v52 = vsel %vm79_vm0, %v1427_v11, %v1431_v35  ;;  %v1440_v24 = vsel %vm79_vm0, %v1431_v35, %v1419_v55 }
 0x4aa   :  { %v1433_v1 = vpop.permute.xlu0 %1432  ;;  %v1675_v0 = vpack.c.bf16 %v1447_v20, %v1443_v38  ;;  %v1442_v37 = vmul.f32 %v1440_v24, %v5641_v7  ;;  %v1445_v49 = vmul.f32 %v1434_v52, %v5642_v39  ;;  %v1676_v52 = vpack.c.bf16 %v1448_v30, %v1444_v15 }
 0x4ab   :  { %v1435_v50 = vsel %vm79_vm0, %v1429_v54, %v1433_v1  ;;  %v1441_v58 = vsel %vm79_vm0, %v1433_v1, %v1421_v13 }
 0x4ac   :  { %v1446_v59 = vmul.f32 %v1441_v58, %v5641_v7  ;;  %v1449_v55 = vmul.f32 %v1435_v50, %v5642_v39  ;;  %v1455_v35 = vpop.permute.xlu1 %1454  ;;  %1721 = vmatprep.subr.bf16.mxu0 %v1675_v0 }
 0x4ad   :  { %v1468_v22 = vsel %vm112_vm1, %v1455_v35, %v4568_v19  ;;  %v1470_v1 = vsel %vm112_vm1, %v4557_v45, %v1455_v35 }
 0x4ae   :  { %v1674_v20 = vpack.c.bf16 %v1446_v59, %v1442_v37  ;;  %v1457_v24 = vpop.permute.xlu0 %1456  ;;  %v1677_v38 = vpack.c.bf16 %v1449_v55, %v1445_v49  ;;  %v1475_v13 = vmul.f32 %v1470_v1, %v2836_v26  ;;  %v1476_v11 = vmul.f32 %v1468_v22, %v2869_v41 }
 0x4af   :  { %v1469_v0 = vsel %vm112_vm1, %v1457_v24, %v4575_v12  ;;  %v1471_v61 = vsel %vm112_vm1, %v4563_v48, %v1457_v24 }
 0x4b0   :  { %v1479_v54 = vmul.f32 %v1471_v61, %v2836_v26  ;;  %v1480_v50 = vmul.f32 %v1469_v0, %v2869_v41  ;;  %v1463_v59 = vpop.permute.xlu1 %1462  ;;  %1722 = vmatpush1.bf16.msra.mxu0 %v1674_v20  ;;  %1762 = vmatprep.subr.bf16.mxu1 %v1677_v38 }
 0x4b1   :  { %v1466_v49 = vsel %vm112_vm1, %v4568_v19, %v1463_v59  ;;  %v1472_v37 = vsel %vm112_vm1, %v1463_v59, %v4557_v45  ;;  %1763 = vmatpush1.bf16.msra.mxu1 %v1676_v52 }
 0x4b2   :  { %v1680_v30 = vpack.c.bf16 %v1480_v50, %v1476_v11  ;;  %v1465_v58 = vpop.permute.xlu0 %1464  ;;  %v1679_v55 = vpack.c.bf16 %v1479_v54, %v1475_v13  ;;  %v1474_v22 = vmul.f32 %v1472_v37, %v2849_v32  ;;  %v1477_v19 = vmul.f32 %v1466_v49, %v2859_v36 }
 0x4b3   :  { %v1467_v35 = vsel %vm112_vm1, %v4575_v12, %v1465_v58  ;;  %v1473_v15 = vsel %vm112_vm1, %v1465_v58, %v4563_v48 }
 0x4b4   :  { %v1478_v1 = vmul.f32 %v1473_v15, %v2849_v32  ;;  %v1481_v45 = vmul.f32 %v1467_v35, %v2859_v36  ;;  %v1487_v20 = vpop.permute.xlu1 %1486  ;;  %1723 = vmatprep.subr.bf16.mxu0 %v1679_v55 }
 0x4b5   :  { %v1500_v24 = vsel %vm145_vm2, %v1487_v20, %v4581_v42  ;;  %v1502_v12 = vsel %vm145_vm2, %v4577_v63, %v1487_v20 }
 0x4b6   :  { %v1678_v38 = vpack.c.bf16 %v1478_v1, %v1474_v22  ;;  %v1489_v48 = vpop.permute.xlu0 %1488  ;;  %v1681_v52 = vpack.c.bf16 %v1481_v45, %v1477_v19  ;;  %v1507_v13 = vmul.f32 %v1502_v12, %v2890_v5  ;;  %v1508_v11 = vmul.f32 %v1500_v24, %v2901_v9 }
 0x4b7   :  { %v1501_v0 = vsel %vm145_vm2, %v1489_v48, %v4583_v31  ;;  %v1503_v61 = vsel %vm145_vm2, %v4579_v57, %v1489_v48 }
 0x4b8   :  { %v1511_v54 = vmul.f32 %v1503_v61, %v2890_v5  ;;  %v1512_v50 = vmul.f32 %v1501_v0, %v2901_v9  ;;  %v1495_v59 = vpop.permute.xlu1 %1494  ;;  %1724 = vmatpush1.bf16.msra.mxu0 %v1678_v38  ;;  %1764 = vmatprep.subr.bf16.mxu1 %v1681_v52 }
 0x4b9   :  { %v1498_v49 = vsel %vm145_vm2, %v4581_v42, %v1495_v59  ;;  %v1504_v37 = vsel %vm145_vm2, %v1495_v59, %v4577_v63  ;;  %1765 = vmatpush1.bf16.msra.mxu1 %v1680_v30 }
 0x4ba   :  { %v1684_v58 = vpack.c.bf16 %v1512_v50, %v1508_v11  ;;  %v1497_v55 = vpop.permute.xlu0 %1496  ;;  %v1683_v35 = vpack.c.bf16 %v1511_v54, %v1507_v13  ;;  %v1506_v19 = vmul.f32 %v1504_v37, %v2898_v8  ;;  %v1509_v42 = vmul.f32 %v1498_v49, %v2904_v10 }
 0x4bb   :  { %v1499_v15 = vsel %vm145_vm2, %v4583_v31, %v1497_v55  ;;  %v1505_v22 = vsel %vm145_vm2, %v1497_v55, %v4579_v57 }
 0x4bc   :  { %v1510_v1 = vmul.f32 %v1505_v22, %v2898_v8  ;;  %v1513_v63 = vmul.f32 %v1499_v15, %v2904_v10  ;;  %v1519_v30 = vpop.permute.xlu1 %1518  ;;  %1725 = vmatprep.subr.bf16.mxu0 %v1683_v35  ;;  %v5643_v15 = vld [vmem:[#allocation7_spill] sm:$0xff] }
 0x4bd   :  { %v1532_v45 = vsel %vm178_vm3, %v1519_v30, %v4589_v43  ;;  %v1534_v31 = vsel %vm178_vm3, %v4585_v28, %v1519_v30  ;;  %v1691_v30 = vpack.c.bf16 %v4486_v23, %v4482_v16 }
 0x4be   :  { %v1682_v20 = vpack.c.bf16 %v1510_v1, %v1506_v19  ;;  %v1521_v57 = vpop.permute.xlu0 %1520  ;;  %v1685_v24 = vpack.c.bf16 %v1513_v63, %v1509_v42  ;;  %v1539_v12 = vmul.f32 %v1534_v31, %v2893_v6  ;;  %v1540_v52 = vmul.f32 %v1532_v45, %v2914_v18 }
 0x4bf   :  { %v1533_v38 = vsel %vm178_vm3, %v1521_v57, %v4591_v56  ;;  %v1535_v48 = vsel %vm178_vm3, %v4587_v47, %v1521_v57  ;;  %v1693_v45 = vpack.c.bf16 %v4494_v4, %v4490_v21 }
 0x4c0   :  { %v1543_v13 = vmul.f32 %v1535_v48, %v2893_v6  ;;  %v1544_v0 = vmul.f32 %v1533_v38, %v2914_v18  ;;  %v1527_v61 = vpop.permute.xlu1 %1526  ;;  %1726 = vmatpush1.bf16.msra.mxu0 %v1682_v20  ;;  %1766 = vmatprep.subr.bf16.mxu1 %v1685_v24 }
 0x4c1   :  { %v1530_v11 = vsel %vm178_vm3, %v4589_v43, %v1527_v61  ;;  %v1536_v54 = vsel %vm178_vm3, %v1527_v61, %v4585_v28  ;;  %1767 = vmatpush1.bf16.msra.mxu1 %v1684_v58 }
 0x4c2   :  { %v1688_v50 = vpack.c.bf16 %v1544_v0, %v1540_v52  ;;  %v1529_v59 = vpop.permute.xlu0 %1528  ;;  %v1687_v49 = vpack.c.bf16 %v1543_v13, %v1539_v12  ;;  %v1538_v35 = vmul.f32 %v1536_v54, %v5532_v46  ;;  %v1541_v43 = vmul.f32 %v1530_v11, %v5643_v15  ;;  %v5645_v54 = vld [vmem:[#allocation6_spill] sm:$0xff] }
 0x4c3   :  { %v1531_v37 = vsel %vm178_vm3, %v4591_v56, %v1529_v59  ;;  %v1537_v55 = vsel %vm178_vm3, %v1529_v59, %v4587_v47  ;;  %v5644_v11 = vpack.c.bf16 %v4410_v3, %v4408_v25  ;;  %v5648_v3 = vld [vmem:[#allocation64_spill] sm:$0xff] }
 0x4c4   :  { %v1542_v22 = vmul.f32 %v1537_v55, %v5532_v46  ;;  %v1545_v28 = vmul.f32 %v1531_v37, %v5643_v15  ;;  %v1551_v58 = vpop.permute.xlu1 %1550  ;;  %1727 = vmatprep.subr.bf16.mxu0 %v1687_v49 }
 0x4c5   :  { %v1564_v19 = vsel %vm211_vm4, %v1551_v58, %v4597_v62  ;;  %v1566_v31 = vsel %vm211_vm4, %v4593_v2, %v1551_v58  ;;  %v5650_v58 = vld [vmem:[#allocation13_spill] sm:$0xff] }
 0x4c6   :  { %v1686_v42 = vpack.c.bf16 %v1542_v22, %v1538_v35  ;;  %v1553_v56 = vpop.permute.xlu0 %1552  ;;  %v1689_v1 = vpack.c.bf16 %v1545_v28, %v1541_v43  ;;  %v1571_v20 = vmul.f32 %v1564_v19, %v5552_v53  ;;  %v1570_v38 = vmul.f32 %v1566_v31, %v5546_v33  ;;  %v5647_v35 = vld [vmem:[#allocation19_spill] sm:$0xff]  ;;  %v5649_v22 = vld [vmem:[#allocation45_spill] sm:$0xff] }
 0x4c7   :  { %v1565_v47 = vsel %vm211_vm4, %v1553_v56, %v4599_v14  ;;  %v1567_v63 = vsel %vm211_vm4, %v4595_v51, %v1553_v56 }
 0x4c8   :  { %v1575_v57 = vmul.f32 %v1565_v47, %v5552_v53  ;;  %v1559_v24 = vpop.permute.xlu1 %1558  ;;  %1728 = vmatpush1.bf16.msra.mxu0 %v1686_v42  ;;  %1768 = vmatprep.subr.bf16.mxu1 %v1689_v1  ;;  %v1574_v23 = vmul.f32 %v1567_v63, %v5546_v33 }
 0x4c9   :  { %v1562_v12 = vsel %vm211_vm4, %v4597_v62, %v1559_v24  ;;  %v1568_v16 = vsel %vm211_vm4, %v1559_v24, %v4593_v2  ;;  %1729 = vmatprep.subr.bf16.mxu0 %v1691_v30  ;;  %1769 = vmatpush1.bf16.msra.mxu1 %v1688_v50  ;;  %v5646_v50 = vpack.c.bf16 %v4416_v27, %v5645_v54  ;;  %v5658_v54 = vld [vmem:[#allocation17_spill] sm:$0xff] }
 0x4ca   :  { %1770 = vmatprep.subr.bf16.mxu1 %v1693_v45  ;;  %v1561_v21 = vpop.permute.xlu0 %1560  ;;  %v1695_v4 = vpack.c.bf16 %v1575_v57, %v1571_v20  ;;  %v1572_v52 = vmul.f32 %v1562_v12, %v5558_v44  ;;  %v1573_v2 = vmul.f32 %v1568_v16, %v5561_v29  ;;  %v1694_v59 = vpack.c.bf16 %v1574_v23, %v1570_v38  ;;  %v5651_v57 = vld [vmem:[#allocation14_spill] sm:$0xff]  ;;  %v5652_v12 = vld [vmem:[#allocation12_spill] sm:$0xff] }
 0x4cb   :  { %v1563_v48 = vsel %vm211_vm4, %v4599_v14, %v1561_v21  ;;  %v1569_v62 = vsel %vm211_vm4, %v1561_v21, %v4595_v51  ;;  %v5653_v21 = vld [vmem:[#allocation28_spill] sm:$0xff]  ;;  %v5654_v38 = vld [vmem:[#allocation30_spill] sm:$0xff] }
 0x4cc   :  { %v1576_v13 = vmul.f32 %v1563_v48, %v5558_v44  ;;  %v1577_v0 = vmul.f32 %v1569_v62, %v5561_v29  ;;  %v1583_v61 = vpop.permute.xlu1 %1582  ;;  %1730 = vmatpush1.bf16.msra.mxu0 %v5644_v11 }
 0x4cd   :  { %v1596_v14 = vsel %vm244_vm6, %v1583_v61, %v4605_v40  ;;  %v1598_v51 = vsel %vm244_vm6, %v4601_v60, %v1583_v61  ;;  %1731 = vmatprep.subr.bf16.mxu0 %v1695_v4  ;;  %1771 = vmatpush1.bf16.msra.mxu1 %v5646_v50  ;;  %v5656_v61 = vld [vmem:[#allocation46_spill] sm:$0xff] }
 0x4ce   :  { %v1696_v49 = vpack.c.bf16 %v1576_v13, %v1572_v52  ;;  %v1585_v37 = vpop.permute.xlu0 %1584  ;;  %v1697_v55 = vpack.c.bf16 %v1577_v0, %v1573_v2  ;;  %v1602_v25 = vmul.f32 %v1598_v51, %v5647_v35  ;;  %v1603_v19 = vmul.f32 %v1596_v14, %v5650_v58  ;;  %v5655_v13 = vld [vmem:[#allocation65_spill] sm:$0xff]  ;;  %v5657_v14 = vld [vmem:[#allocation15_spill] sm:$0xff] }
 0x4cf   :  { %v1597_v43 = vsel %vm244_vm6, %v1585_v37, %v5648_v3  ;;  %v1599_v28 = vsel %vm244_vm6, %v5649_v22, %v1585_v37 }
 0x4d0   :  { %v1606_v42 = vmul.f32 %v1599_v28, %v5647_v35  ;;  %v1607_v27 = vmul.f32 %v1597_v43, %v5650_v58  ;;  %v1591_v56 = vpop.permute.xlu1 %1590  ;;  %1732 = vmatpush1.bf16.msra.mxu0 %v1694_v59  ;;  %1772 = vmatprep.subr.bf16.mxu1 %v1697_v55 }
 0x4d1   :  { %v1594_v1 = vsel %vm244_vm6, %v4605_v40, %v1591_v56  ;;  %v1600_v47 = vsel %vm244_vm6, %v1591_v56, %v4601_v60  ;;  %1773 = vmatpush1.bf16.msra.mxu1 %v1696_v49  ;;  %v5660_v56 = vld [vmem:[#allocation16_spill] sm:$0xff] }
 0x4d2   :  { %v1698_v63 = vpack.c.bf16 %v1606_v42, %v1602_v25  ;;  %v1593_v30 = vpop.permute.xlu0 %1592  ;;  %v1699_v45 = vpack.c.bf16 %v1607_v27, %v1603_v19  ;;  %v1604_v24 = vmul.f32 %v1594_v1, %v5651_v57  ;;  %v1605_v40 = vmul.f32 %v1600_v47, %v5652_v12  ;;  %v5659_v42 = vld [vmem:[#allocation18_spill] sm:$0xff] }
 0x4d3   :  { %v1595_v31 = vsel %vm244_vm6, %v5648_v3, %v1593_v30  ;;  %v1601_v20 = vsel %vm244_vm6, %v1593_v30, %v5649_v22 }
 0x4d4   :  { %v1608_v16 = vmul.f32 %v1595_v31, %v5651_v57  ;;  %v1609_v60 = vmul.f32 %v1601_v20, %v5652_v12  ;;  %v1615_v23 = vpop.permute.xlu1 %1614  ;;  %1733 = vmatprep.subr.bf16.mxu0 %v1699_v45  ;;  %v5661_v45 = vld [vmem:[#allocation8_spill] sm:$0xff]  ;;  %v5662_v20 = vld [vmem:[#allocation67_spill] sm:$0xff] }
 0x4d5   :  { %v1628_v4 = vsel %vm277_vm5, %v1615_v23, %v5653_v21  ;;  %v1630_v48 = vsel %vm277_vm5, %v5654_v38, %v1615_v23  ;;  %1734 = vmatpush1.bf16.msra.mxu0 %v1698_v63  ;;  %v5663_v23 = vld [vmem:[#allocation31_spill] sm:$0xff] }
 0x4d6   :  { %v1700_v62 = vpack.c.bf16 %v1608_v16, %v1604_v24  ;;  %v1617_v52 = vpop.permute.xlu0 %1616  ;;  %v1701_v2 = vpack.c.bf16 %v1609_v60, %v1605_v40  ;;  %v1634_v51 = vmul.f32 %v1630_v48, %v5657_v14  ;;  %v1635_v50 = vmul.f32 %v1628_v4, %v5658_v54  ;;  %v5664_v4 = vld [vmem:[#allocation66_spill] sm:$0xff]  ;;  %v5665_v48 = vld [vmem:[#allocation61_spill] sm:$0xff] }
 0x4d7   :  { %v1629_v0 = vsel %vm277_vm5, %v1617_v52, %v5655_v13  ;;  %v1631_v11 = vsel %vm277_vm5, %v5656_v61, %v1617_v52  ;;  %v5666_v52 = vld [vmem:[#allocation60_spill] sm:$0xff] }
 0x4d8   :  { %v1638_v59 = vmul.f32 %v1631_v11, %v5657_v14  ;;  %v1639_v49 = vmul.f32 %v1629_v0, %v5658_v54  ;;  %v1623_v37 = vpop.permute.xlu1 %1622  ;;  %1774 = vmatprep.subr.bf16.mxu1 %v1701_v2 }
 0x4d9   :  { %v1626_v55 = vsel %vm277_vm5, %v5653_v21, %v1623_v37  ;;  %v1632_v25 = vsel %vm277_vm5, %v1623_v37, %v5654_v38  ;;  %1775 = vmatpush1.bf16.msra.mxu1 %v1700_v62 }
 0x4da   :  { %v1702_v3 = vpack.c.bf16 %v1638_v59, %v1634_v51  ;;  %v1625_v43 = vpop.permute.xlu0 %1624  ;;  %v1703_v22 = vpack.c.bf16 %v1639_v49, %v1635_v50  ;;  %v1636_v27 = vmul.f32 %v1626_v55, %v5659_v42  ;;  %v1637_v1 = vmul.f32 %v1632_v25, %v5660_v56  ;;  %v5667_v25 = vld [vmem:[#allocation62_spill] sm:$0xff] }
 0x4db   :  { %v1627_v28 = vsel %vm277_vm5, %v5655_v13, %v1625_v43  ;;  %v1633_v19 = vsel %vm277_vm5, %v1625_v43, %v5656_v61  ;;  %v5668_v43 = vld [vmem:[#allocation63_spill] sm:$0xff] }
 0x4dc   :  { %v1640_v47 = vmul.f32 %v1627_v28, %v5659_v42  ;;  %v1641_v63 = vmul.f32 %v1633_v19, %v5660_v56  ;;  %v1647_v30 = vpop.permute.xlu1 %1646  ;;  %1735 = vmatprep.subr.bf16.mxu0 %v1703_v22  ;;  %v5669_v28 = vld [vmem:[#allocation44_spill] sm:$0xff] }
 0x4dd   :  { %v1660_v31 = vsel %vm310_vm7, %v1647_v30, %v5661_v45  ;;  %v1662_v24 = vsel %vm310_vm7, %v5662_v20, %v1647_v30  ;;  %1736 = vmatpush1.bf16.msra.mxu0 %v1702_v3  ;;  %v2408_v3 = vcombine.low %v5667_v25, %v5667_v25  ;;  %v5670_v30 = vmov 0  }
 0x4de   :  { %v1704_v40 = vpack.c.bf16 %v1640_v47, %v1636_v27  ;;  %v1649_v16 = vpop.permute.xlu0 %1648  ;;  %v1705_v60 = vpack.c.bf16 %v1641_v63, %v1637_v1  ;;  %v1666_v62 = vmul.f32 %v5665_v48, %v1662_v24  ;;  %v1667_v2 = vmul.f32 %v5666_v52, %v1660_v31 }
 0x4df   :  { %v1661_v21 = vsel %vm310_vm7, %v1649_v16, %v5663_v23  ;;  %v1663_v38 = vsel %vm310_vm7, %v5664_v4, %v1649_v16 }
 0x4e0   :  { %v1670_v13 = vmul.f32 %v5665_v48, %v1663_v38  ;;  %v1671_v0 = vmul.f32 %v5666_v52, %v1661_v21  ;;  %v1655_v61 = vpop.permute.xlu1 %1654  ;;  %1776 = vmatprep.subr.bf16.mxu1 %v1705_v60 }
 0x4e1   :  { %v1658_v11 = vsel %vm310_vm7, %v5661_v45, %v1655_v61  ;;  %v1664_v51 = vsel %vm310_vm7, %v1655_v61, %v5662_v20  ;;  %1777 = vmatpush1.bf16.msra.mxu1 %v1704_v40 }
 0x4e2   :  { %v1706_v50 = vpack.c.bf16 %v1670_v13, %v1666_v62  ;;  %v1657_v59 = vpop.permute.xlu0 %1656  ;;  %v1707_v49 = vpack.c.bf16 %v1671_v0, %v1667_v2  ;;  %v1668_v22 = vmul.f32 %v5668_v43, %v1658_v11  ;;  %v1669_v19 = vmul.f32 %v5669_v28, %v1664_v51 }
 0x4e3   :  { %v1659_v37 = vsel %vm310_vm7, %v5663_v23, %v1657_v59  ;;  %v1665_v55 = vsel %vm310_vm7, %v1657_v59, %v5664_v4 }
 0x4e4   :  { %v1672_v27 = vmul.f32 %v5668_v43, %v1659_v37  ;;  %v1673_v1 = vmul.f32 %v5669_v28, %v1665_v55  ;;  %1737 = vmatprep.subr.bf16.mxu0 %v1707_v49  ;;  %v2073_v49 = vld [vmem:[%s5295_s12] sm:$0xf] }
 0x4e5   :  { %1738 = vmatpush1.bf16.msra.mxu0 %v1706_v50  ;;  %v2083_v37 = vld [vmem:[%s5296_s13] sm:$0xf] }
 0x4e6   :  { %v1708_v47 = vpack.c.bf16 %v1672_v27, %v1668_v22  ;;  %v1709_v63 = vpack.c.bf16 %v1673_v1, %v1669_v19  ;;  %v2302_v55 = vld [vmem:[%s5297_s16] sm:$0xf] }
 0x4e8   :  { %1754 = vmatmul.mubr.bf16.vlgmr.msra.gmra.mrb[12].mxu0 %v2408_v3  ;;  %1778 = vmatprep.subr.bf16.mxu1 %v1709_v63 }
 0x4e9   :  { %1779 = vmatpush1.bf16.msra.mxu1 %v1708_v47  ;;  %2023 = vmatprep.mubr.bf16.mxu0 %v5670_v30  ;;  %v5671_v47 = vld [vmem:[#allocation2_spill] sm:$0xff] }
 0x4ec   :  { %1795 = vmatmul.mubr.bf16.vlgmr.msra.gmra.mrb[12].mxu1 %v2408_v3 }
 0x4ed   :  { %2064 = vmatprep.mubr.bf16.mxu1 %v5670_v30 }
 0x4f1   :  { %v1807_v45 = vpop.permute.xlu1 %1806 }
 0x4f3   :  { %v1817_v40 = vpop.permute.xlu0 %1816 }
 0x5bb   :  { %v1755_v31 = vpop.f32.mrb[12].mxu0 }
 0x5bc   :  { %v1809_v20 = vmul.f32 %v1807_v45, %v1755_v31  ;;  %v1757_v24 = vpop.f32.mrb[13].mxu0 }
 0x5bd   :  { %v1810_v16 = vmul.f32 %v1807_v45, %v1757_v24  ;;  %v1759_v60 = vpop.f32.mrb[14].mxu0 }
 0x5be   :  { %v1819_v23 = vadd.f32 %v1817_v40, %v1809_v20  ;;  %v1760_v21 = vpop.f32.mrb[15].mxu0 }
 0x5bf   :  { %v1820_v4 = vadd.f32 %v1817_v40, %v1810_v16  ;;  %v1796_v38 = vpop.f32.mrb[12].mxu1 }
 0x5c0   :  { %v4887_v48 = vmax.f32 %v1819_v23, 0.0  ;;  %v1811_v62 = vmul.f32 %v1807_v45, %v1796_v38  ;;  %v1798_v52 = vpop.f32.mrb[13].mxu1 }
 0x5c1   :  { %v4889_v2 = vmax.f32 %v1820_v4, 0.0  ;;  %v1812_v13 = vmul.f32 %v1807_v45, %v1798_v52  ;;  %v1800_v0 = vpop.f32.mrb[14].mxu1 }
 0x5c2   :  { %v1821_v61 = vadd.f32 %v1817_v40, %v1811_v62  ;;  %v1801_v11 = vpop.f32.mrb[15].mxu1  ;;  %1827 = vrot.lane.b32.xlu1 %v4887_v48, %s2596_s29 }
 0x5c3   :  { %v1822_v51 = vadd.f32 %v1817_v40, %v1812_v13  ;;  %1829 = vrot.lane.b32.xlu0 %v4889_v2, %s2596_s29 }
 0x5c4   :  { %v4895_v50 = vmax.f32 %v1821_v61, 0.0 }
 0x5c5   :  { %v4897_v59 = vmax.f32 %v1822_v51, 0.0 }
 0x5c6   :  { %1831 = vrot.lane.b32.xlu1 %v4895_v50, %s2596_s29 }
 0x5c7   :  { %1833 = vrot.lane.b32.xlu0 %v4897_v59, %s2596_s29 }
 0x5ca   :  { %1843 = vrot.lane.b32.xlu1 %v4887_v48, %s2597_s2 }
 0x5cb   :  { %1845 = vrot.lane.b32.xlu0 %v4889_v2, %s2597_s2 }
 0x5ce   :  { %1847 = vrot.lane.b32.xlu1 %v4895_v50, %s2597_s2 }
 0x5cf   :  { %1849 = vrot.lane.b32.xlu0 %v4897_v59, %s2597_s2 }
 0x5d2   :  { %1859 = vrot.lane.b32.xlu1 %v4887_v48, %s2598_s20 }
 0x5d3   :  { %1861 = vrot.lane.b32.xlu0 %v4889_v2, %s2598_s20 }
 0x5d6   :  { %1863 = vrot.lane.b32.xlu1 %v4895_v50, %s2598_s20 }
 0x5d7   :  { %1865 = vrot.lane.b32.xlu0 %v4897_v59, %s2598_s20 }
 0x5da   :  { %1875 = vrot.lane.b32.xlu1 %v4887_v48, %s2599_s21 }
 0x5db   :  { %1877 = vrot.lane.b32.xlu0 %v4889_v2, %s2599_s21 }
 0x5de   :  { %1879 = vrot.lane.b32.xlu1 %v4895_v50, %s2599_s21 }
 0x5df   :  { %1881 = vrot.lane.b32.xlu0 %v4897_v59, %s2599_s21 }
 0x5e2   :  { %1891 = vrot.lane.b32.xlu1 %v4887_v48, %s2600_s22 }
 0x5e3   :  { %1893 = vrot.lane.b32.xlu0 %v4889_v2, %s2600_s22 }
 0x5e6   :  { %1895 = vrot.lane.b32.xlu1 %v4895_v50, %s2600_s22 }
 0x5e7   :  { %1897 = vrot.lane.b32.xlu0 %v4897_v59, %s2600_s22 }
 0x5ea   :  { %1907 = vrot.lane.b32.xlu1 %v4887_v48, %s5467_s0 }
 0x5eb   :  { %1909 = vrot.lane.b32.xlu0 %v4889_v2, %s5467_s0 }
 0x5ee   :  { %1911 = vrot.lane.b32.xlu1 %v4895_v50, %s5467_s0 }
 0x5ef   :  { %1913 = vrot.lane.b32.xlu0 %v4897_v59, %s5467_s0 }
 0x5f2   :  { %1923 = vrot.lane.b32.xlu1 %v4887_v48, %s5468_s30 }
 0x5f3   :  { %1925 = vrot.lane.b32.xlu0 %v4889_v2, %s5468_s30 }
 0x5f6   :  { %1927 = vrot.lane.b32.xlu1 %v4895_v50, %s5468_s30 }
 0x5f7   :  { %1929 = vrot.lane.b32.xlu0 %v4897_v59, %s5468_s30 }
 0x5fa   :  { %1939 = vrot.lane.b32.xlu1 %v4887_v48, %s5469_s18 }
 0x5fb   :  { %1941 = vrot.lane.b32.xlu0 %v4889_v2, %s5469_s18 }
 0x5fe   :  { %1943 = vrot.lane.b32.xlu1 %v4895_v50, %s5469_s18 }
 0x5ff   :  { %1945 = vrot.lane.b32.xlu0 %v4897_v59, %s5469_s18 }
 0x602   :  { %2076 = vperm.xlu1 %2579, %v2073_v49  }
 0x603   :  { %2086 = vperm.xlu0 %2578, %v2083_v37  }
 0x606   :  { %2305 = vperm.xlu1 %2579, %v2302_v55  }
 0x634   :  { %v1828_v25 = vpop.permute.xlu1 %1827 }
 0x635   :  { %v1830_v3 = vpop.permute.xlu0 %1829 }
 0x636   :  { %v1837_v28 = vsel %vm79_vm0, %v1828_v25, %v1830_v3 }
 0x637   :  { %v1840_v63 = vmul.f32 %v1837_v28, %v5671_v47 }
 0x638   :  { %v1832_v43 = vpop.permute.xlu1 %1831 }
 0x639   :  { %v1834_v22 = vpop.permute.xlu0 %1833  ;;  %v1836_v24 = vsel %vm79_vm0, %v1830_v3, %v1832_v43 }
 0x63a   :  { %v1835_v45 = vsel %vm79_vm0, %v1832_v43, %v1834_v22  ;;  %v1838_v31 = vsel %vm79_vm0, %v1834_v22, %v1828_v25  ;;  %v1841_v13 = vmul.f32 %v1836_v24, %v5640_v34 }
 0x63b   :  { %v1839_v4 = vmul.f32 %v1838_v31, %v5641_v7  ;;  %v1842_v38 = vmul.f32 %v1835_v45, %v5642_v39 }
 0x63c   :  { %v1844_v19 = vpop.permute.xlu1 %1843 }
 0x63d   :  { %v1846_v27 = vpop.permute.xlu0 %1845 }
 0x63e   :  { %v1853_v1 = vsel %vm112_vm1, %v1844_v19, %v1846_v27 }
 0x63f   :  { %v1856_v30 = vmul.f32 %v1853_v1, %v2836_v26 }
 0x640   :  { %v1848_v20 = vpop.permute.xlu1 %1847 }
 0x641   :  { %v1852_v40 = vsel %vm112_vm1, %v1846_v27, %v1848_v20  ;;  %v1850_v16 = vpop.permute.xlu0 %1849  ;;  %v1956_v60 = vpack.c.bf16 %v1856_v30, %v1840_v63 }
 0x642   :  { %v1857_v23 = vmul.f32 %v1852_v40, %v2869_v41  ;;  %v1851_v26 = vsel %vm112_vm1, %v1848_v20, %v1850_v16  ;;  %v1854_v21 = vsel %vm112_vm1, %v1850_v16, %v1844_v19 }
 0x643   :  { %v1855_v62 = vmul.f32 %v1854_v21, %v2849_v32  ;;  %v1858_v52 = vmul.f32 %v1851_v26, %v2859_v36  ;;  %1991 = vmatprep.subr.bf16.mxu0 %v1956_v60 }
 0x644   :  { %v1860_v0 = vpop.permute.xlu1 %1859  ;;  %v1957_v51 = vpack.c.bf16 %v1857_v23, %v1841_v13 }
 0x645   :  { %v1955_v61 = vpack.c.bf16 %v1855_v62, %v1839_v4  ;;  %v1862_v41 = vpop.permute.xlu0 %1861  ;;  %v1958_v11 = vpack.c.bf16 %v1858_v52, %v1842_v38 }
 0x646   :  { %v1869_v39 = vsel %vm145_vm2, %v1860_v0, %v1862_v41 }
 0x647   :  { %1992 = vmatpush1.bf16.msra.mxu0 %v1955_v61  ;;  %2032 = vmatprep.subr.bf16.mxu1 %v1958_v11  ;;  %v1872_v34 = vmul.f32 %v1869_v39, %v2890_v5 }
 0x648   :  { %v1864_v49 = vpop.permute.xlu1 %1863  ;;  %2033 = vmatpush1.bf16.msra.mxu1 %v1957_v51 }
 0x649   :  { %v1866_v37 = vpop.permute.xlu0 %1865  ;;  %v1868_v22 = vsel %vm145_vm2, %v1862_v41, %v1864_v49 }
 0x64a   :  { %v1867_v25 = vsel %vm145_vm2, %v1864_v49, %v1866_v37  ;;  %v1870_v3 = vsel %vm145_vm2, %v1866_v37, %v1860_v0  ;;  %v1873_v31 = vmul.f32 %v1868_v22, %v2901_v9 }
 0x64b   :  { %v1871_v47 = vmul.f32 %v1870_v3, %v2898_v8  ;;  %v1874_v63 = vmul.f32 %v1867_v25, %v2904_v10 }
 0x64c   :  { %v1876_v7 = vpop.permute.xlu1 %1875 }
 0x64d   :  { %v1878_v32 = vpop.permute.xlu0 %1877 }
 0x64e   :  { %v1885_v36 = vsel %vm178_vm3, %v1876_v7, %v1878_v32 }
 0x64f   :  { %v1888_v55 = vmul.f32 %v1885_v36, %v2893_v6 }
 0x650   :  { %v1880_v43 = vpop.permute.xlu1 %1879 }
 0x651   :  { %v1884_v28 = vsel %vm178_vm3, %v1878_v32, %v1880_v43  ;;  %v1882_v19 = vpop.permute.xlu0 %1881  ;;  %v1960_v27 = vpack.c.bf16 %v1888_v55, %v1872_v34 }
 0x652   :  { %v1889_v1 = vmul.f32 %v1884_v28, %v2914_v18  ;;  %v1883_v5 = vsel %vm178_vm3, %v1880_v43, %v1882_v19  ;;  %v1886_v6 = vsel %vm178_vm3, %v1882_v19, %v1876_v7 }
 0x653   :  { %v1887_v30 = vmul.f32 %v1886_v6, %v5532_v46  ;;  %v1890_v45 = vmul.f32 %v1883_v5, %v5643_v15  ;;  %1993 = vmatprep.subr.bf16.mxu0 %v1960_v27  ;;  %v2114_v5 = vld [vmem:[%s5298_s14 + $0x88] sm:$0xff] }
 0x654   :  { %v1892_v20 = vpop.permute.xlu1 %1891  ;;  %v1961_v16 = vpack.c.bf16 %v1889_v1, %v1873_v31  ;;  %v2113_v1 = vld [vmem:[%s5298_s14 + $0x80] sm:$0xff] }
 0x655   :  { %v1959_v24 = vpack.c.bf16 %v1887_v30, %v1871_v47  ;;  %v1894_v18 = vpop.permute.xlu0 %1893  ;;  %v1962_v40 = vpack.c.bf16 %v1890_v45, %v1874_v63  ;;  %v2593_v47 = vld [vmem:[%s5288_s1 + $0x28] ss:$0 sm:$0xff]  ;;  %v2145_v31 = vld [vmem:[%s5298_s14 + $0x180] sm:$0xff] }
 0x656   :  { %v1901_v60 = vsel %vm211_vm4, %v1892_v20, %v1894_v18 }
 0x657   :  { %1994 = vmatpush1.bf16.msra.mxu0 %v1959_v24  ;;  %2034 = vmatprep.subr.bf16.mxu1 %v1962_v40  ;;  %v1903_v10 = vmul.f32 %v1901_v60, %v5546_v33  ;;  %v2594_v24 = vld [vmem:[%s5288_s1 + $0x30] ss:$0 sm:$0xff]  ;;  %v2595_v40 = vld [vmem:[%s5288_s1 + $0x38] ss:$0 sm:$0xff]  ;;  %v2495_v60 = vpack.c.bf16 %v2114_v5, %v2113_v1  ;;  %v2154_v1 = vld [vmem:[%s5298_s14 + $0x1c8] sm:$0xff] }
 0x658   :  { %v1896_v8 = vpop.permute.xlu1 %1895  ;;  %2035 = vmatpush1.bf16.msra.mxu1 %v1961_v16 }
 0x659   :  { %v1900_v46 = vsel %vm211_vm4, %v1894_v18, %v1896_v8  ;;  %v1898_v15 = vpop.permute.xlu0 %1897  ;;  %v1963_v33 = vpack.c.bf16 %v1903_v10, %v4887_v48  ;;  %v2098_v10 = vld [vmem:[%s5298_s14 + $0x8] sm:$0xff] }
 0x65a   :  { %v1904_v9 = vmul.f32 %v1900_v46, %v5552_v53  ;;  %v1899_v23 = vsel %vm211_vm4, %v1896_v8, %v1898_v15  ;;  %v1902_v26 = vsel %vm211_vm4, %v1898_v15, %v1892_v20  ;;  %v2146_v20 = vld [vmem:[%s5298_s14 + $0x188] sm:$0xff]  ;;  %v2097_v8 = vld [vmem:[%s5298_s14] sm:$0xff] }
 0x65b   :  { %v1905_v21 = vmul.f32 %v1899_v23, %v5558_v44  ;;  %v1906_v4 = vmul.f32 %v1902_v26, %v5561_v29  ;;  %v2129_v46 = vld [vmem:[%s5298_s14 + $0x100] sm:$0xff]  ;;  %v2527_v23 = vpack.c.bf16 %v2146_v20, %v2145_v31  ;;  %v2130_v26 = vld [vmem:[%s5298_s14 + $0x108] sm:$0xff] }
 0x65c   :  { %v1908_v38 = vpop.permute.xlu1 %1907  ;;  %v1964_v62 = vpack.c.bf16 %v1904_v9, %v4889_v2  ;;  %v2138_v20 = vld [vmem:[%s5298_s14 + $0x148] sm:$0xff] }
 0x65d   :  { %v1965_v52 = vpack.c.bf16 %v1905_v21, %v4895_v50  ;;  %v1910_v13 = vpop.permute.xlu0 %1909  ;;  %v1966_v53 = vpack.c.bf16 %v1906_v4, %v4897_v59  ;;  %v2115_v21 = vld [vmem:[%s5298_s14 + $0x90] sm:$0xff]  ;;  %v2116_v4 = vld [vmem:[%s5298_s14 + $0x98] sm:$0xff] }
 0x65e   :  { %1995 = vmatprep.subr.bf16.mxu0 %v1964_v62  ;;  %v1917_v29 = vsel %vm244_vm6, %v1908_v38, %v1910_v13  ;;  %v2147_v62 = vld [vmem:[%s5298_s14 + $0x190] sm:$0xff] }
 0x65f   :  { %1996 = vmatpush1.bf16.msra.mxu0 %v1963_v33  ;;  %2036 = vmatprep.subr.bf16.mxu1 %v1966_v53  ;;  %v1919_v51 = vmul.f32 %v1917_v29, %v5647_v35  ;;  %v2148_v33 = vld [vmem:[%s5298_s14 + $0x198] sm:$0xff]  ;;  %v2497_v53 = vpack.c.bf16 %v2098_v10, %v2097_v8  ;;  %v2131_v29 = vld [vmem:[%s5298_s14 + $0x110] sm:$0xff] }
 0x660   :  { %v1912_v0 = vpop.permute.xlu1 %1911  ;;  %2037 = vmatpush1.bf16.msra.mxu1 %v1965_v52  ;;  %v2107_v10 = vld [vmem:[%s5298_s14 + $0x50] sm:$0xff] }
 0x661   :  { %v1914_v61 = vpop.permute.xlu0 %1913  ;;  %v1916_v48 = vsel %vm244_vm6, %v1910_v13, %v1912_v0  ;;  %v1975_v13 = vld [vmem:[%s5299_s11] sm:$0x3] }
 0x662   :  { %v1915_v50 = vsel %vm244_vm6, %v1912_v0, %v1914_v61  ;;  %v1918_v59 = vsel %vm244_vm6, %v1914_v61, %v1908_v38  ;;  %v1920_v7 = vmul.f32 %v1916_v48, %v5650_v58  ;;  %v2529_v0 = vpack.c.bf16 %v2130_v26, %v2129_v46  ;;  %v2132_v48 = vld [vmem:[%s5298_s14 + $0x118] sm:$0xff] }
 0x663   :  { %v1921_v55 = vmul.f32 %v1915_v50, %v5651_v57  ;;  %v1922_v35 = vmul.f32 %v1918_v59, %v5652_v12  ;;  %v2592_v57 = vld [vmem:[%s5288_s1 + $0x20] ss:$0 sm:$0xff]  ;;  %v2499_v61 = vpack.c.bf16 %v2116_v4, %v2115_v21  ;;  %v2118_v59 = vld [vmem:[%s5298_s14 + $0xa8] sm:$0xff]  ;;  %v2108_v46 = vld [vmem:[%s5298_s14 + $0x58] sm:$0xff] }
 0x664   :  { %v1924_v41 = vpop.permute.xlu1 %1923  ;;  %v2117_v50 = vld [vmem:[%s5298_s14 + $0xa0] sm:$0xff]  ;;  %v2517_v26 = vpack.c.bf16 %v2108_v46, %v2107_v10 }
 0x665   :  { %v1926_v44 = vpop.permute.xlu0 %1925  ;;  %v2125_v4 = vld [vmem:[%s5298_s14 + $0xe0] sm:$0xff] }
 0x666   :  { %v1933_v2 = vsel %vm277_vm5, %v1924_v41, %v1926_v44 }
 0x667   :  { %v1935_v49 = vmul.f32 %v1933_v2, %v5657_v14  ;;  %v2531_v2 = vpack.c.bf16 %v2148_v33, %v2147_v62  ;;  %v2109_v33 = vld [vmem:[%s5298_s14 + $0x60] sm:$0xff] }
 0x668   :  { %v1928_v11 = vpop.permute.xlu1 %1927 }
 0x669   :  { %v1932_v37 = vsel %vm277_vm5, %v1926_v44, %v1928_v11  ;;  %v1930_v39 = vpop.permute.xlu0 %1929  ;;  %v1967_v22 = vpack.c.bf16 %v1935_v49, %v1919_v51  ;;  %v2100_v44 = vld [vmem:[%s5298_s14 + $0x18] sm:$0xff]  ;;  %v2150_v51 = vld [vmem:[%s5298_s14 + $0x1a8] sm:$0xff] }
 0x66a   :  { %v1936_v32 = vmul.f32 %v1932_v37, %v5658_v54  ;;  %v1931_v36 = vsel %vm277_vm5, %v1928_v11, %v1930_v39  ;;  %v1934_v34 = vsel %vm277_vm5, %v1930_v39, %v1924_v41  ;;  %v2099_v41 = vld [vmem:[%s5298_s14 + $0x10] sm:$0xff]  ;;  %v2149_v11 = vld [vmem:[%s5298_s14 + $0x1a0] sm:$0xff]  ;;  %v2533_v37 = vpack.c.bf16 %v2132_v48, %v2131_v29  ;;  %v2128_v48 = vld [vmem:[%s5298_s14 + $0xf8] sm:$0xff] }
 0x66b   :  { %v1937_v14 = vmul.f32 %v1931_v36, %v5659_v42  ;;  %v1938_v25 = vmul.f32 %v1934_v34, %v5660_v56  ;;  %v2501_v49 = vpack.c.bf16 %v2100_v44, %v2099_v41  ;;  %v2503_v39 = vpack.c.bf16 %v2118_v59, %v2117_v50  ;;  %v2133_v36 = vld [vmem:[%s5298_s14 + $0x120] sm:$0xff]  ;;  %v2142_v41 = vld [vmem:[%s5298_s14 + $0x168] sm:$0xff]  ;;  %v2111_v59 = vld [vmem:[%s5298_s14 + $0x70] sm:$0xff] }
 0x66c   :  { %v1940_v3 = vpop.permute.xlu1 %1939  ;;  %v1968_v43 = vpack.c.bf16 %v1936_v32, %v1920_v7  ;;  %v2101_v7 = vld [vmem:[%s5298_s14 + $0x20] sm:$0xff]  ;;  %v2102_v32 = vld [vmem:[%s5298_s14 + $0x28] sm:$0xff]  ;;  %v2535_v34 = vpack.c.bf16 %v2150_v51, %v2149_v11  ;;  %v2112_v11 = vld [vmem:[%s5298_s14 + $0x78] sm:$0xff] }
 0x66d   :  { %v1969_v58 = vpack.c.bf16 %v1937_v14, %v1921_v55  ;;  %v1942_v28 = vpop.permute.xlu0 %1941  ;;  %v1970_v54 = vpack.c.bf16 %v1938_v25, %v1922_v35  ;;  %v2134_v55 = vld [vmem:[%s5298_s14 + $0x128] sm:$0xff]  ;;  %v2119_v35 = vld [vmem:[%s5298_s14 + $0xb0] sm:$0xff]  ;;  %v2120_v14 = vld [vmem:[%s5298_s14 + $0xb8] sm:$0xff] }
 0x66e   :  { %v1949_v19 = vsel %vm310_vm7, %v1940_v3, %v1942_v28  ;;  %1997 = vmatprep.subr.bf16.mxu0 %v1968_v43  ;;  %v2151_v25 = vld [vmem:[%s5298_s14 + $0x1b0] sm:$0xff]  ;;  %v2505_v43 = vpack.c.bf16 %v2102_v32, %v2101_v7  ;;  %v2144_v7 = vld [vmem:[%s5298_s14 + $0x178] sm:$0xff] }
 0x66f   :  { %v1951_v27 = vmul.f32 %v2592_v57, %v1949_v19  ;;  %1998 = vmatpush1.bf16.msra.mxu0 %v1967_v22  ;;  %2038 = vmatprep.subr.bf16.mxu1 %v1970_v54  ;;  %v2537_v22 = vpack.c.bf16 %v2134_v55, %v2133_v36  ;;  %v2104_v54 = vld [vmem:[%s5298_s14 + $0x38] sm:$0xff]  ;;  %v2135_v19 = vld [vmem:[%s5298_s14 + $0x130] sm:$0xff] }
 0x670   :  { %v1944_v12 = vpop.permute.xlu1 %1943  ;;  %2039 = vmatpush1.bf16.msra.mxu1 %v1969_v58  ;;  %v2507_v58 = vpack.c.bf16 %v2120_v14, %v2119_v35  ;;  %v2159_v51 = vld [vmem:[%s5298_s14 + $0x1f0] sm:$0xff] }
 0x671   :  { %v1948_v42 = vsel %vm310_vm7, %v1942_v28, %v1944_v12  ;;  %v1946_v56 = vpop.permute.xlu0 %1945  ;;  %v1971_v6 = vpack.c.bf16 %v1951_v27, %v1951_v27  ;;  %v2103_v28 = vld [vmem:[%s5298_s14 + $0x30] sm:$0xff]  ;;  %v2136_v27 = vld [vmem:[%s5298_s14 + $0x138] sm:$0xff] }
 0x672   :  { %v1952_v63 = vmul.f32 %v2593_v47, %v1948_v42  ;;  %v1947_v30 = vsel %vm310_vm7, %v1944_v12, %v1946_v56  ;;  %v1950_v45 = vsel %vm310_vm7, %v1946_v56, %v1940_v3  ;;  %v2152_v3 = vld [vmem:[%s5298_s14 + $0x1b8] sm:$0xff]  ;;  %v2121_v12 = vld [vmem:[%s5298_s14 + $0xc0] sm:$0xff]  ;;  %v2122_v42 = vld [vmem:[%s5298_s14 + $0xc8] sm:$0xff]  ;;  %v2509_v5 = vpack.c.bf16 %v2104_v54, %v2103_v28 }
 0x673   :  { %v1953_v18 = vmul.f32 %v2594_v24, %v1947_v30  ;;  %v1954_v16 = vmul.f32 %v2595_v40, %v1950_v45  ;;  %v1980_v38 = vsel %vm376_vm8, %v1971_v6, 0  ;;  %v2539_v57 = vpack.c.bf16 %v2152_v3, %v2151_v25  ;;  %v2153_v56 = vld [vmem:[%s5298_s14 + $0x1c0] sm:$0xff]  ;;  %v2106_v30 = vld [vmem:[%s5298_s14 + $0x48] sm:$0xff]  ;;  %v2123_v24 = vld [vmem:[%s5298_s14 + $0xd0] sm:$0xff] }
 0x674   :  { %v1972_v17 = vpack.c.bf16 %v1952_v63, %v1952_v63  ;;  %v2541_v6 = vpack.c.bf16 %v2136_v27, %v2135_v19  ;;  %v2511_v47 = vpack.c.bf16 %v2122_v42, %v2121_v12  ;;  %v2105_v63 = vld [vmem:[%s5298_s14 + $0x40] sm:$0xff]  ;;  %v2543_v31 = vpack.c.bf16 %v2154_v1, %v2153_v56  ;;  %v2155_v40 = vld [vmem:[%s5298_s14 + $0x1d0] sm:$0xff] }
 0x675   :  { %v1973_v15 = vpack.c.bf16 %v1953_v18, %v1953_v18  ;;  %v1974_v9 = vpack.c.bf16 %v1954_v16, %v1954_v16  ;;  %v2137_v45 = vld [vmem:[%s5298_s14 + $0x140] sm:$0xff]  ;;  %v2124_v18 = vld [vmem:[%s5298_s14 + $0xd8] sm:$0xff] }
 0x676   :  { %2412 = vmatprep.subr.msk.bf16.mxu0 %vm376_vm8, %v1972_v17  ;;  %v2156_v16 = vld [vmem:[%s5298_s14 + $0x1d8] sm:$0xff]  ;;  %v2513_v17 = vpack.c.bf16 %v2106_v30, %v2105_v63  ;;  %v2515_v8 = vpack.c.bf16 %v2124_v18, %v2123_v24  ;;  %v2605_v30 = vmov 0.0  }
 0x677   :  { %2000 = vmatpush1.bf16.msra.mxu0 %v1980_v38  ;;  %2414 = vmatprep.subr.msk.bf16.mxu1 %vm376_vm8, %v1974_v9  ;;  %v1986_v52 = vsel %vm376_vm8, %v1973_v15, 0  ;;  %v2547_v15 = vpack.c.bf16 %v2156_v16, %v2155_v40  ;;  %v2139_v9 = vld [vmem:[%s5298_s14 + $0x150] sm:$0xff]  ;;  %v2126_v38 = vld [vmem:[%s5298_s14 + $0xe8] sm:$0xff] }
 0x678   :  { %2041 = vmatpush1.bf16.msra.mxu1 %v1986_v52  ;;  %2496 = vmatprep.subr.bf16.mxu0 %v2495_v60  ;;  %v2545_v60 = vpack.c.bf16 %v2138_v20, %v2137_v45  ;;  %v2519_v62 = vpack.c.bf16 %v2126_v38, %v2125_v4  ;;  %v2110_v52 = vld [vmem:[%s5298_s14 + $0x68] sm:$0xff] }
 0x679   :  { %2528 = vmatprep.subr.bf16.mxu1 %v2527_v23  ;;  %v2140_v23 = vld [vmem:[%s5298_s14 + $0x158] sm:$0xff] }
 0x67a   :  { %2413 = vmatmul.mubr.msk.bf16.vlgmr.msra.gmra.mrb[16].mxu0 %vm369_vm9, %v1975_v13  ;;  %v2549_v21 = vpack.c.bf16 %v2140_v23, %v2139_v9 }
 0x67b   :  { %2415 = vmatmul.mubr.msk.bf16.vlgmr.msra.gmra.mrb[16].mxu1 %vm369_vm9, %v1975_v13  ;;  %2498 = vmatpush3.bf16.msra.mxu0 %v2497_v53  ;;  %v2157_v13 = vld [vmem:[%s5298_s14 + $0x1e0] sm:$0xff]  ;;  %v2521_v53 = vpack.c.bf16 %v2110_v52, %v2109_v33 }
 0x67c   :  { %2530 = vmatpush3.bf16.msra.mxu1 %v2529_v0  ;;  %2500 = vmatprep.subr.bf16.mxu0 %v2499_v61  ;;  %v2158_v0 = vld [vmem:[%s5298_s14 + $0x1e8] sm:$0xff]  ;;  %v2141_v61 = vld [vmem:[%s5298_s14 + $0x160] sm:$0xff] }
 0x67d   :  { %2532 = vmatprep.subr.bf16.mxu1 %v2531_v2  ;;  %v2551_v44 = vpack.c.bf16 %v2158_v0, %v2157_v13  ;;  %v2553_v29 = vpack.c.bf16 %v2142_v41, %v2141_v61  ;;  %v2127_v2 = vld [vmem:[%s5298_s14 + $0xf0] sm:$0xff] }
 0x67e   :  { %v2523_v50 = vpack.c.bf16 %v2128_v48, %v2127_v2 }
 0x67f   :  { %2502 = vmatpush3.bf16.msra.mxu0 %v2501_v49  ;;  %v2525_v49 = vpack.c.bf16 %v2112_v11, %v2111_v59 }
 0x680   :  { %2534 = vmatpush3.bf16.msra.mxu1 %v2533_v37  ;;  %2504 = vmatprep.subr.bf16.mxu0 %v2503_v39  ;;  %v2160_v37 = vld [vmem:[%s5298_s14 + $0x1f8] sm:$0xff]  ;;  %v2143_v39 = vld [vmem:[%s5298_s14 + $0x170] sm:$0xff] }
 0x681   :  { %2536 = vmatprep.subr.bf16.mxu1 %v2535_v34  ;;  %v2555_v32 = vpack.c.bf16 %v2160_v37, %v2159_v51  ;;  %v2557_v36 = vpack.c.bf16 %v2144_v7, %v2143_v39  ;;  %v2077_v34 = vpop.permute.xlu1 %2076 }
 0x682   :  { %v2087_v55 = vpop.permute.xlu0 %2086 }
 0x683   :  { %2506 = vmatpush3.bf16.msra.mxu0 %v2505_v43 }
 0x684   :  { %2538 = vmatpush3.bf16.msra.mxu1 %v2537_v22  ;;  %2508 = vmatprep.subr.bf16.mxu0 %v2507_v58 }
 0x685   :  { %2540 = vmatprep.subr.bf16.mxu1 %v2539_v57 }
 0x687   :  { %2510 = vmatpush3.bf16.msra.mxu0 %v2509_v5 }
 0x688   :  { %2542 = vmatpush3.bf16.msra.mxu1 %v2541_v6  ;;  %2512 = vmatprep.subr.bf16.mxu0 %v2511_v47 }
 0x689   :  { %2544 = vmatprep.subr.bf16.mxu1 %v2543_v31 }
 0x68b   :  { %2514 = vmatpush3.bf16.msra.mxu0 %v2513_v17  ;;  %v2301_v17 = vld [vmem:[%s5300_s15] sm:$0xf] }
 0x68c   :  { %2546 = vmatpush3.bf16.msra.mxu1 %v2545_v60  ;;  %2516 = vmatprep.subr.bf16.mxu0 %v2515_v8  ;;  %v2306_v60 = vpop.permute.xlu1 %2305 }
 0x68d   :  { %2548 = vmatprep.subr.bf16.mxu1 %v2547_v15 }
 0x68f   :  { %2518 = vmatpush3.bf16.msra.mxu0 %v2517_v26 }
 0x690   :  { %2550 = vmatpush3.bf16.msra.mxu1 %v2549_v21  ;;  %2520 = vmatprep.subr.bf16.mxu0 %v2519_v62 }
 0x691   :  { %2552 = vmatprep.subr.bf16.mxu1 %v2551_v44 }
 0x693   :  { %2522 = vmatpush3.bf16.msra.mxu0 %v2521_v53 }
 0x694   :  { %2554 = vmatpush3.bf16.msra.mxu1 %v2553_v29  ;;  %2524 = vmatprep.subr.bf16.mxu0 %v2523_v50 }
 0x695   :  { %2556 = vmatprep.subr.bf16.mxu1 %v2555_v32 }
 0x697   :  { %2526 = vmatpush3.bf16.msra.mxu0 %v2525_v49 }
 0x698   :  { %2558 = vmatpush3.bf16.msra.mxu1 %v2557_v36  ;;  %2490 = vmatprep.subr.mxu0 %v2605_v30 }
 0x74d   :  { %v2025_v35 = vpop.f32.mrb[16].mxu0 }
 0x74e   :  { %v2079_v14 = vmul.f32 %v2077_v34, %v2025_v35  ;;  %v2027_v25 = vpop.f32.mrb[17].mxu0  ;;  %v2066_v3 = vpop.f32.mrb[16].mxu1 }
 0x74f   :  { %v2080_v43 = vmul.f32 %v2077_v34, %v2027_v25  ;;  %v2081_v22 = vmul.f32 %v2077_v34, %v2066_v3  ;;  %v2029_v58 = vpop.f32.mrb[18].mxu0  ;;  %v2068_v28 = vpop.f32.mrb[17].mxu1 }
 0x750   :  { %v2089_v54 = vadd.f32 %v2087_v55, %v2079_v14  ;;  %v2082_v19 = vmul.f32 %v2077_v34, %v2068_v28  ;;  %v2030_v57 = vpop.f32.mrb[19].mxu0  ;;  %v2070_v27 = vpop.f32.mrb[18].mxu1 }
 0x751   :  { %v2090_v12 = vadd.f32 %v2087_v55, %v2080_v43  ;;  %v2091_v42 = vadd.f32 %v2087_v55, %v2081_v22  ;;  %v2071_v56 = vpop.f32.mrb[19].mxu1 }
 0x752   :  { %v2092_v1 = vadd.f32 %v2087_v55, %v2082_v19  ;;  %v2093_v6 = vmax.f32 %v2089_v54, 0.0 }
 0x753   :  { %v2094_v5 = vmax.f32 %v2090_v12, 0.0  ;;  %v2095_v63 = vmax.f32 %v2091_v42, 0.0 }
 0x754   :  { %v2096_v47 = vmax.f32 %v2092_v1, 0.0 }
 0x755   :  { %2225 = vmatprep.mubr.f32.mxu0 %v2094_v5 }
 0x756   :  { %2226 = vmatmul.mubr.f32.vlgmr.msra.gmra.mrb[20].mxu0 %v2093_v6  ;;  %2295 = vmatprep.mubr.f32.mxu1 %v2096_v47 }
 0x757   :  { %2296 = vmatmul.mubr.f32.vlgmr.msra.gmra.mrb[20].mxu1 %v2095_v63  ;;  %2492 = vmatprep.mubr.msk.f32.mxu0 %vm2606_vm12, %v2605_v30 }
 0x829   :  { %v2450_v45 = vpop.f32.mrb[20].mxu0 }
 0x82a   :  { %v2451_v31 = vpop.f32.mrb[21].mxu0  ;;  %v2485_v20 = vpop.f32.mrb[20].mxu1 }
 0x82b   :  { %v2452_v24 = vadd.f32 %v2451_v31, %v2450_v45  ;;  %v2486_v18 = vpop.f32.mrb[21].mxu1 }
 0x82c   :  { %v2487_v40 = vadd.f32 %v2486_v18, %v2485_v20 }
 0x82e   :  { %v2298_v16 = vadd.f32 %v2487_v40, %v2452_v24 }
 0x830   :  { %2491 = vmatpush3.msk.msra.mxu0 %vm376_vm8, %v2298_v16 }
 0x831   :  { %2493 = vmatmul.mubr.msk.f32.vlgmr.msra.gmra.mrb[22].mxu0 %vm2308_vm13, %v2301_v17 }
 0x904   :  { %v2381_v8 = vpop.f32.mrb[22].mxu0 }
 0x905   :  { %v2382_v10 = vadd.f32 %v2381_v8, %v2306_v60  ;;  %v2494_v46 = vpop.f32.mrb[23].mxu0 }
 0x907   :  { %2386 = vst.msk [vmem:[%s5301_s17] sm:$0xf] %vm2385_vm14, %v2382_v10 }

</bundles_post_ra>
